<compile_context>
chip_gen: v7x
topology: tpu7x:2x2x1
jax: 0.10.0
libtpu: 0.0.40
codegen_flags: <defaults>
</compile_context>

<pallas_src>
import math
from functools import partial

import jax
import jax.numpy as jnp
from jax.experimental import pallas as pl
from jax.experimental.pallas import tpu as pltpu

# ---------------------------------------------------------------------------
# Model dimensions (small, consistent with the forward semantics)
# ---------------------------------------------------------------------------
B = 2          # batch
C = 4          # latent channels (SD convention)
H = 16
W = 16
HW = H * W
S_TXT = 8      # text tokens
D_CROSS = 768  # cross-attention dim (hard-coded 768 check in the module)
D_CLIP = 1024  # CLIP image-embed dim (!= 768 -> triggers image_proj_model)
N_TOK = 4      # extra context tokens produced by the image projection
D_M = 64       # attention / timestep-embedding inner dim
HALF = D_M // 2
LN_EPS = 1e-5

TOK_PER_STEP = 2                       # tokens handled per grid step (kernel 1)
N_STEPS = N_TOK // TOK_PER_STEP        # = 2  (keeps both v7x TCs busy)
DW = TOK_PER_STEP * D_CROSS            # = 1536 weight-block / output-block width


# ---------------------------------------------------------------------------
# Kernel 1: ImageProjModel  (Linear + reshape + LayerNorm over last dim)
# ---------------------------------------------------------------------------
def _image_proj_kernel(x_ref, w_ref, b_ref, g_ref, beta_ref, o_ref):
    # x_ref: (B, D_CLIP) bf16; w_ref: (1, D_CLIP, DW) bf16 contiguous block for
    # this step (covers tokens 2t, 2t+1); b_ref: (1, 1, DW) f32;
    # g_ref/beta_ref: (1, D_CROSS) f32; o_ref: (B, DW) lane-dense output block.
    h = jnp.dot(x_ref[...], w_ref[0], preferred_element_type=jnp.float32)
    h = h + b_ref[0]                                    # (B, DW), f32
    for c in range(TOK_PER_STEP):                       # static, unrolled
        hc = h[:, c * D_CROSS:(c + 1) * D_CROSS]        # (B, D_CROSS)
        mean = jnp.mean(hc, axis=-1, keepdims=True)
        var = jnp.mean((hc - mean) ** 2, axis=-1, keepdims=True)  # biased, as torch LN
        normed = (hc - mean) * jax.lax.rsqrt(var + LN_EPS)
        o_ref[:, c * D_CROSS:(c + 1) * D_CROSS] = (
            normed * g_ref[...] + beta_ref[...]).astype(o_ref.dtype)


def image_proj(image_embeds, params):
    out2d = pl.pallas_call(
        _image_proj_kernel,
        out_shape=jax.ShapeDtypeStruct((B, N_TOK * D_CROSS), jnp.float32),
        grid_spec=pltpu.PrefetchScalarGridSpec(
            num_scalar_prefetch=0,
            grid=(N_STEPS,),
            in_specs=[
                pl.BlockSpec((B, D_CLIP), lambda t: (0, 0)),
                # contiguous HBM weight block per step: (1, 1024, 1536) bf16
                pl.BlockSpec((1, D_CLIP, DW), lambda t: (t, 0, 0)),
                pl.BlockSpec((1, 1, DW), lambda t: (t, 0, 0)),
                pl.BlockSpec((1, D_CROSS), lambda t: (0, 0)),
                pl.BlockSpec((1, D_CROSS), lambda t: (0, 0)),
            ],
            out_specs=pl.BlockSpec((B, DW), lambda t: (0, t)),
        ),
        compiler_params=pltpu.CompilerParams(
            dimension_semantics=("parallel",)),   # disjoint output blocks
    )(image_embeds.astype(jnp.bfloat16), params["w_proj"], params["b_proj"],
      params["ln_gamma"], params["ln_beta"])
    # (B, N_TOK*D) -> (B, N_TOK, D): free row-major reshape, no transpose pass.
    return out2d.reshape(B, N_TOK, D_CROSS)


# ---------------------------------------------------------------------------
# Kernel 2: fused schedule-scale + concat + UNet surrogate (cross-attn block)
# TODO(synk): stands in for the externally injected pretrained diffusion UNet.
# ---------------------------------------------------------------------------
def _fused_unet_kernel(ts_ref, scales_ref, x_ref, ehs_ref, ip_ref,
                       wq_t_ref, wk_ref, w_vo_ref, wt_t_ref, o_ref):
    # ts_ref: SMEM (B,) int32; scales_ref: SMEM (2,) f32;
    # x_ref: (1, C, HW) f32; ehs_ref: (1, S_TXT, D_CROSS); ip_ref: (1, N_TOK, D_CROSS);
    # wq_t: (D_M, C) f32; wk: (D_CROSS, D_M) bf16; w_vo: (D_CROSS, C) bf16 (= wv @ wo);
    # wt_t: (C, D_M) f32; o_ref: (1, C, HW) -- lane-dense store (HW = 256 lanes).
    b = pl.program_id(0)
    s_txt = scales_ref[0]
    s_ip = scales_ref[1]
    inv_sqrt_d = 1.0 / math.sqrt(D_M)

    x_b = x_ref[0]                                   # (C, HW) f32
    ctx_t = ehs_ref[0].astype(jnp.bfloat16)          # (S_TXT, D_CROSS)
    ctx_i = ip_ref[0].astype(jnp.bfloat16)           # (N_TOK, D_CROSS)

    # Schedule scaling + token concat, fused: the K / (V@Wo) projections are
    # bias-free, so scaling their small outputs == scaling encoder_hidden_states
    # / ip_tokens before concatenation; keeping txt/ip split avoids any concat.
    k_t = jnp.dot(ctx_t, wk_ref[...], preferred_element_type=jnp.float32) * s_txt
    k_i = jnp.dot(ctx_i, wk_ref[...], preferred_element_type=jnp.float32) * s_ip
    vo_t = jnp.dot(ctx_t, w_vo_ref[...], preferred_element_type=jnp.float32) * s_txt
    vo_i = jnp.dot(ctx_i, w_vo_ref[...], preferred_element_type=jnp.float32) * s_ip

    # Query kept transposed (D_M, HW): HW stays in the lane dim to the store.
    q_t = jnp.dot(wq_t_ref[...], x_b, preferred_element_type=jnp.float32)

    sc_t = jnp.dot(k_t, q_t, preferred_element_type=jnp.float32) * inv_sqrt_d
    sc_i = jnp.dot(k_i, q_t, preferred_element_type=jnp.float32) * inv_sqrt_d

    # softmax over the (split) token axis, f32, max-subtracted
    m = jnp.maximum(jnp.max(sc_t, axis=0, keepdims=True),
                    jnp.max(sc_i, axis=0, keepdims=True))        # (1, HW)
    p_t = jnp.exp(sc_t - m)
    p_i = jnp.exp(sc_i - m)
    l = (jnp.sum(p_t, axis=0, keepdims=True)
         + jnp.sum(p_i, axis=0, keepdims=True))                  # (1, HW)
    inv_l = pl.reciprocal(l, approx=True)

    # attn = (V@Wo)^T @ P -> (C, HW); contraction over the tiny token axis.
    cdims = (((0,), (0,)), ((), ()))
    attn = (jax.lax.dot_general(vo_t, p_t, cdims, preferred_element_type=jnp.float32)
            + jax.lax.dot_general(vo_i, p_i, cdims, preferred_element_type=jnp.float32)
            ) * inv_l

    # timestep conditioning, computed in-kernel on the EUP:
    #   emb = [cos(t*f_0..f_31), sin(t*f_0..f_31)],  f_k = 10000^(-k/32)
    t = ts_ref[b].astype(jnp.float32)
    j = jax.lax.broadcasted_iota(jnp.int32, (1, D_M), 1)
    freqs = jnp.exp(-(math.log(10000.0) / HALF) * (j % HALF).astype(jnp.float32))
    arg = t * freqs
    temb = jnp.where(j < HALF, jnp.cos(arg), jnp.sin(arg))       # (1, D_M)
    tb = jnp.sum(wt_t_ref[...] * temb, axis=-1, keepdims=True)   # (C, 1)

    o_ref[0] = (x_b + attn + tb).astype(o_ref.dtype)


def unet_surrogate(noisy_latents, timesteps, encoder_hidden_states, ip_tokens,
                   scales, params):
    b, c, h, w = noisy_latents.shape
    x = noisy_latents.reshape(b, c, h * w)              # free row-major reshape

    smem = pltpu.MemorySpace.SMEM
    out = pl.pallas_call(
        _fused_unet_kernel,
        out_shape=jax.ShapeDtypeStruct((b, c, h * w), jnp.float32),
        grid=(b,),
        in_specs=[
            pl.BlockSpec(memory_space=smem),                          # timesteps (B,)
            pl.BlockSpec(memory_space=smem),                          # scales (2,)
            pl.BlockSpec((1, C, HW), lambda i: (i, 0, 0)),            # x
            pl.BlockSpec((1, S_TXT, D_CROSS), lambda i: (i, 0, 0)),   # ehs
            pl.BlockSpec((1, N_TOK, D_CROSS), lambda i: (i, 0, 0)),   # ip_tokens
            pl.BlockSpec((D_M, C), lambda i: (0, 0)),                 # wq_t
            pl.BlockSpec((D_CROSS, D_M), lambda i: (0, 0)),           # wk (bf16)
            pl.BlockSpec((D_CROSS, C), lambda i: (0, 0)),             # w_vo (bf16)
            pl.BlockSpec((C, D_M), lambda i: (0, 0)),                 # wt_t
        ],
        out_specs=pl.BlockSpec((1, C, HW), lambda i: (i, 0, 0)),
        compiler_params=pltpu.CompilerParams(
            dimension_semantics=("parallel",)),   # batch sharded across TCs (v7x)
    )(timesteps.astype(jnp.int32), scales, x,
      encoder_hidden_states, ip_tokens,
      params["wq_t"], params["wk"], params["w_vo"], params["wt_t"])
    return out.reshape(b, c, h, w)                      # free row-major reshape


# ---------------------------------------------------------------------------
# IPAdapter.forward
# ---------------------------------------------------------------------------
def ip_adapter_forward(params, noisy_latents, timesteps, encoder_hidden_states,
                       image_embeds, schedule=None):
    if image_embeds.shape[-1] != 768:
        ip_tokens = image_proj(image_embeds, params)
    else:
        ip_tokens = image_embeds
    if schedule is not None:
        scales = jnp.array([schedule, 1.0 - schedule], dtype=jnp.float32)
    else:
        scales = jnp.array([1.0, 1.0], dtype=jnp.float32)
    # Scaling + concat are fused into the attention kernel (applied to the
    # bias-free K / V@Wo projection outputs).
    noise_pred = unet_surrogate(noisy_latents, timesteps, encoder_hidden_states,
                                ip_tokens, scales, params)
    return noise_pred


# ---------------------------------------------------------------------------
# Deterministic parameter init (synthetic; no checkpoint loading)
# ---------------------------------------------------------------------------
def init_params():
    key = jax.random.PRNGKey(42)
    ks = jax.random.split(key, 7)

    # Image-projection Linear weight, re-laid-out for contiguous per-step DMA:
    # full (D_CLIP, N_TOK*768) -> (N_STEPS, D_CLIP, TOK_PER_STEP*768), bf16.
    w_full = 0.02 * jax.random.normal(ks[0], (D_CLIP, N_TOK * D_CROSS), jnp.float32)
    w_proj = (w_full.reshape(D_CLIP, N_STEPS, DW)
                    .transpose(1, 0, 2)
                    .astype(jnp.bfloat16))
    b_proj = jnp.zeros((N_STEPS, 1, DW), jnp.float32)

    # Attention weights; Wo folded into V offline (pure algebra, bias-free).
    wv = 0.02 * jax.random.normal(ks[3], (D_CROSS, D_M), jnp.float32)
    wo = 0.05 * jax.random.normal(ks[4], (D_M, C), jnp.float32)
    w_vo = (wv @ wo).astype(jnp.bfloat16)               # (D_CROSS, C)

    return {
        "w_proj": w_proj,
        "b_proj": b_proj,
        "ln_gamma": jnp.ones((1, D_CROSS), jnp.float32),
        "ln_beta": jnp.zeros((1, D_CROSS), jnp.float32),
        "wq_t": 0.05 * jax.random.normal(ks[1], (D_M, C), jnp.float32),
        "wk": (0.02 * jax.random.normal(ks[2], (D_CROSS, D_M),
                                        jnp.float32)).astype(jnp.bfloat16),
        "w_vo": w_vo,
        "wt_t": 0.05 * jax.random.normal(ks[5], (C, D_M), jnp.float32),
    }


if __name__ == "__main__":
    params = init_params()

    key = jax.random.PRNGKey(0)
    k1, k2, k3, k4 = jax.random.split(key, 4)
    noisy_latents = jax.random.normal(k1, (B, C, H, W), jnp.float32)
    timesteps = jax.random.randint(k2, (B,), 0, 1000, jnp.int32)
    encoder_hidden_states = jax.random.normal(k3, (B, S_TXT, D_CROSS), jnp.float32)
    image_embeds = jax.random.normal(k4, (B, D_CLIP), jnp.float32)  # != 768 -> image_proj path
    schedule = 0.7

    fwd = jax.jit(partial(ip_adapter_forward, params))
    noise_pred = fwd(noisy_latents, timesteps, encoder_hidden_states,
                     image_embeds, schedule)
    jax.block_until_ready(noise_pred)
    assert noise_pred.shape == (B, C, H, W)
    assert bool(jnp.all(jnp.isfinite(noise_pred)))
    print("KERNEL_OK")
</pallas_src>

<mosaic_0001>
module attributes {stable_mosaic.version = 11 : i64} {
  func.func @_image_proj_kernel(%arg0: i32, %arg1: memref<2x1024xbf16, #tpu.memory_space<vmem>>, %arg2: memref<1x1024x1536xbf16, #tpu.memory_space<vmem>>, %arg3: memref<1x1x1536xf32, #tpu.memory_space<vmem>>, %arg4: memref<1x768xf32, #tpu.memory_space<vmem>>, %arg5: memref<1x768xf32, #tpu.memory_space<vmem>>, %arg6: memref<2x1536xf32, #tpu.memory_space<vmem>>) attributes {dimension_semantics = [#tpu.dimension_semantics<parallel>], iteration_bounds = array<i64: 2>, scalar_prefetch = 0 : i64, scratch_operands = 0 : i64, tpu.core_type = #tpu.core_type<tc>, window_params = [{pipeline_mode = #tpu.pipeline_mode<synchronous>, transform_indices = @transform_0, window_bounds = array<i64: 2, 1024>}, {transform_indices = @transform_1, window_bounds = array<i64: 1, 1024, 1536>}, {transform_indices = @transform_2, window_bounds = array<i64: 1, 1, 1536>}, {pipeline_mode = #tpu.pipeline_mode<synchronous>, transform_indices = @transform_3, window_bounds = array<i64: 1, 768>}, {pipeline_mode = #tpu.pipeline_mode<synchronous>, transform_indices = @transform_4, window_bounds = array<i64: 1, 768>}, {transform_indices = @transform_5, window_bounds = array<i64: 2, 1536>}]} {
    %c0 = arith.constant 0 : index
    %c0_0 = arith.constant 0 : index
    %0 = vector.load %arg1[%c0, %c0_0] : memref<2x1024xbf16, #tpu.memory_space<vmem>>, vector<2x1024xbf16>
    %c0_1 = arith.constant 0 : index
    %c0_2 = arith.constant 0 : index
    %c0_3 = arith.constant 0 : index
    %1 = vector.load %arg2[%c0_1, %c0_2, %c0_3] : memref<1x1024x1536xbf16, #tpu.memory_space<vmem>>, vector<1x1024x1536xbf16>
    %2 = vector.shape_cast %1 : vector<1x1024x1536xbf16> to vector<1024x1536xbf16>
    %cst = arith.constant dense<0.000000e+00> : vector<2x1536xf32>
    %3 = tpu.matmul %0, %2, %cst {dimension_numbers = #tpu.dot_dimension_numbers<[1], [0], [0], [1], [0, 0, 1, 1], [], []>} : vector<2x1024xbf16>, vector<1024x1536xbf16>, vector<2x1536xf32> -> vector<2x1536xf32>
    %c0_4 = arith.constant 0 : index
    %c0_5 = arith.constant 0 : index
    %c0_6 = arith.constant 0 : index
    %4 = vector.load %arg3[%c0_4, %c0_5, %c0_6] : memref<1x1x1536xf32, #tpu.memory_space<vmem>>, vector<1x1x1536xf32>
    %5 = vector.shape_cast %4 : vector<1x1x1536xf32> to vector<1x1536xf32>
    %6 = vector.broadcast %5 : vector<1x1536xf32> to vector<2x1536xf32>
    %7 = arith.addf %3, %6 : vector<2x1536xf32>
    %8 = vector.extract_strided_slice %7 {offsets = [0, 0], sizes = [2, 768], strides = [1, 1]} : vector<2x1536xf32> to vector<2x768xf32>
    %cst_7 = arith.constant dense<0.000000e+00> : vector<2xf32>
    %9 = vector.multi_reduction <add>, %8, %cst_7 [1] : vector<2x768xf32> to vector<2xf32>
    %10 = vector.shape_cast %9 : vector<2xf32> to vector<2x1xf32>
    %cst_8 = arith.constant 7.680000e+02 : f32
    %11 = vector.broadcast %cst_8 : f32 to vector<2x1xf32>
    %12 = arith.divf %10, %11 : vector<2x1xf32>
    %13 = vector.broadcast %12 : vector<2x1xf32> to vector<2x768xf32>
    %14 = arith.subf %8, %13 : vector<2x768xf32>
    %15 = arith.mulf %14, %14 : vector<2x768xf32>
    %cst_9 = arith.constant dense<0.000000e+00> : vector<2xf32>
    %16 = vector.multi_reduction <add>, %15, %cst_9 [1] : vector<2x768xf32> to vector<2xf32>
    %17 = vector.shape_cast %16 : vector<2xf32> to vector<2x1xf32>
    %cst_10 = arith.constant 7.680000e+02 : f32
    %18 = vector.broadcast %cst_10 : f32 to vector<2x1xf32>
    %19 = arith.divf %17, %18 : vector<2x1xf32>
    %20 = vector.broadcast %12 : vector<2x1xf32> to vector<2x768xf32>
    %21 = arith.subf %8, %20 : vector<2x768xf32>
    %cst_11 = arith.constant 9.99999974E-6 : f32
    %22 = vector.broadcast %cst_11 : f32 to vector<2x1xf32>
    %23 = arith.addf %19, %22 : vector<2x1xf32>
    %24 = math.rsqrt %23 : vector<2x1xf32>
    %25 = vector.broadcast %24 : vector<2x1xf32> to vector<2x768xf32>
    %26 = arith.mulf %21, %25 : vector<2x768xf32>
    %c0_12 = arith.constant 0 : index
    %c0_13 = arith.constant 0 : index
    %27 = vector.load %arg4[%c0_12, %c0_13] : memref<1x768xf32, #tpu.memory_space<vmem>>, vector<1x768xf32>
    %28 = vector.broadcast %27 : vector<1x768xf32> to vector<2x768xf32>
    %29 = arith.mulf %26, %28 : vector<2x768xf32>
    %c0_14 = arith.constant 0 : index
    %c0_15 = arith.constant 0 : index
    %30 = vector.load %arg5[%c0_14, %c0_15] : memref<1x768xf32, #tpu.memory_space<vmem>>, vector<1x768xf32>
    %31 = vector.broadcast %30 : vector<1x768xf32> to vector<2x768xf32>
    %32 = arith.addf %29, %31 : vector<2x768xf32>
    %c0_16 = arith.constant 0 : index
    %c0_17 = arith.constant 0 : index
    %33 = vector.load %arg6[%c0_16, %c0_17] : memref<2x1536xf32, #tpu.memory_space<vmem>>, vector<2x768xf32>
    tpu.vector_store %arg6[%c0_16, %c0_17], %32 {strides = array<i32>} : memref<2x1536xf32, #tpu.memory_space<vmem>>, vector<2x768xf32>,
    %34 = vector.extract_strided_slice %7 {offsets = [0, 768], sizes = [2, 768], strides = [1, 1]} : vector<2x1536xf32> to vector<2x768xf32>
    %cst_18 = arith.constant dense<0.000000e+00> : vector<2xf32>
    %35 = vector.multi_reduction <add>, %34, %cst_18 [1] : vector<2x768xf32> to vector<2xf32>
    %36 = vector.shape_cast %35 : vector<2xf32> to vector<2x1xf32>
    %cst_19 = arith.constant 7.680000e+02 : f32
    %37 = vector.broadcast %cst_19 : f32 to vector<2x1xf32>
    %38 = arith.divf %36, %37 : vector<2x1xf32>
    %39 = vector.broadcast %38 : vector<2x1xf32> to vector<2x768xf32>
    %40 = arith.subf %34, %39 : vector<2x768xf32>
    %41 = arith.mulf %40, %40 : vector<2x768xf32>
    %cst_20 = arith.constant dense<0.000000e+00> : vector<2xf32>
    %42 = vector.multi_reduction <add>, %41, %cst_20 [1] : vector<2x768xf32> to vector<2xf32>
    %43 = vector.shape_cast %42 : vector<2xf32> to vector<2x1xf32>
    %cst_21 = arith.constant 7.680000e+02 : f32
    %44 = vector.broadcast %cst_21 : f32 to vector<2x1xf32>
    %45 = arith.divf %43, %44 : vector<2x1xf32>
    %46 = vector.broadcast %38 : vector<2x1xf32> to vector<2x768xf32>
    %47 = arith.subf %34, %46 : vector<2x768xf32>
    %cst_22 = arith.constant 9.99999974E-6 : f32
    %48 = vector.broadcast %cst_22 : f32 to vector<2x1xf32>
    %49 = arith.addf %45, %48 : vector<2x1xf32>
    %50 = math.rsqrt %49 : vector<2x1xf32>
    %51 = vector.broadcast %50 : vector<2x1xf32> to vector<2x768xf32>
    %52 = arith.mulf %47, %51 : vector<2x768xf32>
    %c0_23 = arith.constant 0 : index
    %c0_24 = arith.constant 0 : index
    %53 = vector.load %arg4[%c0_23, %c0_24] : memref<1x768xf32, #tpu.memory_space<vmem>>, vector<1x768xf32>
    %54 = vector.broadcast %53 : vector<1x768xf32> to vector<2x768xf32>
    %55 = arith.mulf %52, %54 : vector<2x768xf32>
    %c0_25 = arith.constant 0 : index
    %c0_26 = arith.constant 0 : index
    %56 = vector.load %arg5[%c0_25, %c0_26] : memref<1x768xf32, #tpu.memory_space<vmem>>, vector<1x768xf32>
    %57 = vector.broadcast %56 : vector<1x768xf32> to vector<2x768xf32>
    %58 = arith.addf %55, %57 : vector<2x768xf32>
    %c0_27 = arith.constant 0 : index
    %c768 = arith.constant 768 : index
    %59 = vector.load %arg6[%c0_27, %c768] : memref<2x1536xf32, #tpu.memory_space<vmem>>, vector<2x768xf32>
    tpu.vector_store %arg6[%c0_27, %c768], %58 {strides = array<i32>} : memref<2x1536xf32, #tpu.memory_space<vmem>>, vector<2x768xf32>,
    return
  }
  func.func @transform_0(%arg0: i32) -> (i32, i32) {
    %c0_i32 = arith.constant 0 : i32
    %c0_i32_0 = arith.constant 0 : i32
    %c0_i32_1 = arith.constant 0 : i32
    return %c0_i32, %c0_i32_0 : i32, i32
  }
  func.func @transform_1(%arg0: i32) -> (i32, i32, i32) {
    %c0_i32 = arith.constant 0 : i32
    %c0_i32_0 = arith.constant 0 : i32
    %c0_i32_1 = arith.constant 0 : i32
    return %arg0, %c0_i32, %c0_i32_0 : i32, i32, i32
  }
  func.func @transform_2(%arg0: i32) -> (i32, i32, i32) {
    %c0_i32 = arith.constant 0 : i32
    %c0_i32_0 = arith.constant 0 : i32
    %c0_i32_1 = arith.constant 0 : i32
    return %arg0, %c0_i32, %c0_i32_0 : i32, i32, i32
  }
  func.func @transform_3(%arg0: i32) -> (i32, i32) {
    %c0_i32 = arith.constant 0 : i32
    %c0_i32_0 = arith.constant 0 : i32
    %c0_i32_1 = arith.constant 0 : i32
    return %c0_i32, %c0_i32_0 : i32, i32
  }
  func.func @transform_4(%arg0: i32) -> (i32, i32) {
    %c0_i32 = arith.constant 0 : i32
    %c0_i32_0 = arith.constant 0 : i32
    %c0_i32_1 = arith.constant 0 : i32
    return %c0_i32, %c0_i32_0 : i32, i32
  }
  func.func @transform_5(%arg0: i32) -> (i32, i32) {
    %c0_i32 = arith.constant 0 : i32
    %c0_i32_0 = arith.constant 0 : i32
    return %c0_i32, %arg0 : i32, i32
  }
}

module attributes {stable_mosaic.version = 11 : i64} {
  func.func @_fused_unet_kernel(%arg0: i32, %arg1: memref<2xi32, #tpu.memory_space<smem>>, %arg2: memref<2xf32, #tpu.memory_space<smem>>, %arg3: memref<1x4x256xf32, #tpu.memory_space<vmem>>, %arg4: memref<1x8x768xf32, #tpu.memory_space<vmem>>, %arg5: memref<1x4x768xf32, #tpu.memory_space<vmem>>, %arg6: memref<64x4xf32, #tpu.memory_space<vmem>>, %arg7: memref<768x64xbf16, #tpu.memory_space<vmem>>, %arg8: memref<768x4xbf16, #tpu.memory_space<vmem>>, %arg9: memref<4x64xf32, #tpu.memory_space<vmem>>, %arg10: memref<1x4x256xf32, #tpu.memory_space<vmem>>) attributes {dimension_semantics = [#tpu.dimension_semantics<parallel>], iteration_bounds = array<i64: 2>, scalar_prefetch = 0 : i64, scratch_operands = 0 : i64, tpu.core_type = #tpu.core_type<tc>, window_params = [{transform_indices = @transform_0, window_bounds = array<i64: 2>}, {transform_indices = @transform_1, window_bounds = array<i64: 2>}, {transform_indices = @transform_2, window_bounds = array<i64: 1, 4, 256>}, {transform_indices = @transform_3, window_bounds = array<i64: 1, 8, 768>}, {transform_indices = @transform_4, window_bounds = array<i64: 1, 4, 768>}, {pipeline_mode = #tpu.pipeline_mode<synchronous>, transform_indices = @transform_5, window_bounds = array<i64: 64, 4>}, {pipeline_mode = #tpu.pipeline_mode<synchronous>, transform_indices = @transform_6, window_bounds = array<i64: 768, 64>}, {pipeline_mode = #tpu.pipeline_mode<synchronous>, transform_indices = @transform_7, window_bounds = array<i64: 768, 4>}, {pipeline_mode = #tpu.pipeline_mode<synchronous>, transform_indices = @transform_8, window_bounds = array<i64: 4, 64>}, {transform_indices = @transform_9, window_bounds = array<i64: 1, 4, 256>}]} {
    %c0 = arith.constant 0 : index
    %0 = memref.load %arg2[%c0] : memref<2xf32, #tpu.memory_space<smem>>
    %c1 = arith.constant 1 : index
    %1 = memref.load %arg2[%c1] : memref<2xf32, #tpu.memory_space<smem>>
    %c0_0 = arith.constant 0 : index
    %c0_1 = arith.constant 0 : index
    %c0_2 = arith.constant 0 : index
    %2 = vector.load %arg3[%c0_0, %c0_1, %c0_2] : memref<1x4x256xf32, #tpu.memory_space<vmem>>, vector<1x4x256xf32>
    %3 = vector.shape_cast %2 : vector<1x4x256xf32> to vector<4x256xf32>
    %c0_3 = arith.constant 0 : index
    %c0_4 = arith.constant 0 : index
    %c0_5 = arith.constant 0 : index
    %4 = vector.load %arg4[%c0_3, %c0_4, %c0_5] : memref<1x8x768xf32, #tpu.memory_space<vmem>>, vector<1x8x768xf32>
    %5 = vector.shape_cast %4 : vector<1x8x768xf32> to vector<8x768xf32>
    %6 = arith.truncf %5 : vector<8x768xf32> to vector<8x768xbf16>
    %c0_6 = arith.constant 0 : index
    %c0_7 = arith.constant 0 : index
    %c0_8 = arith.constant 0 : index
    %7 = vector.load %arg5[%c0_6, %c0_7, %c0_8] : memref<1x4x768xf32, #tpu.memory_space<vmem>>, vector<1x4x768xf32>
    %8 = vector.shape_cast %7 : vector<1x4x768xf32> to vector<4x768xf32>
    %9 = arith.truncf %8 : vector<4x768xf32> to vector<4x768xbf16>
    %c0_9 = arith.constant 0 : index
    %c0_10 = arith.constant 0 : index
    %10 = vector.load %arg7[%c0_9, %c0_10] : memref<768x64xbf16, #tpu.memory_space<vmem>>, vector<768x64xbf16>
    %cst = arith.constant dense<0.000000e+00> : vector<8x64xf32>
    %11 = tpu.matmul %6, %10, %cst {dimension_numbers = #tpu.dot_dimension_numbers<[1], [0], [0], [1], [0, 0, 1, 1], [], []>} : vector<8x768xbf16>, vector<768x64xbf16>, vector<8x64xf32> -> vector<8x64xf32>
    %12 = vector.broadcast %0 : f32 to vector<8x64xf32>
    %13 = arith.mulf %11, %12 : vector<8x64xf32>
    %c0_11 = arith.constant 0 : index
    %c0_12 = arith.constant 0 : index
    %14 = vector.load %arg7[%c0_11, %c0_12] : memref<768x64xbf16, #tpu.memory_space<vmem>>, vector<768x64xbf16>
    %cst_13 = arith.constant dense<0.000000e+00> : vector<4x64xf32>
    %15 = tpu.matmul %9, %14, %cst_13 {dimension_numbers = #tpu.dot_dimension_numbers<[1], [0], [0], [1], [0, 0, 1, 1], [], []>} : vector<4x768xbf16>, vector<768x64xbf16>, vector<4x64xf32> -> vector<4x64xf32>
    %16 = vector.broadcast %1 : f32 to vector<4x64xf32>
    %17 = arith.mulf %15, %16 : vector<4x64xf32>
    %c0_14 = arith.constant 0 : index
    %c0_15 = arith.constant 0 : index
    %18 = vector.load %arg8[%c0_14, %c0_15] : memref<768x4xbf16, #tpu.memory_space<vmem>>, vector<768x4xbf16>
    %cst_16 = arith.constant dense<0.000000e+00> : vector<8x4xf32>
    %19 = tpu.matmul %6, %18, %cst_16 {dimension_numbers = #tpu.dot_dimension_numbers<[1], [0], [0], [1], [0, 0, 1, 1], [], []>} : vector<8x768xbf16>, vector<768x4xbf16>, vector<8x4xf32> -> vector<8x4xf32>
    %20 = vector.broadcast %0 : f32 to vector<8x4xf32>
    %21 = arith.mulf %19, %20 : vector<8x4xf32>
    %c0_17 = arith.constant 0 : index
    %c0_18 = arith.constant 0 : index
    %22 = vector.load %arg8[%c0_17, %c0_18] : memref<768x4xbf16, #tpu.memory_space<vmem>>, vector<768x4xbf16>
    %cst_19 = arith.constant dense<0.000000e+00> : vector<4x4xf32>
    %23 = tpu.matmul %9, %22, %cst_19 {dimension_numbers = #tpu.dot_dimension_numbers<[1], [0], [0], [1], [0, 0, 1, 1], [], []>} : vector<4x768xbf16>, vector<768x4xbf16>, vector<4x4xf32> -> vector<4x4xf32>
    %24 = vector.broadcast %1 : f32 to vector<4x4xf32>
    %25 = arith.mulf %23, %24 : vector<4x4xf32>
    %c0_20 = arith.constant 0 : index
    %c0_21 = arith.constant 0 : index
    %26 = vector.load %arg6[%c0_20, %c0_21] : memref<64x4xf32, #tpu.memory_space<vmem>>, vector<64x4xf32>
    %cst_22 = arith.constant dense<0.000000e+00> : vector<64x256xf32>
    %27 = tpu.matmul %26, %3, %cst_22 {dimension_numbers = #tpu.dot_dimension_numbers<[1], [0], [0], [1], [0, 0, 1, 1], [], []>} : vector<64x4xf32>, vector<4x256xf32>, vector<64x256xf32> -> vector<64x256xf32>
    %cst_23 = arith.constant dense<0.000000e+00> : vector<8x256xf32>
    %28 = tpu.matmul %13, %27, %cst_23 {dimension_numbers = #tpu.dot_dimension_numbers<[1], [0], [0], [1], [0, 0, 1, 1], [], []>} : vector<8x64xf32>, vector<64x256xf32>, vector<8x256xf32> -> vector<8x256xf32>
    %cst_24 = arith.constant 1.250000e-01 : f32
    %29 = vector.broadcast %cst_24 : f32 to vector<8x256xf32>
    %30 = arith.mulf %28, %29 : vector<8x256xf32>
    %cst_25 = arith.constant dense<0.000000e+00> : vector<4x256xf32>
    %31 = tpu.matmul %17, %27, %cst_25 {dimension_numbers = #tpu.dot_dimension_numbers<[1], [0], [0], [1], [0, 0, 1, 1], [], []>} : vector<4x64xf32>, vector<64x256xf32>, vector<4x256xf32> -> vector<4x256xf32>
    %cst_26 = arith.constant 1.250000e-01 : f32
    %32 = vector.broadcast %cst_26 : f32 to vector<4x256xf32>
    %33 = arith.mulf %31, %32 : vector<4x256xf32>
    %cst_27 = arith.constant dense<0xFF800000> : vector<256xf32>
    %34 = vector.multi_reduction <maximumf>, %30, %cst_27 [0] : vector<8x256xf32> to vector<256xf32>
    %35 = vector.shape_cast %34 : vector<256xf32> to vector<1x256xf32>
    %cst_28 = arith.constant dense<0xFF800000> : vector<256xf32>
    %36 = vector.multi_reduction <maximumf>, %33, %cst_28 [0] : vector<4x256xf32> to vector<256xf32>
    %37 = vector.shape_cast %36 : vector<256xf32> to vector<1x256xf32>
    %38 = arith.maximumf %35, %37 : vector<1x256xf32>
    %39 = vector.broadcast %38 : vector<1x256xf32> to vector<8x256xf32>
    %40 = arith.subf %30, %39 : vector<8x256xf32>
    %41 = math.exp %40 : vector<8x256xf32>
    %42 = vector.broadcast %38 : vector<1x256xf32> to vector<4x256xf32>
    %43 = arith.subf %33, %42 : vector<4x256xf32>
    %44 = math.exp %43 : vector<4x256xf32>
    %cst_29 = arith.constant dense<0.000000e+00> : vector<256xf32>
    %45 = vector.multi_reduction <add>, %41, %cst_29 [0] : vector<8x256xf32> to vector<256xf32>
    %46 = vector.shape_cast %45 : vector<256xf32> to vector<1x256xf32>
    %cst_30 = arith.constant dense<0.000000e+00> : vector<256xf32>
    %47 = vector.multi_reduction <add>, %44, %cst_30 [0] : vector<4x256xf32> to vector<256xf32>
    %48 = vector.shape_cast %47 : vector<256xf32> to vector<1x256xf32>
    %49 = arith.addf %46, %48 : vector<1x256xf32>
    %50 = tpu.reciprocal %49 {approx = true} : vector<1x256xf32> -> vector<1x256xf32>
    %cst_31 = arith.constant dense<0.000000e+00> : vector<4x256xf32>
    %51 = tpu.matmul %21, %41, %cst_31 {dimension_numbers = #tpu.dot_dimension_numbers<[0], [0], [1], [1], [0, 1, 1, 1], [], []>} : vector<8x4xf32>, vector<8x256xf32>, vector<4x256xf32> -> vector<4x256xf32>
    %cst_32 = arith.constant dense<0.000000e+00> : vector<4x256xf32>
    %52 = tpu.matmul %25, %44, %cst_32 {dimension_numbers = #tpu.dot_dimension_numbers<[0], [0], [1], [1], [0, 1, 1, 1], [], []>} : vector<4x4xf32>, vector<4x256xf32>, vector<4x256xf32> -> vector<4x256xf32>
    %53 = arith.addf %51, %52 : vector<4x256xf32>
    %54 = vector.broadcast %50 : vector<1x256xf32> to vector<4x256xf32>
    %55 = arith.mulf %53, %54 : vector<4x256xf32>
    %56 = arith.index_cast %arg0 : i32 to index
    %57 = memref.load %arg1[%56] : memref<2xi32, #tpu.memory_space<smem>>
    %58 = arith.sitofp %57 : i32 to f32
    %59 = tpu.iota {dimensions = array<i32: 1>} : vector<1x64xi32>
    %c32_i32 = arith.constant 32 : i32
    %c0_i32 = arith.constant 0 : i32
    %60 = arith.cmpi eq, %c32_i32, %c0_i32 : i32
    %c1_i32 = arith.constant 1 : i32
    %61 = arith.select %60, %c1_i32, %c32_i32 : i32
    %62 = vector.broadcast %61 : i32 to vector<1x64xi32>
    %63 = arith.remsi %59, %62 : vector<1x64xi32>
    %c0_i32_33 = arith.constant 0 : i32
    %64 = vector.broadcast %c0_i32_33 : i32 to vector<1x64xi32>
    %65 = arith.cmpi ne, %63, %64 : vector<1x64xi32>
    %c0_i32_34 = arith.constant 0 : i32
    %66 = vector.broadcast %c0_i32_34 : i32 to vector<1x64xi32>
    %67 = arith.cmpi slt, %63, %66 : vector<1x64xi32>
    %c0_i32_35 = arith.constant 0 : i32
    %68 = arith.cmpi slt, %61, %c0_i32_35 : i32
    %69 = vector.broadcast %68 : i1 to vector<1x64xi1>
    %70 = vector.broadcast %69 : vector<1x64xi1> to vector<1x64xi1>
    %71 = arith.xori %67, %70 : vector<1x64xi1>
    %72 = arith.andi %71, %65 : vector<1x64xi1>
    %73 = vector.broadcast %61 : i32 to vector<1x64xi32>
    %74 = arith.addi %63, %73 : vector<1x64xi32>
    %75 = arith.select %72, %74, %63 : vector<1x64xi1>, vector<1x64xi32>
    %76 = arith.sitofp %75 : vector<1x64xi32> to vector<1x64xf32>
    %cst_36 = arith.constant -0.287823141 : f32
    %77 = vector.broadcast %cst_36 : f32 to vector<1x64xf32>
    %78 = arith.mulf %77, %76 : vector<1x64xf32>
    %79 = math.exp %78 : vector<1x64xf32>
    %80 = vector.broadcast %58 : f32 to vector<1x64xf32>
    %81 = arith.mulf %80, %79 : vector<1x64xf32>
    %c32_i32_37 = arith.constant 32 : i32
    %82 = vector.broadcast %c32_i32_37 : i32 to vector<1x64xi32>
    %83 = arith.cmpi slt, %59, %82 : vector<1x64xi32>
    %84 = math.cos %81 : vector<1x64xf32>
    %85 = math.sin %81 : vector<1x64xf32>
    %86 = arith.select %83, %84, %85 : vector<1x64xi1>, vector<1x64xf32>
    %c0_38 = arith.constant 0 : index
    %c0_39 = arith.constant 0 : index
    %87 = vector.load %arg9[%c0_38, %c0_39] : memref<4x64xf32, #tpu.memory_space<vmem>>, vector<4x64xf32>
    %88 = vector.broadcast %86 : vector<1x64xf32> to vector<4x64xf32>
    %89 = arith.mulf %87, %88 : vector<4x64xf32>
    %cst_40 = arith.constant dense<0.000000e+00> : vector<4xf32>
    %90 = vector.multi_reduction <add>, %89, %cst_40 [1] : vector<4x64xf32> to vector<4xf32>
    %91 = vector.shape_cast %90 : vector<4xf32> to vector<4x1xf32>
    %92 = arith.addf %3, %55 : vector<4x256xf32>
    %93 = vector.broadcast %91 : vector<4x1xf32> to vector<4x256xf32>
    %94 = arith.addf %92, %93 : vector<4x256xf32>
    %c0_41 = arith.constant 0 : index
    %c0_42 = arith.constant 0 : index
    %c0_43 = arith.constant 0 : index
    %95 = vector.load %arg10[%c0_41, %c0_42, %c0_43] : memref<1x4x256xf32, #tpu.memory_space<vmem>>, vector<1x4x256xf32>
    %96 = vector.shape_cast %95 : vector<1x4x256xf32> to vector<4x256xf32>
    %97 = vector.shape_cast %94 : vector<4x256xf32> to vector<1x4x256xf32>
    tpu.vector_store %arg10[%c0_41, %c0_42, %c0_43], %97 {strides = array<i32>} : memref<1x4x256xf32, #tpu.memory_space<vmem>>, vector<1x4x256xf32>,
    return
  }
  func.func @transform_0(%arg0: i32) -> i32 {
    %c0_i32 = arith.constant 0 : i32
    %c0_i32_0 = arith.constant 0 : i32
    return %c0_i32 : i32
  }
  func.func @transform_1(%arg0: i32) -> i32 {
    %c0_i32 = arith.constant 0 : i32
    %c0_i32_0 = arith.constant 0 : i32
    return %c0_i32 : i32
  }
  func.func @transform_2(%arg0: i32) -> (i32, i32, i32) {
    %c0_i32 = arith.constant 0 : i32
    %c0_i32_0 = arith.constant 0 : i32
    %c0_i32_1 = arith.constant 0 : i32
    return %arg0, %c0_i32, %c0_i32_0 : i32, i32, i32
  }
  func.func @transform_3(%arg0: i32) -> (i32, i32, i32) {
    %c0_i32 = arith.constant 0 : i32
    %c0_i32_0 = arith.constant 0 : i32
    %c0_i32_1 = arith.constant 0 : i32
    return %arg0, %c0_i32, %c0_i32_0 : i32, i32, i32
  }
  func.func @transform_4(%arg0: i32) -> (i32, i32, i32) {
    %c0_i32 = arith.constant 0 : i32
    %c0_i32_0 = arith.constant 0 : i32
    %c0_i32_1 = arith.constant 0 : i32
    return %arg0, %c0_i32, %c0_i32_0 : i32, i32, i32
  }
  func.func @transform_5(%arg0: i32) -> (i32, i32) {
    %c0_i32 = arith.constant 0 : i32
    %c0_i32_0 = arith.constant 0 : i32
    %c0_i32_1 = arith.constant 0 : i32
    return %c0_i32, %c0_i32_0 : i32, i32
  }
  func.func @transform_6(%arg0: i32) -> (i32, i32) {
    %c0_i32 = arith.constant 0 : i32
    %c0_i32_0 = arith.constant 0 : i32
    %c0_i32_1 = arith.constant 0 : i32
    return %c0_i32, %c0_i32_0 : i32, i32
  }
  func.func @transform_7(%arg0: i32) -> (i32, i32) {
    %c0_i32 = arith.constant 0 : i32
    %c0_i32_0 = arith.constant 0 : i32
    %c0_i32_1 = arith.constant 0 : i32
    return %c0_i32, %c0_i32_0 : i32, i32
  }
  func.func @transform_8(%arg0: i32) -> (i32, i32) {
    %c0_i32 = arith.constant 0 : i32
    %c0_i32_0 = arith.constant 0 : i32
    %c0_i32_1 = arith.constant 0 : i32
    return %c0_i32, %c0_i32_0 : i32, i32
  }
  func.func @transform_9(%arg0: i32) -> (i32, i32, i32) {
    %c0_i32 = arith.constant 0 : i32
    %c0_i32_0 = arith.constant 0 : i32
    %c0_i32_1 = arith.constant 0 : i32
    return %arg0, %c0_i32, %c0_i32_0 : i32, i32, i32
  }
}

</mosaic_0001>

<bundles_post_ra>
// kernel: ip_adapter_forward.3
= control target key start
LH: loop header
LB: loop body
LE: loop exit
PB: predicated region body
PF: predicated region fallthrough
CT: control target
= control target key end

     0   :  { %14 = vsyncpa [#allocation3], 0  ;;  %s4115_s0 = inlined_call_operand.vmem [shape: s32[2], index: 0, kind: input, shape index: {}]   ;;  %s4116_s1 = inlined_call_operand.vmem [shape: f32[2], index: 1, kind: input, shape index: {}]   ;;  %s4117_s2 = inlined_call_operand.vmem [shape: f32[2,4,256], index: 2, kind: input, shape index: {}]   ;;  %s4118_s3 = inlined_call_operand.vmem [shape: f32[2,8,768], index: 3, kind: input, shape index: {}]   ;;  %s4119_s4 = inlined_call_operand.vmem [shape: f32[2,4,768], index: 4, kind: input, shape index: {}]   ;;  %s4120_s5 = inlined_call_operand.vmem [shape: f32[64,4], index: 5, kind: input, shape index: {}]   ;;  %s4121_s6 = inlined_call_operand.vmem [shape: bf16[768,64], index: 6, kind: input, shape index: {}]   ;;  %s4122_s7 = inlined_call_operand.vmem [shape: bf16[768,4], index: 7, kind: input, shape index: {}]   ;;  %s4123_s8 = inlined_call_operand.vmem [shape: f32[4,64], index: 8, kind: input, shape index: {}]   ;;  %s4124_s9 = inlined_call_operand.vmem [shape: f32[2,4,256], index: 9, kind: output, shape index: {}]  }
   0x1   :  { %15 = vsyncpa [#allocation5], 0  ;;  %s3344_s30 = smov 0  }
   0x2 LB: > { %s3350_s10 = sadd.s32 4294967295, %s3282_s30   ;;  %p2641_p0 = scmp.ge.s32.totalorder %s3282_s30, 1  ;;  %s3282_s30 = sphi %s3344_s30, %s21_s30  }
   0x3   : > { %p256_p1 = scmp.lt.s32.totalorder %s3282_s30, 3  ;;  %s269_s13 = sshll.u32 %s4115_s0, 4  ;;  %s270_s13 = int_to_ptr.vmem [resolvable:$true] %s269_s13 }
   0x4   : > { %p4125_p3 = scmp.eq.s32.totalorder %s3350_s10, 0  ;;  %s280_s17 = sshll.u32 %s4116_s1, 4  ;;  %s281_s17 = int_to_ptr.vmem [resolvable:$true] %s280_s17 }
   0x5   : > { %p3357_p2 = pnand %p2641_p0, %p256_p1  ;;  %s3238_s19 = scalar_lea.vmem %s270_s13, 16 }
   0x6   : > { %p3239_p6 = scmp.ne.s32.totalorder %s270_s13, %s3238_s19  ;;  %p3246_p10 = scmp.lt.s32.totalorder %s270_s13, %s270_s13 }
   0x7   : > { %s4127_s14 = scalar_select %p3357_p2, 1, 0 }
   0x8   : > { %p3091_p4 = pneg %p3357_p2  ;;  %p3247_p11 = scmp.lt.s32.totalorder %s3238_s19, %s3238_s19 }
   0xa   : > { %p3369_p5 = pnand %p4125_p3, %p3091_p4  ;;  %p3248_p12 = por %p3247_p11, %p3246_p10 }
   0xc   : > { %p3240_p7 = pneg %p3369_p5 }
   0xe   : > { %p3241_p8 = pnand %p3240_p7, %p3239_p6 }
  0x10   : > { %p3242_p9 = pneg %p3241_p8 }
  0x12   : > { %p3249_p13 = pnand %p3248_p12, %p3242_p9 }
  0x14   : > { %3252 = shalt.err (!%p3249_p13)
}
  0x15   : > { %s3284_s20 = smov [#allocation2]   ;;  %s3253_s21 = scalar_lea.vmem %s281_s17, 16 }
  0x16   : > { %3094 = dma.vmem_to_smem (!%p3369_p5), %s270_s13, 16, %s3284_s20, [#allocation3]  }
  0x17   : > { %p3254_p0 = scmp.ne.s32.totalorder %s281_s17, %s3253_s21  ;;  %p3261_p3 = scmp.lt.s32.totalorder %s281_s17, %s281_s17 }
  0x18   : > { %p3262_p2 = scmp.lt.s32.totalorder %s3253_s21, %s3253_s21 }
  0x19   : > { %p3256_p1 = pnand %p3254_p0, %p3240_p7 }
  0x1a   : > { %p3263_p6 = por %p3262_p2, %p3261_p3 }
  0x1b   : > { %p3257_p4 = pneg %p3256_p1 }
  0x1d   : > { %p3264_p8 = pnand %p3263_p6, %p3257_p4 }
  0x1f   : > { %3267 = shalt.err (!%p3264_p8)
}
  0x20   : > { %s3285_s22 = smov [#allocation4]   ;;  %p4129_p9 = scmp.ne.s32.totalorder %s4127_s14, 0 }
  0x21   : > { %3097 = dma.vmem_to_smem (!%p3369_p5), %s281_s17, 16, %s3285_s22, [#allocation5]  }
  0x22   : > { %329 = sbr.rel (%p4129_p9) target bundleno = 992 (0x3e0), region = 56  ;;  %p4130_p10 = scmp.eq.s32.totalorder (!%p4129_p9), %s3350_s10, 0 }
  0x29   : > { %3273 = dma.done.wait (%p4130_p10), [#allocation3], 16   ;;  %p4131_p11 = pmov %p4130_p10 }
  0x2a   : > { %p4132_p7 = pmov %p4130_p10 }
  0x2b   : > { %3275 = vsyncadd (%p4131_p11), [#allocation3], 4294967280 }
  0x2c   : > { %3277 = dma.done.wait (%p4132_p7), [#allocation5], 16   ;;  %p4133_p2 = pmov %p4132_p7 }
  0x2e   : > { %3279 = vsyncadd (%p4133_p2), [#allocation5], 4294967280 }
  0x2f   : > { %339 = sfence }
  0x30   : > { %v3392_v0 = vld [vmem:[%s4121_s6 + $0x40] sm:$0xff]   ;;  %v3415_v4 = vld [vmem:[%s4121_s6 + $0x48] sm:$0xff]   ;;  %v3439_v8 = vld [vmem:[%s4121_s6 + $0x50] sm:$0xff]   ;;  %p380_p3 = scmp.lt.s32.totalorder %s3350_s10, 1  ;;  %vm1723_vm0 = vcmask 1043456   ;;  %vm1698_vm1 = vcmask 31744  }
  0x31   : > { %v3397_v1 = vld [vmem:[%s4121_s6 + $0xc0] sm:$0xff]   ;;  %2779 = vmatprep.subr.bf16.mxu0 %v3392_v0  ;;  %v3421_v5 = vld [vmem:[%s4121_s6 + $0xc8] sm:$0xff]   ;;  %v3445_v9 = vld [vmem:[%s4121_s6 + $0xd0] sm:$0xff]   ;;  %s4053_s28 = sld [smem:[#allocation4]]  ;;  %vm1841_vm2 = vcmask 523264  }
  0x32   : > { %v3403_v2 = vld [vmem:[%s4121_s6] sm:$0xff]   ;;  %2801 = vmatprep.subr.bf16.mxu1 %v3397_v1  ;;  %v3427_v6 = vld [vmem:[%s4121_s6 + $0x8] sm:$0xff]   ;;  %v3451_v10 = vld [vmem:[%s4121_s6 + $0x10] sm:$0xff]   ;;  %s3521_s29 = scalar_select %p380_p3, %s3350_s10, 1 }
  0x33   : > { %v3409_v3 = vld [vmem:[%s4121_s6 + $0x80] sm:$0xff]   ;;  %2780 = vmatpush3.bf16.msra.mxu0 %v3403_v2  ;;  %v3433_v7 = vld [vmem:[%s4121_s6 + $0x88] sm:$0xff]   ;;  %v3457_v11 = vld [vmem:[%s4121_s6 + $0x90] sm:$0xff]   ;;  %s2285_s11 = sld [smem:[#allocation2 + %s3350_s10]] }
  0x34   : > { %2802 = vmatpush3.bf16.msra.mxu1 %v3409_v3  ;;  %2781 = vmatprep.subr.bf16.mxu0 %v3415_v4  ;;  %v3463_v12 = vld [vmem:[%s4121_s6 + $0x58] sm:$0xff]   ;;  %v3487_v16 = vld [vmem:[%s4121_s6 + $0x60] sm:$0xff]   ;;  %v3512_v20 = vld [vmem:[%s4121_s6 + $0x68] sm:$0xff]   ;;  %s3077_s19 = smul.u32 48, %s3521_s29  ;;  %s2777_s24 = sshll.u32 %s3521_s29, 3 }
  0x35   : > { %2803 = vmatprep.subr.bf16.mxu1 %v3421_v5  ;;  %v3469_v13 = vld [vmem:[%s4121_s6 + $0xd8] sm:$0xff]   ;;  %v3493_v17 = vld [vmem:[%s4121_s6 + $0xe0] sm:$0xff]   ;;  %v3518_v21 = vld [vmem:[%s4121_s6 + $0xe8] sm:$0xff]   ;;  %s3078_s14 = smul.u32 24, %s3521_s29  ;;  %s384_s27 = scalar_lea.vmem %s4117_s2, %s2777_s24 }
  0x36   : > { %v3475_v14 = vld [vmem:[%s4121_s6 + $0x18] sm:$0xff]   ;;  %v3500_v18 = vld [vmem:[%s4121_s6 + $0x20] sm:$0xff]   ;;  %v3527_v22 = vld [vmem:[%s4121_s6 + $0x28] sm:$0xff]   ;;  %s3575_s12 = scalar_lea.vmem %s4118_s3, %s3077_s19  ;;  %s399_s17 = scalar_lea.vmem %s4124_s9, %s2777_s24 }
  0x37   : > { %2782 = vmatpush3.bf16.msra.mxu0 %v3427_v6  ;;  %v3481_v15 = vld [vmem:[%s4121_s6 + $0x98] sm:$0xff]   ;;  %v3506_v19 = vld [vmem:[%s4121_s6 + $0xa0] sm:$0xff]   ;;  %v3533_v23 = vld [vmem:[%s4121_s6 + $0xa8] sm:$0xff]   ;;  %s394_s21 = scalar_lea.vmem %s4119_s4, %s3078_s14 }
  0x38   : > { %2804 = vmatpush3.bf16.msra.mxu1 %v3433_v7  ;;  %2783 = vmatprep.subr.bf16.mxu0 %v3439_v8  ;;  %v3539_v24 = vld [vmem:[%s4121_s6 + $0x70] sm:$0xff]   ;;  %v3564_v28 = vld [vmem:[%s4121_s6 + $0x78] sm:$0xff]   ;;  %v405_v32 = vld [vmem:[%s3575_s12 + $0x8] sm:$0xff] }
  0x39   : > { %2805 = vmatprep.subr.bf16.mxu1 %v3445_v9  ;;  %v3545_v25 = vld [vmem:[%s4121_s6 + $0xf0] sm:$0xff]   ;;  %v3570_v29 = vld [vmem:[%s4121_s6 + $0xf8] sm:$0xff]   ;;  %v404_v34 = vld [vmem:[%s3575_s12] sm:$0xff]  ;;  %v3594_v35 = vpack.c.bf16 %v405_v32, %v405_v32  ;;  %s2286_s13 = scvt.s32.f32 %s2285_s11 }
  0x3a   : > { %v3552_v26 = vld [vmem:[%s4121_s6 + $0x30] sm:$0xff]   ;;  %v3581_v30 = vld [vmem:[%s4121_s6 + $0x38] sm:$0xff]   ;;  %v3598_v37 = vpack.c.bf16 %v404_v34, %v404_v34  ;;  %v3606_v40 = vld [vmem:[%s4121_s6 + $0x140] sm:$0xff]  }
  0x3b   : > { %2784 = vmatpush3.bf16.msra.mxu0 %v3451_v10  ;;  %v3558_v27 = vld [vmem:[%s4121_s6 + $0xb0] sm:$0xff]   ;;  %v3587_v31 = vld [vmem:[%s4121_s6 + $0xb8] sm:$0xff]   ;;  %850 = vmatprep.mubr.bf16.mxu0 %v3594_v35  ;;  %v3614_v41 = vld [vmem:[%s4121_s6 + $0x100] sm:$0xff]  }
  0x3c   : > { %2806 = vmatpush3.bf16.msra.mxu1 %v3457_v11  ;;  %2785 = vmatprep.subr.bf16.mxu0 %v3463_v12  ;;  %v407_v33 = vld [vmem:[%s3575_s12 + $0x18] sm:$0xff]  ;;  %v406_v38 = vld [vmem:[%s3575_s12 + $0x10] sm:$0xff]  ;;  %v3621_v42 = vld [vmem:[%s4121_s6 + $0x148] sm:$0xff]  }
  0x3d   : > { %2807 = vmatprep.subr.bf16.mxu1 %v3469_v13  ;;  %v3596_v36 = vpack.c.bf16 %v407_v33, %v407_v33  ;;  %v3601_v39 = vpack.c.bf16 %v406_v38, %v406_v38  ;;  %v3630_v43 = vld [vmem:[%s4121_s6 + $0x108] sm:$0xff]   ;;  %v3636_v44 = vld [vmem:[%s4121_s6 + $0x150] sm:$0xff]   ;;  %v3650_v46 = vld [vmem:[%s4121_s6 + $0x158] sm:$0xff]  }
  0x3e   : > { %v3644_v45 = vld [vmem:[%s4121_s6 + $0x110] sm:$0xff]   ;;  %v3159_v47 = vld [vmem:[%s4121_s6 + $0x118] sm:$0xff]   ;;  %v3160_v48 = vld [vmem:[%s4121_s6 + $0x160] sm:$0xff]  }
  0x3f   : > { %2786 = vmatpush3.bf16.msra.mxu0 %v3475_v14  ;;  %890 = vmatprep.mubr.bf16.mxu1 %v3596_v36  ;;  %v409_v49 = vld [vmem:[%s3575_s12 + $0x28] sm:$0xff]  ;;  %v3161_v50 = vld [vmem:[%s4121_s6 + $0x120] sm:$0xff]   ;;  %v3164_v57 = vld [vmem:[%s4121_s6 + $0x170] sm:$0xff]  }
  0x40   : > { %2808 = vmatpush3.bf16.msra.mxu1 %v3481_v15  ;;  %2787 = vmatprep.subr.bf16.mxu0 %v3487_v16  ;;  %v3672_v51 = vpack.c.bf16 %v409_v49, %v409_v49  ;;  %v416_v52 = vld [vmem:[%s394_s21] sm:$0xff]  ;;  %v3162_v53 = vld [vmem:[%s4121_s6 + $0x168] sm:$0xff]   ;;  %v3165_v58 = vld [vmem:[%s4121_s6 + $0x130] sm:$0xff]  }
  0x41   : > { %2809 = vmatprep.subr.bf16.mxu1 %v3493_v17  ;;  %v422_v54 = vcombine.high %v416_v52, %v416_v52  ;;  %v3163_v56 = vld [vmem:[%s4121_s6 + $0x128] sm:$0xff]   ;;  %v3166_v59 = vld [vmem:[%s4121_s6 + $0x178] sm:$0xff]   ;;  %v418_v62 = vld [vmem:[%s394_s21 + $0x10] sm:$0xff] }
  0x42   : > { %v3167_v60 = vld [vmem:[%s4121_s6 + $0x138] sm:$0xff]   ;;  %v417_v61 = vld [vmem:[%s394_s21 + $0x8] sm:$0xff]  ;;  %v408_v63 = vld [vmem:[%s3575_s12 + $0x20] sm:$0xff] }
  0x43   : > { %2788 = vmatpush3.bf16.msra.mxu0 %v3500_v18  ;;  %v3679_v55 = vpack.c.bf16 %v422_v54, %v422_v54  ;;  %v3878_v32 = vld [vmem:[%s4122_s7 + $0xf0] sm:$0xff]   ;;  %v3199_v38 = vld [vmem:[%s4122_s7 + $0x78] sm:$0xff]   ;;  %v3212_v49 = vld [vmem:[%s4122_s7 + $0x120] sm:$0xff]  }
  0x44   : > { %2810 = vmatpush3.bf16.msra.mxu1 %v3506_v19  ;;  %2789 = vmatprep.subr.bf16.mxu0 %v3512_v20  ;;  %v3195_v33 = vld [vmem:[%s4122_s7 + $0x70] sm:$0xff]   ;;  %v3217_v54 = vld [vmem:[%s4122_s7 + $0x178] sm:$0xff]  }
  0x45   : > { %2811 = vmatprep.subr.bf16.mxu1 %v3518_v21  ;;  %v3887_v34 = vld [vmem:[%s4122_s7 + $0xb0] sm:$0xff]  }
  0x47   : > { %2790 = vmatpush3.bf16.msra.mxu0 %v3527_v22 }
  0x48   : > { %2812 = vmatpush3.bf16.msra.mxu1 %v3533_v23  ;;  %2791 = vmatprep.subr.bf16.mxu0 %v3539_v24 }
  0x49   : > { %2813 = vmatprep.subr.bf16.mxu1 %v3545_v25 }
  0x4b   : > { %2792 = vmatpush3.bf16.msra.mxu0 %v3552_v26 }
  0x4c   : > { %2814 = vmatpush3.bf16.msra.mxu1 %v3558_v27  ;;  %2793 = vmatprep.subr.bf16.mxu0 %v3564_v28 }
  0x4d   : > { %2815 = vmatprep.subr.bf16.mxu1 %v3570_v29 }
  0x4f   : > { %2794 = vmatpush3.bf16.msra.mxu0 %v3581_v30 }
  0x50   : > { %2816 = vmatpush3.bf16.msra.mxu1 %v3587_v31  ;;  %2823 = vmatprep.subr.bf16.mxu0 %v3606_v40 }
  0x51   : > { %2845 = vmatprep.subr.bf16.mxu1 %v3392_v0  ;;  %v423_v0 = vcombine.high %v417_v61, %v417_v61 }
  0x52   : > { %851 = vmatmul.mubr.bf16.vlgmr.msra.gmra.mrb[0].mxu0 %v3598_v37 }
  0x53   : > { %891 = vmatmul.mubr.bf16.vlgmr.msra.gmra.mrb[0].mxu1 %v3601_v39  ;;  %2824 = vmatpush3.bf16.msra.mxu0 %v3614_v41 }
  0x54   : > { %2846 = vmatpush3.bf16.msra.mxu1 %v3403_v2  ;;  %2825 = vmatprep.subr.bf16.mxu0 %v3621_v42  ;;  %v3703_v2 = vpack.c.bf16 %v416_v52, %v416_v52  ;;  %v3215_v52 = vld [vmem:[%s4122_s7 + $0x170] sm:$0xff]  }
  0x55   : > { %2847 = vmatprep.subr.bf16.mxu1 %v3415_v4  ;;  %930 = vmatprep.mubr.bf16.mxu0 %v3672_v51  ;;  %v424_v4 = vcombine.high %v418_v62, %v418_v62 }
  0x56   : > { %972 = vmatprep.mubr.bf16.mxu1 %v3679_v55 }
  0x57   : > { %2826 = vmatpush3.bf16.msra.mxu0 %v3630_v43 }
  0x58   : > { %2848 = vmatpush3.bf16.msra.mxu1 %v3427_v6  ;;  %2827 = vmatprep.subr.bf16.mxu0 %v3636_v44  ;;  %v3706_v6 = vpack.c.bf16 %v408_v63, %v408_v63  ;;  %v1692_v63 = vld [vmem:[%s4120_s5 + $0x20] sm:$0xff] }
  0x59   : > { %2849 = vmatprep.subr.bf16.mxu1 %v3439_v8  ;;  %v3710_v8 = vpack.c.bf16 %v423_v0, %v423_v0  ;;  %v1693_v0 = vld [vmem:[%s4120_s5 + $0x28] sm:$0xff] }
  0x5b   : > { %2828 = vmatpush3.bf16.msra.mxu0 %v3644_v45 }
  0x5c   : > { %2850 = vmatpush3.bf16.msra.mxu1 %v3451_v10  ;;  %2829 = vmatprep.subr.bf16.mxu0 %v3650_v46  ;;  %v3713_v10 = vpack.c.bf16 %v424_v4, %v424_v4  ;;  %v1695_v4 = vld [vmem:[%s4120_s5 + $0x38] sm:$0xff] }
  0x5d   : > { %2851 = vmatprep.subr.bf16.mxu1 %v3463_v12  ;;  %v3767_v12 = vld [vmem:[%s4122_s7 + $0xc8] sm:$0xff]  }
  0x5f   : > { %2830 = vmatpush3.bf16.msra.mxu0 %v3159_v47 }
  0x60   : > { %2852 = vmatpush3.bf16.msra.mxu1 %v3475_v14  ;;  %2831 = vmatprep.subr.bf16.mxu0 %v3160_v48  ;;  %v3781_v14 = vld [vmem:[%s4122_s7 + $0x88] sm:$0xff]  }
  0x61   : > { %2853 = vmatprep.subr.bf16.mxu1 %v3487_v16  ;;  %v3793_v16 = vld [vmem:[%s4122_s7 + $0xd0] sm:$0xff]  }
  0x63   : > { %2832 = vmatpush3.bf16.msra.mxu0 %v3161_v50 }
  0x64   : > { %2854 = vmatpush3.bf16.msra.mxu1 %v3500_v18  ;;  %2833 = vmatprep.subr.bf16.mxu0 %v3162_v53  ;;  %v3807_v18 = vld [vmem:[%s4122_s7 + $0x90] sm:$0xff]  }
  0x65   : > { %2855 = vmatprep.subr.bf16.mxu1 %v3512_v20  ;;  %v3819_v20 = vld [vmem:[%s4122_s7 + $0xd8] sm:$0xff]  }
  0x67   : > { %2834 = vmatpush3.bf16.msra.mxu0 %v3163_v56 }
  0x68   : > { %2856 = vmatpush3.bf16.msra.mxu1 %v3527_v22  ;;  %2835 = vmatprep.subr.bf16.mxu0 %v3164_v57  ;;  %v3831_v22 = vld [vmem:[%s4122_s7 + $0x98] sm:$0xff]  }
  0x69   : > { %2857 = vmatprep.subr.bf16.mxu1 %v3539_v24  ;;  %v3841_v24 = vld [vmem:[%s4122_s7 + $0xe0] sm:$0xff]  }
  0x6b   : > { %2836 = vmatpush3.bf16.msra.mxu0 %v3165_v58 }
  0x6c   : > { %2858 = vmatpush3.bf16.msra.mxu1 %v3552_v26  ;;  %2837 = vmatprep.subr.bf16.mxu0 %v3166_v59  ;;  %v3851_v26 = vld [vmem:[%s4122_s7 + $0xa0] sm:$0xff]  }
  0x6d   : > { %2859 = vmatprep.subr.bf16.mxu1 %v3564_v28  ;;  %v3860_v28 = vld [vmem:[%s4122_s7 + $0xe8] sm:$0xff]  }
  0x6f   : > { %2838 = vmatpush3.bf16.msra.mxu0 %v3167_v60 }
  0x70   : > { %2860 = vmatpush3.bf16.msra.mxu1 %v3581_v30  ;;  %2867 = vmatprep.subr.bf16.mxu0 %v3397_v1  ;;  %v3740_v1 = vld [vmem:[%s4122_s7 + $0xc0] sm:$0xff]   ;;  %v3869_v30 = vld [vmem:[%s4122_s7 + $0xa8] sm:$0xff]  }
  0x71   : > { %2889 = vmatprep.subr.bf16.mxu1 %v3606_v40  ;;  %v3905_v40 = vld [vmem:[%s4122_s7 + $0xb8] sm:$0xff]  }
  0x72   : > { %931 = vmatmul.mubr.bf16.vlgmr.msra.gmra.mrb[4].mxu0 %v3706_v6 }
  0x73   : > { %973 = vmatmul.mubr.bf16.vlgmr.msra.gmra.mrb[4].mxu1 %v3703_v2  ;;  %2868 = vmatpush3.bf16.msra.mxu0 %v3409_v3  ;;  %v3746_v3 = vld [vmem:[%s4122_s7 + $0x40] sm:$0xff]  }
  0x74   : > { %2890 = vmatpush3.bf16.msra.mxu1 %v3614_v41  ;;  %2869 = vmatprep.subr.bf16.mxu0 %v3421_v5  ;;  %v3748_v5 = vpack.c.bf16 %v418_v62, %v418_v62  ;;  %v3201_v41 = vld [vmem:[%s4122_s7 + $0x38] sm:$0xff]  }
  0x75   : > { %2891 = vmatprep.subr.bf16.mxu1 %v3621_v42  ;;  %1012 = vmatprep.mubr.bf16.mxu0 %v3710_v8  ;;  %v3203_v42 = vld [vmem:[%s4122_s7 + $0x140] sm:$0xff]   ;;  %v1691_v62 = vld [vmem:[%s4120_s5 + $0x18] sm:$0xff] }
  0x76   : > { %1052 = vmatprep.mubr.bf16.mxu1 %v3713_v10 }
  0x77   : > { %2870 = vmatpush3.bf16.msra.mxu0 %v3433_v7  ;;  %v3753_v7 = vld [vmem:[%s4122_s7] sm:$0xff]  }
  0x78   : > { %2892 = vmatpush3.bf16.msra.mxu1 %v3630_v43  ;;  %2871 = vmatprep.subr.bf16.mxu0 %v3445_v9  ;;  %v3755_v9 = vpack.c.bf16 %v417_v61, %v417_v61  ;;  %v3204_v43 = vld [vmem:[%s4122_s7 + $0x100] sm:$0xff]   ;;  %v1690_v61 = vld [vmem:[%s4120_s5 + $0x10] sm:$0xff] }
  0x79   : > { %2893 = vmatprep.subr.bf16.mxu1 %v3636_v44  ;;  %v3205_v44 = vld [vmem:[%s4122_s7 + $0x148] sm:$0xff]  }
  0x7b   : > { %2872 = vmatpush3.bf16.msra.mxu0 %v3457_v11  ;;  %v3760_v11 = vld [vmem:[%s4122_s7 + $0x80] sm:$0xff]  }
  0x7c   : > { %2894 = vmatpush3.bf16.msra.mxu1 %v3644_v45  ;;  %2873 = vmatprep.subr.bf16.mxu0 %v3469_v13  ;;  %v3773_v13 = vld [vmem:[%s4122_s7 + $0x48] sm:$0xff]  }
  0x7d   : > { %2895 = vmatprep.subr.bf16.mxu1 %v3650_v46  ;;  %v3206_v45 = vld [vmem:[%s4122_s7 + $0x108] sm:$0xff]   ;;  %v3207_v46 = vld [vmem:[%s4122_s7 + $0x150] sm:$0xff]  }
  0x7f   : > { %2874 = vmatpush3.bf16.msra.mxu0 %v3481_v15  ;;  %v3788_v15 = vld [vmem:[%s4122_s7 + $0x8] sm:$0xff]  }
  0x80   : > { %2896 = vmatpush3.bf16.msra.mxu1 %v3159_v47  ;;  %2875 = vmatprep.subr.bf16.mxu0 %v3493_v17  ;;  %v3799_v17 = vld [vmem:[%s4122_s7 + $0x50] sm:$0xff]   ;;  %v3210_v47 = vld [vmem:[%s4122_s7 + $0x118] sm:$0xff]  }
  0x81   : > { %2897 = vmatprep.subr.bf16.mxu1 %v3160_v48  ;;  %v3211_v48 = vld [vmem:[%s4122_s7 + $0x160] sm:$0xff]  }
  0x83   : > { %2876 = vmatpush3.bf16.msra.mxu0 %v3506_v19  ;;  %v3814_v19 = vld [vmem:[%s4122_s7 + $0x10] sm:$0xff]  }
  0x84   : > { %2898 = vmatpush3.bf16.msra.mxu1 %v3161_v50  ;;  %2877 = vmatprep.subr.bf16.mxu0 %v3518_v21  ;;  %v3825_v21 = vld [vmem:[%s4122_s7 + $0x58] sm:$0xff]   ;;  %v3213_v50 = vld [vmem:[%s4122_s7 + $0x168] sm:$0xff]  }
  0x85   : > { %2899 = vmatprep.subr.bf16.mxu1 %v3162_v53  ;;  %v3216_v53 = vld [vmem:[%s4122_s7 + $0x130] sm:$0xff]  }
  0x87   : > { %2878 = vmatpush3.bf16.msra.mxu0 %v3533_v23  ;;  %v3185_v23 = vld [vmem:[%s4122_s7 + $0x18] sm:$0xff]  }
  0x88   : > { %2900 = vmatpush3.bf16.msra.mxu1 %v3163_v56  ;;  %2879 = vmatprep.subr.bf16.mxu0 %v3545_v25  ;;  %v3187_v25 = vld [vmem:[%s4122_s7 + $0x60] sm:$0xff]  }
  0x89   : > { %2901 = vmatprep.subr.bf16.mxu1 %v3164_v57  ;;  %v3994_v56 = vld [vmem:[%s384_s27] sm:$0xff]  ;;  %s4051_s27 = sld [smem:[#allocation4 + $0x1]] }
  0x8a   : > { %v1697_v57 = vcombine.high %v3994_v56, %v3994_v56 }
  0x8b   : > { %2880 = vmatpush3.bf16.msra.mxu0 %v3558_v27  ;;  %v3189_v27 = vld [vmem:[%s4122_s7 + $0x20] sm:$0xff]  }
  0x8c   : > { %2902 = vmatpush3.bf16.msra.mxu1 %v3165_v58  ;;  %2881 = vmatprep.subr.bf16.mxu0 %v3570_v29  ;;  %v3191_v29 = vld [vmem:[%s4122_s7 + $0x68] sm:$0xff]   ;;  %v3286_v58 = vmov 0.0  }
  0x8d   : > { %2903 = vmatprep.subr.bf16.mxu1 %v3166_v59  ;;  %v1688_v59 = vld [vmem:[%s4120_s5] sm:$0xff] }
  0x8f   : > { %2882 = vmatpush3.bf16.msra.mxu0 %v3587_v31  ;;  %v3193_v31 = vld [vmem:[%s4122_s7 + $0x28] sm:$0xff]  }
  0x90   : > { %2904 = vmatpush3.bf16.msra.mxu1 %v3167_v60  ;;  %2911 = vmatprep.subr.bf16.mxu0 %v3746_v3  ;;  %v1689_v60 = vld [vmem:[%s4120_s5 + $0x8] sm:$0xff] }
  0x91   : > { %2933 = vmatprep.subr.bf16.mxu1 %v3740_v1 }
  0x92   : > { %1013 = vmatmul.mubr.bf16.vlgmr.msra.gmra.mrb[8].mxu0 %v3755_v9 }
  0x93   : > { %1053 = vmatmul.mubr.bf16.vlgmr.msra.gmra.mrb[8].mxu1 %v3748_v5  ;;  %2912 = vmatpush3.bf16.msra.mxu0 %v3753_v7 }
  0x94   : > { %2934 = vmatpush3.bf16.msra.mxu1 %v3760_v11  ;;  %2913 = vmatprep.subr.bf16.mxu0 %v3773_v13 }
  0x95   : > { %2935 = vmatprep.subr.bf16.mxu1 %v3767_v12  ;;  %1478 = vmatprep.mubr.bf16.mxu0 %v3594_v35  ;;  %v3197_v35 = vld [vmem:[%s4122_s7 + $0x30] sm:$0xff]  }
  0x96   : > { %1518 = vmatprep.mubr.bf16.mxu1 %v3596_v36  ;;  %v3896_v36 = vld [vmem:[%s4122_s7 + $0xf8] sm:$0xff]  }
  0x97   : > { %2914 = vmatpush3.bf16.msra.mxu0 %v3788_v15 }
  0x98   : > { %2936 = vmatpush3.bf16.msra.mxu1 %v3781_v14  ;;  %2915 = vmatprep.subr.bf16.mxu0 %v3799_v17 }
  0x99   : > { %2937 = vmatprep.subr.bf16.mxu1 %v3793_v16 }
  0x9b   : > { %2916 = vmatpush3.bf16.msra.mxu0 %v3814_v19 }
  0x9c   : > { %2938 = vmatpush3.bf16.msra.mxu1 %v3807_v18  ;;  %2917 = vmatprep.subr.bf16.mxu0 %v3825_v21 }
  0x9d   : > { %2939 = vmatprep.subr.bf16.mxu1 %v3819_v20 }
  0x9f   : > { %2918 = vmatpush3.bf16.msra.mxu0 %v3185_v23 }
  0xa0   : > { %2940 = vmatpush3.bf16.msra.mxu1 %v3831_v22  ;;  %2919 = vmatprep.subr.bf16.mxu0 %v3187_v25 }
  0xa1   : > { %2941 = vmatprep.subr.bf16.mxu1 %v3841_v24 }
  0xa3   : > { %2920 = vmatpush3.bf16.msra.mxu0 %v3189_v27 }
  0xa4   : > { %2942 = vmatpush3.bf16.msra.mxu1 %v3851_v26  ;;  %2921 = vmatprep.subr.bf16.mxu0 %v3191_v29 }
  0xa5   : > { %2943 = vmatprep.subr.bf16.mxu1 %v3860_v28 }
  0xa7   : > { %2922 = vmatpush3.bf16.msra.mxu0 %v3193_v31 }
  0xa8   : > { %2944 = vmatpush3.bf16.msra.mxu1 %v3869_v30  ;;  %2923 = vmatprep.subr.bf16.mxu0 %v3195_v33 }
  0xa9   : > { %2945 = vmatprep.subr.bf16.mxu1 %v3878_v32 }
  0xab   : > { %2924 = vmatpush3.bf16.msra.mxu0 %v3197_v35 }
  0xac   : > { %2946 = vmatpush3.bf16.msra.mxu1 %v3887_v34  ;;  %2925 = vmatprep.subr.bf16.mxu0 %v3199_v38 }
  0xad   : > { %2947 = vmatprep.subr.bf16.mxu1 %v3896_v36 }
  0xaf   : > { %2926 = vmatpush3.bf16.msra.mxu0 %v3201_v41 }
  0xb0   : > { %2948 = vmatpush3.bf16.msra.mxu1 %v3905_v40  ;;  %2955 = vmatprep.subr.bf16.mxu0 %v3203_v42 }
  0xb1   : > { %2977 = vmatprep.subr.bf16.mxu1 %v3746_v3 }
  0xb2   : > { %1479 = vmatmul.mubr.bf16.vlgmr.msra.gmra.mrb[12].mxu0 %v3598_v37  ;;  %v3208_v37 = vld [vmem:[%s4122_s7 + $0x110] sm:$0xff]  }
  0xb3   : > { %1519 = vmatmul.mubr.bf16.vlgmr.msra.gmra.mrb[12].mxu1 %v3601_v39  ;;  %2956 = vmatpush3.bf16.msra.mxu0 %v3204_v43  ;;  %v3209_v39 = vld [vmem:[%s4122_s7 + $0x158] sm:$0xff]  }
  0xb4   : > { %2978 = vmatpush3.bf16.msra.mxu1 %v3753_v7  ;;  %2957 = vmatprep.subr.bf16.mxu0 %v3205_v44 }
  0xb5   : > { %2979 = vmatprep.subr.bf16.mxu1 %v3773_v13  ;;  %1558 = vmatprep.mubr.bf16.mxu0 %v3672_v51  ;;  %v3214_v51 = vld [vmem:[%s4122_s7 + $0x128] sm:$0xff]  }
  0xb6   : > { %1599 = vmatprep.mubr.bf16.mxu1 %v3679_v55  ;;  %v3218_v55 = vld [vmem:[%s4122_s7 + $0x138] sm:$0xff]  }
  0xb7   : > { %2958 = vmatpush3.bf16.msra.mxu0 %v3206_v45 }
  0xb8   : > { %2980 = vmatpush3.bf16.msra.mxu1 %v3788_v15  ;;  %2959 = vmatprep.subr.bf16.mxu0 %v3207_v46 }
  0xb9   : > { %2981 = vmatprep.subr.bf16.mxu1 %v3799_v17 }
  0xbb   : > { %2960 = vmatpush3.bf16.msra.mxu0 %v3208_v37 }
  0xbc   : > { %2982 = vmatpush3.bf16.msra.mxu1 %v3814_v19  ;;  %2961 = vmatprep.subr.bf16.mxu0 %v3209_v39 }
  0xbd   : > { %2983 = vmatprep.subr.bf16.mxu1 %v3825_v21 }
  0xbf   : > { %2962 = vmatpush3.bf16.msra.mxu0 %v3210_v47 }
  0xc0   : > { %2984 = vmatpush3.bf16.msra.mxu1 %v3185_v23  ;;  %2963 = vmatprep.subr.bf16.mxu0 %v3211_v48 }
  0xc1   : > { %2985 = vmatprep.subr.bf16.mxu1 %v3187_v25 }
  0xc3   : > { %2964 = vmatpush3.bf16.msra.mxu0 %v3212_v49 }
  0xc4   : > { %2986 = vmatpush3.bf16.msra.mxu1 %v3189_v27  ;;  %2965 = vmatprep.subr.bf16.mxu0 %v3213_v50 }
  0xc5   : > { %2987 = vmatprep.subr.bf16.mxu1 %v3191_v29 }
  0xc7   : > { %2966 = vmatpush3.bf16.msra.mxu0 %v3214_v51 }
  0xc8   : > { %2988 = vmatpush3.bf16.msra.mxu1 %v3193_v31  ;;  %2967 = vmatprep.subr.bf16.mxu0 %v3215_v52 }
  0xc9   : > { %2989 = vmatprep.subr.bf16.mxu1 %v3195_v33 }
  0xcb   : > { %2968 = vmatpush3.bf16.msra.mxu0 %v3216_v53 }
  0xcc   : > { %2990 = vmatpush3.bf16.msra.mxu1 %v3197_v35  ;;  %2969 = vmatprep.subr.bf16.mxu0 %v3217_v54 }
  0xcd   : > { %2991 = vmatprep.subr.bf16.mxu1 %v3199_v38 }
  0xcf   : > { %2970 = vmatpush3.bf16.msra.mxu0 %v3218_v55 }
  0xd0   : > { %2992 = vmatpush3.bf16.msra.mxu1 %v3201_v41  ;;  %2999 = vmatprep.subr.bf16.mxu0 %v3740_v1 }
  0xd1   : > { %3021 = vmatprep.subr.bf16.mxu1 %v3203_v42 }
  0xd2   : > { %1559 = vmatmul.mubr.bf16.vlgmr.msra.gmra.mrb[16].mxu0 %v3706_v6 }
  0xd3   : > { %1600 = vmatmul.mubr.bf16.vlgmr.msra.gmra.mrb[16].mxu1 %v3703_v2  ;;  %3000 = vmatpush3.bf16.msra.mxu0 %v3760_v11  ;;  %v1694_v2 = vld [vmem:[%s4120_s5 + $0x30] sm:$0xff] }
  0xd4   : > { %3022 = vmatpush3.bf16.msra.mxu1 %v3204_v43  ;;  %3001 = vmatprep.subr.bf16.mxu0 %v3767_v12 }
  0xd5   : > { %3023 = vmatprep.subr.bf16.mxu1 %v3205_v44  ;;  %1639 = vmatprep.mubr.bf16.mxu0 %v3710_v8 }
  0xd6   : > { %1679 = vmatprep.mubr.bf16.mxu1 %v3713_v10 }
  0xd7   : > { %3002 = vmatpush3.bf16.msra.mxu0 %v3781_v14 }
  0xd8   : > { %3024 = vmatpush3.bf16.msra.mxu1 %v3206_v45  ;;  %3003 = vmatprep.subr.bf16.mxu0 %v3793_v16 }
  0xd9   : > { %3025 = vmatprep.subr.bf16.mxu1 %v3207_v46 }
  0xdb   : > { %3004 = vmatpush3.bf16.msra.mxu0 %v3807_v18 }
  0xdc   : > { %3026 = vmatpush3.bf16.msra.mxu1 %v3208_v37  ;;  %3005 = vmatprep.subr.bf16.mxu0 %v3819_v20 }
  0xdd   : > { %3027 = vmatprep.subr.bf16.mxu1 %v3209_v39 }
  0xdf   : > { %3006 = vmatpush3.bf16.msra.mxu0 %v3831_v22 }
  0xe0   : > { %3028 = vmatpush3.bf16.msra.mxu1 %v3210_v47  ;;  %3007 = vmatprep.subr.bf16.mxu0 %v3841_v24 }
  0xe1   : > { %3029 = vmatprep.subr.bf16.mxu1 %v3211_v48 }
  0xe3   : > { %3008 = vmatpush3.bf16.msra.mxu0 %v3851_v26 }
  0xe4   : > { %3030 = vmatpush3.bf16.msra.mxu1 %v3212_v49  ;;  %3009 = vmatprep.subr.bf16.mxu0 %v3860_v28 }
  0xe5   : > { %3031 = vmatprep.subr.bf16.mxu1 %v3213_v50 }
  0xe7   : > { %3010 = vmatpush3.bf16.msra.mxu0 %v3869_v30 }
  0xe8   : > { %3032 = vmatpush3.bf16.msra.mxu1 %v3214_v51  ;;  %3011 = vmatprep.subr.bf16.mxu0 %v3878_v32 }
  0xe9   : > { %3033 = vmatprep.subr.bf16.mxu1 %v3215_v52 }
  0xeb   : > { %3012 = vmatpush3.bf16.msra.mxu0 %v3887_v34 }
  0xec   : > { %3034 = vmatpush3.bf16.msra.mxu1 %v3216_v53  ;;  %3013 = vmatprep.subr.bf16.mxu0 %v3896_v36 }
  0xed   : > { %3035 = vmatprep.subr.bf16.mxu1 %v3217_v54 }
  0xef   : > { %3014 = vmatpush3.bf16.msra.mxu0 %v3905_v40 }
  0xf0   : > { %3036 = vmatpush3.bf16.msra.mxu1 %v3218_v55  ;;  %2751 = vmatprep.subr.msk.mxu0 %vm1723_vm0, %v1697_v57 }
  0xf2   : > { %1640 = vmatmul.mubr.bf16.vlgmr.msra.gmra.mrb[20].mxu0 %v3755_v9 }
  0xf3   : > { %1680 = vmatmul.mubr.bf16.vlgmr.msra.gmra.mrb[20].mxu1 %v3748_v5  ;;  %2752 = vmatpush1.msk.msra.mxu0 %vm1723_vm0, %v3994_v56 }
  0xf4   : > { %1909 = vmatprep.mubr.f32.mxu1 %v3286_v58  ;;  %1792 = vmatprep.mubr.f32.mxu0 %v3286_v58 }
  0xfa   : > { %2753 = vmatmul.mubr.msk.f32.vlgmr.msra.gmra.mrb[24].mxu0 %vm1698_vm1, %v1688_v59 }
  0xfb   : > { %1798 = vmatprep.mubr.f32.mxu0 %v3286_v58 }
  0xfe   : > { %2754 = vmatmul.mubr.msk.f32.gmra.mrb[26].mxu0 %vm1698_vm1, %v1689_v60 }
  0xff   : > { %1804 = vmatprep.mubr.f32.mxu0 %v3286_v58 }
 0x102   : > { %2755 = vmatmul.mubr.msk.f32.gmra.mrb[28].mxu0 %vm1698_vm1, %v1690_v61 }
 0x103   : > { %1810 = vmatprep.mubr.f32.mxu0 %v3286_v58 }
 0x106   : > { %2756 = vmatmul.mubr.msk.f32.gmra.mrb[30].mxu0 %vm1698_vm1, %v1691_v62 }
 0x107   : > { %1816 = vmatprep.mubr.f32.mxu0 %v3286_v58 }
 0x10a   : > { %2757 = vmatmul.mubr.msk.f32.gmra.mrb[32].mxu0 %vm1698_vm1, %v1692_v63 }
 0x10b   : > { %1822 = vmatprep.mubr.f32.mxu0 %v3286_v58 }
 0x10e   : > { %2758 = vmatmul.mubr.msk.f32.gmra.mrb[34].mxu0 %vm1698_vm1, %v1693_v0 }
 0x10f   : > { %1828 = vmatprep.mubr.f32.mxu0 %v3286_v58 }
 0x112   : > { %2759 = vmatmul.mubr.msk.f32.gmra.mrb[36].mxu0 %vm1698_vm1, %v1694_v2 }
 0x113   : > { %1834 = vmatprep.mubr.f32.mxu0 %v3286_v58 }
 0x116   : > { %2760 = vmatmul.mubr.msk.f32.gmra.mrb[38].mxu0 %vm1698_vm1, %v1695_v4 }
 0x125   : > { %v2795_v6 = vpop.f32.mrb[0].mxu0 }
 0x126   : > { %v2817_v8 = vpop.f32.mrb[0].mxu1  ;;  %v2796_v10 = vpop.f32.mrb[1].mxu0 }
 0x127   : > { %v2818_v1 = vpop.f32.mrb[1].mxu1  ;;  %v2797_v3 = vadd.f32 %v2796_v10, %v2795_v6  ;;  %v2798_v7 = vpop.f32.mrb[2].mxu0 }
 0x128   : > { %v2819_v5 = vadd.f32 %v2818_v1, %v2817_v8  ;;  %v2820_v9 = vpop.f32.mrb[2].mxu1  ;;  %v2799_v11 = vpop.f32.mrb[3].mxu0  ;;  %v1060_v7 = vstv %s4051_s27 }
 0x129   : > { %v2821_v12 = vpop.f32.mrb[3].mxu1 }
 0x12a   : > { %v893_v13 = vadd.f32 %v2819_v5, %v2797_v3 }
 0x145   : > { %v2839_v15 = vpop.f32.mrb[4].mxu0 }
 0x146   : > { %v2861_v14 = vpop.f32.mrb[4].mxu1  ;;  %v2840_v17 = vpop.f32.mrb[5].mxu0 }
 0x147   : > { %v2862_v16 = vpop.f32.mrb[5].mxu1  ;;  %v2841_v20 = vadd.f32 %v2840_v17, %v2839_v15  ;;  %v2842_v21 = vpop.f32.mrb[6].mxu0 }
 0x148   : > { %v2863_v18 = vadd.f32 %v2862_v16, %v2861_v14  ;;  %v2864_v19 = vpop.f32.mrb[6].mxu1  ;;  %v2843_v23 = vpop.f32.mrb[7].mxu0 }
 0x149   : > { %v2865_v22 = vpop.f32.mrb[7].mxu1  ;;  %v4047_v24 = vadd.f32 %v2841_v20, %v893_v13  ;;  %v938_v13 = vstv %s4053_s28 }
 0x165   : > { %v2883_v26 = vpop.f32.mrb[8].mxu0 }
 0x166   : > { %v2905_v25 = vpop.f32.mrb[8].mxu1  ;;  %v2884_v28 = vpop.f32.mrb[9].mxu0 }
 0x167   : > { %v2906_v27 = vpop.f32.mrb[9].mxu1  ;;  %v2885_v31 = vadd.f32 %v2884_v28, %v2883_v26  ;;  %v2886_v32 = vpop.f32.mrb[10].mxu0 }
 0x168   : > { %v2907_v29 = vadd.f32 %v2906_v27, %v2905_v25  ;;  %v2908_v30 = vpop.f32.mrb[10].mxu1  ;;  %v2887_v34 = vpop.f32.mrb[11].mxu0 }
 0x169   : > { %v2909_v33 = vpop.f32.mrb[11].mxu1  ;;  %v1015_v35 = vadd.f32 %v2885_v31, %v2863_v18 }
 0x16b   : > { %v4049_v36 = vadd.f32 %v2907_v29, %v1015_v35 }
 0x185   : > { %v2927_v40 = vpop.f32.mrb[12].mxu0 }
 0x186   : > { %v2949_v38 = vpop.f32.mrb[12].mxu1  ;;  %v2928_v42 = vpop.f32.mrb[13].mxu0 }
 0x187   : > { %v2950_v41 = vpop.f32.mrb[13].mxu1  ;;  %v2929_v45 = vadd.f32 %v2928_v42, %v2927_v40  ;;  %v2930_v46 = vpop.f32.mrb[14].mxu0  ;;  %v1061_v42 = vmul.f32 %v1060_v7, %v4049_v36 }
 0x188   : > { %v2951_v43 = vadd.f32 %v2950_v41, %v2949_v38  ;;  %v2952_v44 = vpop.f32.mrb[14].mxu1  ;;  %v2931_v39 = vpop.f32.mrb[15].mxu0  ;;  %v939_v41 = vmul.f32 %v938_v13, %v4047_v24 }
 0x189   : > { %v2953_v37 = vpop.f32.mrb[15].mxu1 }
 0x18a   : > { %v1521_v47 = vadd.f32 %v2951_v43, %v2929_v45  ;;  %v2287_v43 = vlaneseq }
 0x18c   : > { %v4062_v24 = vand.u32 127, %v2287_v43 }
 0x18e   : > { %v2293_v44 = vand.u32 31, %v4062_v24 }
 0x190   : > { %v2301_v45 = vcvt.s32.f32 %v2293_v44 }
 0x192   : > { %v2302_v46 = vmul.f32 -0.28782314, %v2301_v45 }
 0x194   : > { %v2303_v37 = vmul.f32 1.442695, %v2302_v46 }
 0x196   : > { %3220 = vpow2.f32 %v2303_v37 }
 0x1a0   : > { %v3221_v39 = vpop.eup %3220 }
 0x1a5   : > { %v2971_v49 = vpop.f32.mrb[16].mxu0 }
 0x1a6   : > { %v2993_v48 = vpop.f32.mrb[16].mxu1  ;;  %v2972_v51 = vpop.f32.mrb[17].mxu0 }
 0x1a7   : > { %v2994_v50 = vpop.f32.mrb[17].mxu1  ;;  %v2973_v54 = vadd.f32 %v2972_v51, %v2971_v49  ;;  %v2974_v55 = vpop.f32.mrb[18].mxu0 }
 0x1a8   : > { %v2995_v52 = vadd.f32 %v2994_v50, %v2993_v48  ;;  %v2996_v53 = vpop.f32.mrb[18].mxu1  ;;  %v2975_v59 = vpop.f32.mrb[19].mxu0 }
 0x1a9   : > { %v2997_v57 = vpop.f32.mrb[19].mxu1  ;;  %v1561_v60 = vadd.f32 %v2973_v54, %v1521_v47  ;;  %v2305_v47 = vstv %s2286_s13 }
 0x1aa   : > { %v4066_v48 = vmul.f32 %v3221_v39, %v2305_v47 }
 0x1ab   : > { %v1566_v15 = vmul.f32 %v1561_v60, %v938_v13  ;;  %v3287_v60 = vmov 683565275  }
 0x1ac   : > { %v2311_v36 = vand.u32 2139095040, %v4066_v48  ;;  %vm2310_vm10 = vcmp.lt.s32.totalorder %v4066_v48, 0 }
 0x1ae   : > { %v2312_v49 = vshrl.u32 %v2311_v36, 23 }
 0x1b0   : > { %v2767_v50 = vadd.s32 4294967169, %v2312_v49 }
 0x1b2   : > { %v2318_v51 = vadd.s32 1, %v2767_v50 }
 0x1b4   : > { %vm2319_vm3 = vcmp.gt.s32.totalorder %v2318_v51, 0 }
 0x1b5   : > { %v2320_v53 = vsel %vm2319_vm3, %v2318_v51, 0 }
 0x1b6   : > { %v2321_v54 = vshrl.u32 %v2320_v53, 5  ;;  %v2322_v55 = vand.u32 31, %v2320_v53 }
 0x1b8   : > { %v2323_v59 = vsub.s32 32, %v2322_v55  ;;  %vm2340_vm4 = vcmp.lt.s32.totalorder %v2321_v54, 1  ;;  %vm2341_vm5 = vcmp.lt.s32.totalorder %v2321_v54, 2  ;;  %vm2342_vm6 = vcmp.lt.s32.totalorder %v2321_v54, 3 }
 0x1b9   : > { %vm2343_vm7 = vcmp.lt.s32.totalorder %v2321_v54, 4 }
 0x1c5   : > { %v3015_v62 = vpop.f32.mrb[20].mxu0 }
 0x1c6   : > { %v3037_v61 = vpop.f32.mrb[20].mxu1  ;;  %v3016_v0 = vpop.f32.mrb[21].mxu0 }
 0x1c7   : > { %v3038_v63 = vpop.f32.mrb[21].mxu1  ;;  %v3017_v6 = vadd.f32 %v3016_v0, %v3015_v62  ;;  %v3018_v8 = vpop.f32.mrb[22].mxu0  ;;  %v3288_v62 = vmov 2475754826   ;;  %v3289_v0 = vmov 2131351028  }
 0x1c8   : > { %v3039_v2 = vadd.f32 %v3038_v63, %v3037_v61  ;;  %v3040_v4 = vpop.f32.mrb[22].mxu1  ;;  %v3019_v1 = vpop.f32.mrb[23].mxu0  ;;  %v2325_v61 = vshll.u32 %v3287_v60, %v2322_v55  ;;  %v2328_v63 = vshll.u32 %v3288_v62, %v2322_v55  ;;  %v2326_v8 = vshrl.u32 %v3288_v62, %v2323_v59 }
 0x1c9   : > { %v3041_v10 = vpop.f32.mrb[23].mxu1  ;;  %v1642_v3 = vadd.f32 %v3017_v6, %v2995_v52  ;;  %v2308_v52 = vand.u32 2147483647, %v4066_v48  ;;  %v2324_v6 = vshrl.u32 %v3287_v60, %v2323_v59  ;;  %v3290_v1 = vmov 2102212464  }
 0x1ca   : > { %v2329_v10 = vshrl.u32 %v3289_v0, %v2323_v59 }
 0x1cb   : > { %v1682_v5 = vadd.f32 %v3039_v2, %v1642_v3  ;;  %v2315_v57 = vand.u32 8388607, %v2308_v52  ;;  %v2331_v2 = vshll.u32 %v3289_v0, %v2322_v55  ;;  %v2332_v3 = vshrl.u32 %v3290_v1, %v2323_v59 }
 0x1cc   : > { %v2330_v13 = vor.u32 %v2329_v10, %v2328_v63  ;;  %vm2309_vm11 = vcmp.le.f32.partialorder %v2308_v52, 0.7853982 }
 0x1cd   : > { %v1794_v9 = vpop.f32.mrb[24].mxu0  ;;  %v1687_v11 = vmul.f32 %v1682_v5, %v1060_v7  ;;  %v2316_v4 = vor.u32 8388608, %v2315_v57  ;;  %v2334_v5 = vshll.u32 %v3290_v1, %v2322_v55  ;;  %v3291_v7 = vmov 920167782  }
 0x1ce   : > { %v1796_v12 = vpop.f32.mrb[25].mxu0 }
 0x1cf   : > { %2064 = vxpose.xlu0.b32.start.end [1/1] (short) (narrow) %v1687_v11, 8  ;;  %v2337_v11 = vshll.u32 %v3291_v7, %v2322_v55 }
 0x1d1   : > { %v1800_v14 = vpop.f32.mrb[26].mxu0 }
 0x1d2   : > { %v3045_v16 = vpack.c.bf16 %v1800_v14, %v1794_v9  ;;  %v1802_v17 = vpop.f32.mrb[27].mxu0  ;;  %v2335_v9 = vshrl.u32 %v3291_v7, %v2323_v59  ;;  %v2333_v14 = vor.u32 %v2332_v3, %v2331_v2 }
 0x1d3   : > { %v3043_v18 = vpack.c.bf16 %v1802_v17, %v1796_v12  ;;  %2176 = vxpose.xlu0.b32.start.end [1/1] (short) (narrow) %v1566_v15, 8  ;;  %v2327_v12 = vor.u32 %v2326_v8, %v2325_v61  ;;  %v3292_v15 = vmov 1326507024  }
 0x1d4   : > { %v2336_v17 = vor.u32 %v2335_v9, %v2334_v5 }
 0x1d5   : > { %v1806_v19 = vpop.f32.mrb[28].mxu0  ;;  %3044 = vmatprep.subr.bf16.mxu1 %v3043_v18 }
 0x1d6   : > { %v1808_v20 = vpop.f32.mrb[29].mxu0  ;;  %3046 = vmatpush1.bf16.msra.mxu1 %v3045_v16 }
 0x1d9   : > { %v1812_v21 = vpop.f32.mrb[30].mxu0 }
 0x1da   : > { %v3049_v22 = vpack.c.bf16 %v1812_v21, %v1806_v19  ;;  %v1814_v23 = vpop.f32.mrb[31].mxu0  ;;  %v2344_v19 = vsel %vm2340_vm4, %v2324_v6, %v2327_v12  ;;  %v2348_v21 = vsel %vm2340_vm4, %v2327_v12, %v2330_v13 }
 0x1db   : > { %v3047_v25 = vpack.c.bf16 %v1814_v23, %v1808_v20  ;;  %v2345_v20 = vsel %vm2343_vm7, %v2333_v14, 2102212464  ;;  %v2349_v23 = vsel %vm2343_vm7, %v2336_v17, 920167782 }
 0x1dd   : > { %v1818_v26 = vpop.f32.mrb[32].mxu0  ;;  %3048 = vmatprep.subr.bf16.mxu1 %v3047_v25 }
 0x1de   : > { %v1820_v27 = vpop.f32.mrb[33].mxu0  ;;  %3050 = vmatpush1.bf16.msra.mxu1 %v3049_v22 }
 0x1e1   : > { %v1824_v28 = vpop.f32.mrb[34].mxu0 }
 0x1e2   : > { %v3053_v29 = vpack.c.bf16 %v1824_v28, %v1818_v26  ;;  %v1826_v30 = vpop.f32.mrb[35].mxu0  ;;  %v2356_v26 = vshll.u32 %v2316_v4, 8 }
 0x1e3   : > { %v3051_v31 = vpack.c.bf16 %v1826_v30, %v1820_v27  ;;  %v2350_v27 = vsel %vm2342_vm6, %v2333_v14, %v2349_v23  ;;  %v2516_v23 = vld [vmem:[%s4123_s8] sm:$0xf] }
 0x1e5   : > { %v1830_v32 = vpop.f32.mrb[36].mxu0  ;;  %3052 = vmatprep.subr.bf16.mxu1 %v3051_v31 }
 0x1e6   : > { %v1832_v33 = vpop.f32.mrb[37].mxu0  ;;  %3054 = vmatpush1.bf16.msra.mxu1 %v3053_v29 }
 0x1e9   : > { %v1836_v34 = vpop.f32.mrb[38].mxu0 }
 0x1ea   : > { %v3057_v35 = vpack.c.bf16 %v1836_v34, %v1830_v32  ;;  %v1838_v38 = vpop.f32.mrb[39].mxu0 }
 0x1eb   : > { %v3055_v40 = vpack.c.bf16 %v1838_v38, %v1832_v33 }
 0x1ed   : > { %3056 = vmatprep.subr.bf16.mxu1 %v3055_v40 }
 0x1ee   : > { %3058 = vmatpush1.bf16.msra.mxu1 %v3057_v35 }
 0x1ef   : > { %3060 = vmatprep.subr.bf16.mxu1 %v3043_v18 }
 0x1f1   : > { %2761 = vmatmul.mubr.msk.f32.vlgmr.msra.gmra.mrb[24].mxu1 %vm1841_vm2, %v939_v41 }
 0x1f2   : > { %3062 = vmatpush1.bf16.msra.mxu1 %v3045_v16  ;;  %1985 = vmatprep.mubr.f32.mxu1 %v3286_v58  ;;  %v2338_v16 = vshrl.u32 %v3292_v15, %v2323_v59 }
 0x1f3   : > { %3064 = vmatprep.subr.bf16.mxu1 %v3047_v25  ;;  %v2352_v25 = vsel %vm2340_vm4, %v2330_v13, %v2333_v14  ;;  %vm2400_vm4 = vweird.f32 %v4066_v48 }
 0x1f4   : > { %v2339_v18 = vor.u32 %v2338_v16, %v2337_v11 }
 0x1f6   : > { %3066 = vmatpush1.bf16.msra.mxu1 %v3049_v22  ;;  %v2346_v22 = vsel %vm2342_vm6, %v2330_v13, %v2345_v20  ;;  %v2353_v28 = vsel %vm2343_vm7, %v2339_v18, 1326507024  ;;  %vm2208_vm7 = vcmask 64512  }
 0x1f7   : > { %3068 = vmatprep.subr.bf16.mxu1 %v3051_v31  ;;  %v2354_v30 = vsel %vm2342_vm6, %v2336_v17, %v2353_v28  ;;  %v2347_v31 = vsel %vm2341_vm5, %v2344_v19, %v2346_v22  ;;  %vm2518_vm6 = vcmask 519168  }
 0x1f8   : > { %v2355_v32 = vsel %vm2341_vm5, %v2352_v25, %v2354_v30 }
 0x1fa   : > { %3070 = vmatpush1.bf16.msra.mxu1 %v3053_v29  ;;  %v2351_v29 = vsel %vm2341_vm5, %v2348_v21, %v2350_v27  ;;  %vm2307_vm5 = vcmp.lt.s32.totalorder %v4062_v24, 32 }
 0x1fb   : > { %3072 = vmatprep.subr.bf16.mxu1 %v3055_v40  ;;  %v4078_v33 = vmul.u32.u64.low %v2356_v26, %v2351_v29  ;;  %v4079_v34 = vmul.u32.u64.high %v2356_v26, %v2351_v29, %v4078_v33  ;;  %v2363_v40 = vmul.u32 %v2356_v26, %v2347_v31 }
 0x1fd   : > { %v2366_v41 = vadd.s32 1, %v4079_v34 }
 0x1fe   : > { %3074 = vmatpush1.bf16.msra.mxu1 %v3057_v35  ;;  %v4081_v35 = vmul.u32.u64.low %v2356_v26, %v2355_v32  ;;  %v4082_v38 = vmul.u32.u64.high %v2356_v26, %v2355_v32, %v4081_v35 }
 0x200   : > { %vm2365_vm8 = vc.u32 %v4082_v38, %v4078_v33  ;;  %v2364_v51 = vadd.s32 %v4078_v33, %v4082_v38 }
 0x201   : > { %2762 = vmatmul.mubr.msk.f32.vlgmr.msra.gmra.mrb[26].mxu1 %vm1841_vm2, %v1061_v42  ;;  %v2367_v42 = vsel %vm2365_vm8, %v2366_v41, %v4079_v34 }
 0x202   : > { %2169 = vmatprep.mubr.f32.mxu1 %v3286_v58  ;;  %v2368_v44 = vadd.s32 %v2367_v42, %v2363_v40 }
 0x204   : > { %v2369_v45 = vadd.s32 536870912, %v2368_v44 }
 0x206   : > { %v2370_v46 = vshrl.u32 %v2369_v45, 30 }
 0x208   : > { %v2371_v37 = vshll.u32 %v2370_v46, 30  ;;  %v2394_v4 = vsub.s32 4, %v2370_v46 }
 0x20a   : > { %v2372_v39 = vsub.s32 %v2368_v44, %v2371_v37  ;;  %v2395_v10 = vsel %vm2310_vm10, %v2394_v4, %v2370_v46 }
 0x20b   : > { %v2397_v5 = vsel %vm2309_vm11, 0, %v2395_v10 }
 0x20c   : > { %v2374_v47 = vsub.s32 0, %v2372_v39  ;;  %v2504_v7 = vadd.s32 3, %v2397_v5  ;;  %v2401_v9 = vand.u32 3, %v2397_v5 }
 0x20e   : > { %v2768_v36 = vmin.u32 %v2374_v47, %v2372_v39  ;;  %v2505_v11 = vand.u32 3, %v2504_v7  ;;  %vm2406_vm12 = vcmp.eq.s32.totalorder %v2401_v9, 2  ;;  %vm2403_vm14 = vcmp.eq.s32.totalorder %v2401_v9, 0 }
 0x20f   : > { %vm2402_vm2 = vcmp.lt.s32.totalorder %v2401_v9, 2 }
 0x210   : > { %v2376_v49 = vclz %v2768_v36  ;;  %vm2510_vm13 = vcmp.eq.s32.totalorder %v2505_v11, 2  ;;  %vm2507_vm15 = vcmp.eq.s32.totalorder %v2505_v11, 0  ;;  %vm2506_vm3 = vcmp.lt.s32.totalorder %v2505_v11, 2 }
 0x212   : > { %v2769_v50 = vadd.s32 4294967294, %v2376_v49 }
 0x214   : > { %vm2770_vm9 = vcmp.lt.s32.totalorder %v2769_v50, 0 }
 0x215   : > { %v2379_v53 = vsel %vm2770_vm9, 0, %v2769_v50 }
 0x216   : > { %v2380_v54 = vsub.s32 32, %v2379_v53  ;;  %v2381_v55 = vshll.u32 %v2372_v39, %v2379_v53  ;;  %v2384_v57 = vsub.s32 4294967266, %v2379_v53 }
 0x218   : > { %v2382_v59 = vshrl.u32 %v2364_v51, %v2380_v54  ;;  %v2385_v60 = vadd.s32 127, %v2384_v57 }
 0x21a   : > { %v2383_v61 = vor.u32 %v2382_v59, %v2381_v55  ;;  %v2386_v62 = vshll.u32 %v2385_v60, 23 }
 0x21c   : > { %v2387_v63 = vor.u32 4788187, %v2386_v62  ;;  %v2390_v0 = vcvt.s32.f32 %v2383_v61 }
 0x21e   : > { %v2388_v2 = vand.u32 2147483647, %v2387_v63 }
 0x220   : > { %v2391_v6 = vmul.f32 %v2390_v0, %v2388_v2 }
 0x222   : > { %v2392_v8 = vxor.u32 2147483648, %v2391_v6 }
 0x224   : > { %v2393_v1 = vsel %vm2310_vm10, %v2392_v8, %v2391_v6 }
 0x225   : > { %v2396_v3 = vsel %vm2309_vm11, %v4066_v48, %v2393_v1 }
 0x226   : > { %3222 = vcosq.f32 %v2396_v3 }
 0x227   : > { %3224 = vsinq.f32 %v2396_v3 }
 0x230   : > { %v3223_v12 = vpop.eup %3222 }
 0x231   : > { %v3225_v14 = vpop.eup %3224  ;;  %v2407_v16 = vxor.u32 2147483648, %v3223_v12 }
 0x232   : > { %v2404_v52 = vxor.u32 2147483648, %v3225_v14 }
 0x233   : > { %v2408_v17 = vsel %vm2406_vm12, %v2407_v16, %v3225_v14  ;;  %v2512_v18 = vsel %vm2510_vm13, %v2407_v16, %v3225_v14 }
 0x234   : > { %v2405_v19 = vsel %vm2403_vm14, %v3223_v12, %v2404_v52  ;;  %v2509_v20 = vsel %vm2507_vm15, %v3223_v12, %v2404_v52 }
 0x235   : > { %v2409_v21 = vsel %vm2402_vm2, %v2405_v19, %v2408_v17  ;;  %v2513_v22 = vsel %vm2506_vm3, %v2509_v20, %v2512_v18 }
 0x236   : > { %v2410_v26 = vsel %vm2400_vm4, nan, %v2409_v21  ;;  %v2514_v27 = vsel %vm2400_vm4, nan, %v2513_v22 }
 0x237   : > { %v2515_v29 = vsel %vm2307_vm5, %v2410_v26, %v2514_v27 }
 0x238   : > { %v2517_v30 = vmul.f32 %v2516_v23, %v2515_v29 }
 0x23a   : > { %v2519_v31 = vsel %vm2518_vm6, %v2517_v30, 0.0 }
 0x23b   : > { %2520 = vadd.xlane.f32.xlu1 %v2519_v31 }
 0x24f   : > { %v2080_v17 = vpop.trf.xlu0 }
 0x2c4   : > { %v1911_v13 = vpop.f32.mrb[24].mxu1 }
 0x2c5   : > { %v1913_v15 = vpop.f32.mrb[25].mxu1  ;;  %v1916_v25 = vmul.f32 0.125, %v1911_v13 }
 0x2c6   : > { %v1917_v28 = vmul.f32 0.125, %v1913_v15 }
 0x2c7   : > { %v1994_v48 = vrot.slane %v1916_v25, 4 }
 0x2c8   : > { %v2000_v32 = vrot.slane %v1917_v28, 4 }
 0x2c9   : > { %v1995_v24 = vmax.f32 %v1916_v25, %v1994_v48 }
 0x2ca   : > { %v2001_v33 = vmax.f32 %v1917_v28, %v2000_v32 }
 0x2cb   : > { %v1996_v40 = vrot.slane %v1995_v24, 2 }
 0x2cc   : > { %v2002_v42 = vrot.slane %v2001_v33, 2 }
 0x2cd   : > { %v1997_v39 = vmax.f32 %v1995_v24, %v1996_v40  ;;  %v2192_v24 = vpop.trf.xlu0 }
 0x2ce   : > { %v2003_v36 = vmax.f32 %v2001_v33, %v2002_v42 }
 0x2cf   : > { %v1998_v53 = vrot.slane %v1997_v39, 1 }
 0x2d0   : > { %v2004_v55 = vrot.slane %v2003_v36, 1 }
 0x2d1   : > { %v1999_v61 = vmax.f32 %v1997_v39, %v1998_v53 }
 0x2d2   : > { %v2005_v63 = vmax.f32 %v2003_v36, %v2004_v55  ;;  %v2521_v55 = vpop.xlane.xlu1 %2520 }
 0x2d4   : > { %v1987_v34 = vpop.f32.mrb[26].mxu1 }
 0x2d5   : > { %v1992_v35 = vmul.f32 0.125, %v1987_v34  ;;  %v1989_v38 = vpop.f32.mrb[27].mxu1 }
 0x2d6   : > { %v1993_v41 = vmul.f32 0.125, %v1989_v38 }
 0x2d7   : > { %v2006_v44 = vsel %vm1723_vm0, %v1992_v35, -inf }
 0x2d8   : > { %v2007_v45 = vrot.slane %v2006_v44, 4  ;;  %v2013_v46 = vsel %vm1723_vm0, %v1993_v41, -inf }
 0x2d9   : > { %v2014_v37 = vrot.slane %v2013_v46, 4 }
 0x2da   : > { %v2008_v47 = vmax.f32 %v2006_v44, %v2007_v45 }
 0x2db   : > { %v2015_v49 = vmax.f32 %v2013_v46, %v2014_v37 }
 0x2dc   : > { %v2009_v50 = vrot.slane %v2008_v47, 2 }
 0x2dd   : > { %v2016_v51 = vrot.slane %v2015_v49, 2 }
 0x2de   : > { %v2010_v54 = vmax.f32 %v2008_v47, %v2009_v50  ;;  %v2532_v47 = vshrl.u32 %v2287_v43, 7 }
 0x2df   : > { %v2017_v57 = vmax.f32 %v2015_v49, %v2016_v51 }
 0x2e0   : > { %v2011_v59 = vrot.slane %v2010_v54, 1 }
 0x2e1   : > { %v2018_v60 = vrot.slane %v2017_v57, 1 }
 0x2e2   : > { %v2012_v62 = vmax.f32 %v2010_v54, %v2011_v59 }
 0x2e3   : > { %v2019_v0 = vmax.f32 %v2017_v57, %v2018_v60 }
 0x2e4   : > { %v2020_v2 = vmax.f32 %v1999_v61, %v2012_v62 }
 0x2e5   : > { %v2021_v4 = vmax.f32 %v2005_v63, %v2019_v0 }
 0x2e6   : > { %v2022_v6 = vsub.f32 %v1916_v25, %v2020_v2  ;;  %v2028_v8 = vsub.f32 %v1992_v35, %v2020_v2 }
 0x2e7   : > { %v2023_v10 = vsub.f32 %v1917_v28, %v2021_v4  ;;  %v2029_v1 = vsub.f32 %v1993_v41, %v2021_v4 }
 0x2e8   : > { %v2024_v3 = vmul.f32 1.442695, %v2022_v6  ;;  %v2030_v5 = vmul.f32 1.442695, %v2028_v8 }
 0x2e9   : > { %v2026_v7 = vmul.f32 1.442695, %v2023_v10  ;;  %v2032_v9 = vmul.f32 1.442695, %v2029_v1 }
 0x2ea   : > { %3226 = vpow2.f32 %v2024_v3 }
 0x2eb   : > { %3228 = vpow2.f32 %v2030_v5 }
 0x2ec   : > { %3230 = vpow2.f32 %v2026_v7 }
 0x2ed   : > { %3232 = vpow2.f32 %v2032_v9 }
 0x2f4   : > { %v3227_v11 = vpop.eup %3226 }
 0x2f5   : > { %v3229_v12 = vpop.eup %3228  ;;  %v2034_v13 = vrot.slane %v3227_v11, 4 }
 0x2f6   : > { %v3231_v14 = vpop.eup %3230  ;;  %v2046_v15 = vsel %vm1723_vm0, %v3229_v12, 0.0 }
 0x2f7   : > { %v3233_v16 = vpop.eup %3232  ;;  %v2047_v52 = vrot.slane %v2046_v15, 4  ;;  %v2035_v18 = vadd.f32 %v3227_v11, %v2034_v13  ;;  %v2040_v19 = vrot.slane %v3231_v14, 4 }
 0x2f8   : > { %v2053_v20 = vsel %vm1723_vm0, %v3233_v16, 0.0  ;;  %2763 = vmatprep.subr.msk.mxu1 %vm1723_vm0, %v3233_v16 }
 0x2f9   : > { %v2048_v21 = vadd.f32 %v2047_v52, %v2046_v15  ;;  %v2054_v22 = vrot.slane %v2053_v20, 4  ;;  %2764 = vmatpush1.msk.msra.mxu1 %vm1723_vm0, %v3229_v12  ;;  %v2036_v23 = vrot.slane %v2035_v18, 2  ;;  %v2041_v25 = vadd.f32 %v3231_v14, %v2040_v19 }
 0x2fa   : > { %2765 = vmatmul.mubr.msk.f32.vlgmr.msra.gmra.mrb[28].mxu1 %vm1698_vm1, %v2080_v17  ;;  %2212 = vmatprep.subr.mxu1 %v3231_v14 }
 0x2fb   : > { %v2049_v26 = vrot.slane %v2048_v21, 2  ;;  %v2055_v27 = vadd.f32 %v2054_v22, %v2053_v20  ;;  %2213 = vmatpush1.msra.mxu1 %v3227_v11  ;;  %2276 = vmatprep.mubr.f32.mxu1 %v3286_v58  ;;  %v2037_v28 = vadd.f32 %v2036_v23, %v2035_v18  ;;  %v2042_v29 = vrot.slane %v2041_v25, 2 }
 0x2fc   : > { %v3293_v58 = vmov 839922192  }
 0x2fd   : > { %v2056_v30 = vrot.slane %v2055_v27, 2  ;;  %v2038_v48 = vrot.slane %v2037_v28, 1  ;;  %v2050_v31 = vadd.f32 %v2049_v26, %v2048_v21  ;;  %v2043_v32 = vadd.f32 %v2042_v29, %v2041_v25 }
 0x2fe   : > { %v2529_v37 = vunpack.c.l.s4 %v3293_v58 }
 0x2ff   : > { %v2039_v33 = vadd.f32 %v2038_v48, %v2037_v28  ;;  %v2051_v34 = vrot.slane %v2050_v31, 1  ;;  %v2044_v35 = vrot.slane %v2043_v32, 1  ;;  %v2057_v38 = vadd.f32 %v2056_v30, %v2055_v27 }
 0x300   : > { %v2530_v39 = vunpack.c.0.s8 %v2529_v37 }
 0x301   : > { %v2052_v40 = vadd.f32 %v2051_v34, %v2050_v31  ;;  %v2045_v41 = vadd.f32 %v2044_v35, %v2043_v32  ;;  %v2058_v42 = vrot.slane %v2057_v38, 1 }
 0x302   : > { %2766 = vmatmul.mubr.msk.f32.vlgmr.msra.gmra.mrb[28].mxu1 %vm2208_vm7, %v2192_v24  ;;  %v2533_v50 = vsub.s32 %v2530_v39, %v2532_v47 }
 0x303   : > { %v2060_v44 = vadd.f32 %v2052_v40, %v2039_v33  ;;  %v2059_v45 = vadd.f32 %v2058_v42, %v2057_v38 }
 0x304   : > { %v2534_v60 = vrot.slane %v2521_v55, %v2533_v50 }
 0x305   : > { %v2061_v46 = vadd.f32 %v2059_v45, %v2045_v41  ;;  %3234 = vrcp.f32 %v2060_v44 }
 0x307   : > { %3236 = vrcp.f32 %v2061_v46 }
 0x30f   : > { %v3235_v36 = vpop.eup %3234 }
 0x311   : > { %v3237_v51 = vpop.eup %3236 }
 0x3d5   : > { %v2278_v49 = vpop.f32.mrb[28].mxu1 }
 0x3d6   : > { %v2283_v53 = vmul.f32 %v3235_v36, %v2278_v49  ;;  %v2280_v54 = vpop.f32.mrb[29].mxu1 }
 0x3d7   : > { %v2284_v57 = vmul.f32 %v3237_v51, %v2280_v54 }
 0x3d9   : > { %v2524_v59 = vcombine.low %v2283_v53, %v2284_v57 }
 0x3db   : > { %v2526_v61 = vadd.f32 %v2524_v59, %v3994_v56 }
 0x3dd   : > { %v2536_v62 = vadd.f32 %v2534_v60, %v2526_v61 }
 0x3df   : > { %2537 = vst [vmem:[%s399_s17] sm:$0xff] %v2536_v62 }
 0x3e0 PF: > { %s21_s30 = sadd.s32 1, %s3282_s30  }
 0x3e1   : > { %p18_p5 = scmp.ge.s32.totalorder %s21_s30, 4  }
 0x3e3   :  { %20 = sbr.rel (!%p18_p5) target bundleno = 2 (0x2), region = 101 }
 0x3ea   :  { %2559 = vsyncpa [#allocation3], 1 }
 0x3eb   :  { %2561 = vsyncpa [#allocation3 + $0x1], 1 }
 0x3ec   :  { %2562 = vsyncpa [#allocation5], 1 }

// kernel: ip_adapter_forward.2
= control target key start
LH: loop header
LB: loop body
LE: loop exit
PB: predicated region body
PF: predicated region fallthrough
CT: control target
= control target key end

     0   :  { %s8418_s18 = smov 0   ;;  %s9537_s0 = inlined_call_operand.vmem [shape: bf16[2,1024], index: 0, kind: input, shape index: {}]   ;;  %s9538_s1 = inlined_call_operand.vmem [shape: bf16[2,1024,1536], index: 1, kind: input, shape index: {}]   ;;  %s9539_s2 = inlined_call_operand.vmem [shape: f32[2,1,1536], index: 2, kind: input, shape index: {}]   ;;  %s9540_s3 = inlined_call_operand.vmem [shape: f32[1,768], index: 3, kind: input, shape index: {}]   ;;  %s9541_s4 = inlined_call_operand.vmem [shape: f32[1,768], index: 4, kind: input, shape index: {}]   ;;  %s9542_s5 = inlined_call_operand.vmem [shape: f32[2,3072], index: 5, kind: output, shape index: {}]  }
   0x1 LB: > { %s8424_s19 = sadd.s32 4294967295, %s8384_s18   ;;  %p6350_p0 = scmp.ge.s32.totalorder %s8384_s18, 1  ;;  %s8384_s18 = sphi %s8418_s18, %s15_s18  }
   0x2   : > { %p196_p1 = scmp.lt.s32.totalorder %s8384_s18, 3 }
   0x4   : > { %p197_p2 = pnand %p6350_p0, %p196_p1 }
   0x5   : > { %p228_p3 = scmp.lt.s32.totalorder (!%p197_p2), %s8424_s19, 1  ;;  %v1016_v0 = vlaneseq (!%p197_p2)  ;;  %v8386_v1 = vmov (!%p197_p2), 1966171168   ;;  %v8438_v5 = vld [vmem:[%s9537_s0] sm:$0xff] (!%p197_p2)  ;;  %vm5958_vm0 = vcmask (!%p197_p2), 1041408   ;;  %s237_s6 = smul.u32 (!%p197_p2), 12, %s8424_s19 }
   0x6   : > { %200 = sbr.rel (%p197_p2) target bundleno = 1339 (0x53b), region = 40  ;;  %v1079_v2 = vunpack.c.l.s4 (!%p197_p2), %v8386_v1 }
   0x7   : > { %v8432_v3 = vshrl.u32 (!%p197_p2), %v1016_v0, 7  ;;  %p9464_p4 = scmp.lt.s32.totalorder (!%p197_p2), %s237_s6, 23 }
   0x8   : > { %v1080_v4 = vunpack.c.0.s8 (!%p197_p2), %v1079_v2 }
   0xa   : > { %v8441_v6 = vsub.s32 (!%p197_p2), %v1080_v4, %v8432_v3 }
   0xc   : > { %v8451_v8 = vrot.slane (!%p197_p2), %v8438_v5, %v8441_v6 }
   0xd   : > { %s8430_s20 = scalar_select %p228_p3, %s8424_s19, 1 }
   0xe   : > { %v1092_v12 = vcombine.high %v8451_v8, %v8451_v8  ;;  %s9545_s6 = smov (!%p9464_p4, %s237_s6), 23 }
   0xf   : > { %s7209_s21 = smul.u32 6144, %s8430_s20  ;;  %s6352_s12 = sshll.u32 %s9545_s6, 1 }
  0x10   : > { %v8462_v16 = vrot.slane %v1092_v12, %v8441_v6  ;;  %s7210_s27 = smul.u32 12, %s8430_s20  ;;  %s9494_s15 = scalar_lea.vmem %s9542_s5, %s6352_s12 }
  0x11   : > { %s8446_s26 = scalar_lea.vmem %s9538_s1, %s7209_s21 }
  0x12   : > { %v7221_v7 = vld [vmem:[%s8446_s26 + $0x4] ss:$48 sps:$4 sm:$0xff]   ;;  %v7223_v9 = vld [vmem:[%s8446_s26 + $0xc] ss:$48 sps:$4 sm:$0xff]   ;;  %v7225_v10 = vld [vmem:[%s8446_s26] ss:$48 sps:$4 sm:$0xff]   ;;  %5006 = vmatprep.mubr.bf16.mxu0 %v8462_v16  ;;  %5170 = vmatprep.mubr.bf16.mxu1 %v8462_v16  ;;  %s9251_s30 = scalar_lea.vmem %s9539_s2, %s7210_s27 }
  0x13   : > { %4974 = vmatprep.subr.bf16.mxu0 %v7221_v7  ;;  %v7226_v11 = vld [vmem:[%s8446_s26 + $0x8] ss:$48 sps:$4 sm:$0xff]   ;;  %5138 = vmatprep.subr.bf16.mxu1 %v7223_v9  ;;  %v7227_v13 = vld [vmem:[%s8446_s26 + $0x64] ss:$48 sps:$4 sm:$0xff]   ;;  %v7229_v14 = vld [vmem:[%s8446_s26 + $0x6c] ss:$48 sps:$4 sm:$0xff]  }
  0x14   : > { %4975 = vmatpush1.bf16.msra.mxu0 %v7225_v10  ;;  %5139 = vmatpush1.bf16.msra.mxu1 %v7226_v11  ;;  %v7231_v15 = vld [vmem:[%s8446_s26 + $0x60] ss:$48 sps:$4 sm:$0xff]   ;;  %v7232_v17 = vld [vmem:[%s8446_s26 + $0x68] ss:$48 sps:$4 sm:$0xff]   ;;  %v7233_v18 = vld [vmem:[%s8446_s26 + $0xc4] ss:$48 sps:$4 sm:$0xff]  }
  0x15   : > { %4976 = vmatprep.subr.bf16.mxu0 %v7227_v13  ;;  %5140 = vmatprep.subr.bf16.mxu1 %v7229_v14  ;;  %v7235_v19 = vld [vmem:[%s8446_s26 + $0xcc] ss:$48 sps:$4 sm:$0xff]   ;;  %v7237_v20 = vld [vmem:[%s8446_s26 + $0xc0] ss:$48 sps:$4 sm:$0xff]   ;;  %v7238_v21 = vld [vmem:[%s8446_s26 + $0xc8] ss:$48 sps:$4 sm:$0xff]  }
  0x16   : > { %v7239_v22 = vld [vmem:[%s8446_s26 + $0x124] ss:$48 sps:$4 sm:$0xff]   ;;  %v7241_v23 = vld [vmem:[%s8446_s26 + $0x12c] ss:$48 sps:$4 sm:$0xff]   ;;  %v7243_v24 = vld [vmem:[%s8446_s26 + $0x120] ss:$48 sps:$4 sm:$0xff]  }
  0x17   : > { %v7244_v25 = vld [vmem:[%s8446_s26 + $0x128] ss:$48 sps:$4 sm:$0xff]   ;;  %v7245_v26 = vld [vmem:[%s8446_s26 + $0x184] ss:$48 sps:$4 sm:$0xff]   ;;  %v7247_v27 = vld [vmem:[%s8446_s26 + $0x18c] ss:$48 sps:$4 sm:$0xff]  }
  0x18   : > { %4977 = vmatpush1.bf16.msra.mxu0 %v7231_v15  ;;  %5141 = vmatpush1.bf16.msra.mxu1 %v7232_v17  ;;  %v7249_v28 = vld [vmem:[%s8446_s26 + $0x180] ss:$48 sps:$4 sm:$0xff]   ;;  %v7250_v29 = vld [vmem:[%s8446_s26 + $0x188] ss:$48 sps:$4 sm:$0xff]   ;;  %v7251_v30 = vld [vmem:[%s8446_s26 + $0x1e4] ss:$48 sps:$4 sm:$0xff]  }
  0x19   : > { %4978 = vmatprep.subr.bf16.mxu0 %v7233_v18  ;;  %5142 = vmatprep.subr.bf16.mxu1 %v7235_v19  ;;  %v7253_v31 = vld [vmem:[%s8446_s26 + $0x1ec] ss:$48 sps:$4 sm:$0xff]   ;;  %v7255_v32 = vld [vmem:[%s8446_s26 + $0x1e0] ss:$48 sps:$4 sm:$0xff]   ;;  %v7256_v33 = vld [vmem:[%s8446_s26 + $0x1e8] ss:$48 sps:$4 sm:$0xff]   ;;  %v8529_v19 = vrot.slane %v8451_v8, %v8441_v6 }
  0x1a   : > { %v7257_v34 = vld [vmem:[%s8446_s26 + $0x244] ss:$48 sps:$4 sm:$0xff]   ;;  %v7259_v35 = vld [vmem:[%s8446_s26 + $0x24c] ss:$48 sps:$4 sm:$0xff]   ;;  %v7261_v36 = vld [vmem:[%s8446_s26 + $0x240] ss:$48 sps:$4 sm:$0xff]  }
  0x1b   : > { %v7262_v37 = vld [vmem:[%s8446_s26 + $0x248] ss:$48 sps:$4 sm:$0xff]   ;;  %v7263_v38 = vld [vmem:[%s8446_s26 + $0x2a4] ss:$48 sps:$4 sm:$0xff]   ;;  %v7265_v39 = vld [vmem:[%s8446_s26 + $0x2ac] ss:$48 sps:$4 sm:$0xff]  }
  0x1c   : > { %4979 = vmatpush1.bf16.msra.mxu0 %v7237_v20  ;;  %5143 = vmatpush1.bf16.msra.mxu1 %v7238_v21  ;;  %v7267_v40 = vld [vmem:[%s8446_s26 + $0x2a0] ss:$48 sps:$4 sm:$0xff]   ;;  %v7268_v41 = vld [vmem:[%s8446_s26 + $0x2a8] ss:$48 sps:$4 sm:$0xff]   ;;  %v7269_v42 = vld [vmem:[%s8446_s26 + $0x304] ss:$48 sps:$4 sm:$0xff]  }
  0x1d   : > { %4980 = vmatprep.subr.bf16.mxu0 %v7239_v22  ;;  %5144 = vmatprep.subr.bf16.mxu1 %v7241_v23  ;;  %v7271_v43 = vld [vmem:[%s8446_s26 + $0x30c] ss:$48 sps:$4 sm:$0xff]   ;;  %v7273_v44 = vld [vmem:[%s8446_s26 + $0x300] ss:$48 sps:$4 sm:$0xff]   ;;  %v7274_v45 = vld [vmem:[%s8446_s26 + $0x308] ss:$48 sps:$4 sm:$0xff]   ;;  %v8535_v22 = vcombine.high %v8462_v16, %v8462_v16 }
  0x1e   : > { %v7275_v46 = vld [vmem:[%s8446_s26 + $0x364] ss:$48 sps:$4 sm:$0xff]   ;;  %v7277_v47 = vld [vmem:[%s8446_s26 + $0x36c] ss:$48 sps:$4 sm:$0xff]   ;;  %v7279_v48 = vld [vmem:[%s8446_s26 + $0x360] ss:$48 sps:$4 sm:$0xff]  }
  0x1f   : > { %v7280_v49 = vld [vmem:[%s8446_s26 + $0x368] ss:$48 sps:$4 sm:$0xff]   ;;  %v7281_v50 = vld [vmem:[%s8446_s26 + $0x3c4] ss:$48 sps:$4 sm:$0xff]   ;;  %v7283_v51 = vld [vmem:[%s8446_s26 + $0x3cc] ss:$48 sps:$4 sm:$0xff]  }
  0x20   : > { %4981 = vmatpush1.bf16.msra.mxu0 %v7243_v24  ;;  %5145 = vmatpush1.bf16.msra.mxu1 %v7244_v25  ;;  %v7285_v52 = vld [vmem:[%s8446_s26 + $0x3c0] ss:$48 sps:$4 sm:$0xff]   ;;  %v7286_v53 = vld [vmem:[%s8446_s26 + $0x3c8] ss:$48 sps:$4 sm:$0xff]   ;;  %v7287_v54 = vld [vmem:[%s8446_s26 + $0x424] ss:$48 sps:$4 sm:$0xff]  }
  0x21   : > { %4982 = vmatprep.subr.bf16.mxu0 %v7245_v26  ;;  %5146 = vmatprep.subr.bf16.mxu1 %v7247_v27  ;;  %v7289_v55 = vld [vmem:[%s8446_s26 + $0x42c] ss:$48 sps:$4 sm:$0xff]   ;;  %v7291_v56 = vld [vmem:[%s8446_s26 + $0x420] ss:$48 sps:$4 sm:$0xff]   ;;  %v7292_v57 = vld [vmem:[%s8446_s26 + $0x428] ss:$48 sps:$4 sm:$0xff]  }
  0x22   : > { %v7293_v58 = vld [vmem:[%s8446_s26 + $0x484] ss:$48 sps:$4 sm:$0xff]   ;;  %v7295_v59 = vld [vmem:[%s8446_s26 + $0x48c] ss:$48 sps:$4 sm:$0xff]   ;;  %v7297_v60 = vld [vmem:[%s8446_s26 + $0x480] ss:$48 sps:$4 sm:$0xff]  }
  0x23   : > { %v7298_v61 = vld [vmem:[%s8446_s26 + $0x488] ss:$48 sps:$4 sm:$0xff]   ;;  %v7299_v62 = vld [vmem:[%s8446_s26 + $0x4e4] ss:$48 sps:$4 sm:$0xff]   ;;  %v7301_v63 = vld [vmem:[%s8446_s26 + $0x4ec] ss:$48 sps:$4 sm:$0xff]  }
  0x24   : > { %4983 = vmatpush1.bf16.msra.mxu0 %v7249_v28  ;;  %5147 = vmatpush1.bf16.msra.mxu1 %v7250_v29  ;;  %v7303_v0 = vld [vmem:[%s8446_s26 + $0x4e0] ss:$48 sps:$4 sm:$0xff]   ;;  %v7304_v1 = vld [vmem:[%s8446_s26 + $0x4e8] ss:$48 sps:$4 sm:$0xff]   ;;  %v7305_v2 = vld [vmem:[%s8446_s26 + $0x544] ss:$48 sps:$4 sm:$0xff]  }
  0x25   : > { %4984 = vmatprep.subr.bf16.mxu0 %v7251_v30  ;;  %5148 = vmatprep.subr.bf16.mxu1 %v7253_v31  ;;  %v7307_v4 = vld [vmem:[%s8446_s26 + $0x54c] ss:$48 sps:$4 sm:$0xff]   ;;  %v7309_v7 = vld [vmem:[%s8446_s26 + $0x540] ss:$48 sps:$4 sm:$0xff]   ;;  %v7310_v9 = vld [vmem:[%s8446_s26 + $0x548] ss:$48 sps:$4 sm:$0xff]  }
  0x26   : > { %v7311_v10 = vld [vmem:[%s8446_s26 + $0x5a4] ss:$48 sps:$4 sm:$0xff]   ;;  %v7313_v11 = vld [vmem:[%s8446_s26 + $0x5ac] ss:$48 sps:$4 sm:$0xff]   ;;  %v7315_v12 = vld [vmem:[%s8446_s26 + $0x5a0] ss:$48 sps:$4 sm:$0xff]  }
  0x27   : > { %v7316_v13 = vld [vmem:[%s8446_s26 + $0x5a8] ss:$48 sps:$4 sm:$0xff]   ;;  %v7319_v14 = vld [vmem:[%s8446_s26 + $0x604] ss:$48 sps:$4 sm:$0xff]   ;;  %v7322_v15 = vld [vmem:[%s8446_s26 + $0x60c] ss:$48 sps:$4 sm:$0xff]  }
  0x28   : > { %4985 = vmatpush1.bf16.msra.mxu0 %v7255_v32  ;;  %5149 = vmatpush1.bf16.msra.mxu1 %v7256_v33  ;;  %v7317_v17 = vld [vmem:[%s8446_s26 + $0x600] ss:$48 sps:$4 sm:$0xff]   ;;  %v7320_v18 = vld [vmem:[%s8446_s26 + $0x608] ss:$48 sps:$4 sm:$0xff]   ;;  %v7325_v20 = vld [vmem:[%s8446_s26 + $0x664] ss:$48 sps:$4 sm:$0xff]  }
  0x29   : > { %4986 = vmatprep.subr.bf16.mxu0 %v7257_v34  ;;  %5150 = vmatprep.subr.bf16.mxu1 %v7259_v35  ;;  %v7328_v21 = vld [vmem:[%s8446_s26 + $0x66c] ss:$48 sps:$4 sm:$0xff]   ;;  %v7323_v8 = vld [vmem:[%s8446_s26 + $0x660] ss:$48 sps:$4 sm:$0xff]   ;;  %v7326_v23 = vld [vmem:[%s8446_s26 + $0x668] ss:$48 sps:$4 sm:$0xff]  }
  0x2a   : > { %v7331_v24 = vld [vmem:[%s8446_s26 + $0x6c4] ss:$48 sps:$4 sm:$0xff]   ;;  %v7334_v25 = vld [vmem:[%s8446_s26 + $0x6cc] ss:$48 sps:$4 sm:$0xff]   ;;  %v7329_v26 = vld [vmem:[%s8446_s26 + $0x6c0] ss:$48 sps:$4 sm:$0xff]  }
  0x2b   : > { %v7332_v27 = vld [vmem:[%s8446_s26 + $0x6c8] ss:$48 sps:$4 sm:$0xff]   ;;  %v7337_v28 = vld [vmem:[%s8446_s26 + $0x724] ss:$48 sps:$4 sm:$0xff]   ;;  %v7340_v29 = vld [vmem:[%s8446_s26 + $0x72c] ss:$48 sps:$4 sm:$0xff]  }
  0x2c   : > { %4987 = vmatpush1.bf16.msra.mxu0 %v7261_v36  ;;  %5151 = vmatpush1.bf16.msra.mxu1 %v7262_v37  ;;  %v7335_v30 = vld [vmem:[%s8446_s26 + $0x720] ss:$48 sps:$4 sm:$0xff]   ;;  %v7338_v31 = vld [vmem:[%s8446_s26 + $0x728] ss:$48 sps:$4 sm:$0xff]   ;;  %v7343_v32 = vld [vmem:[%s8446_s26 + $0x784] ss:$48 sps:$4 sm:$0xff]  }
  0x2d   : > { %4988 = vmatprep.subr.bf16.mxu0 %v7263_v38  ;;  %5152 = vmatprep.subr.bf16.mxu1 %v7265_v39  ;;  %v7346_v33 = vld [vmem:[%s8446_s26 + $0x78c] ss:$48 sps:$4 sm:$0xff]   ;;  %v7341_v34 = vld [vmem:[%s8446_s26 + $0x780] ss:$48 sps:$4 sm:$0xff]   ;;  %v7344_v35 = vld [vmem:[%s8446_s26 + $0x788] ss:$48 sps:$4 sm:$0xff]  }
  0x2e   : > { %v7349_v36 = vld [vmem:[%s8446_s26 + $0x7e4] ss:$48 sps:$4 sm:$0xff]   ;;  %v7352_v37 = vld [vmem:[%s8446_s26 + $0x7ec] ss:$48 sps:$4 sm:$0xff]   ;;  %v7347_v38 = vld [vmem:[%s8446_s26 + $0x7e0] ss:$48 sps:$4 sm:$0xff]  }
  0x2f   : > { %v7350_v39 = vld [vmem:[%s8446_s26 + $0x7e8] ss:$48 sps:$4 sm:$0xff]  }
  0x30   : > { %4989 = vmatpush1.bf16.msra.mxu0 %v7267_v40  ;;  %5153 = vmatpush1.bf16.msra.mxu1 %v7268_v41  ;;  %v7355_v40 = vld [vmem:[%s8446_s26 + $0x844] ss:$48 sps:$4 sm:$0xff]   ;;  %v7358_v41 = vld [vmem:[%s8446_s26 + $0x84c] ss:$48 sps:$4 sm:$0xff]  }
  0x31   : > { %4990 = vmatprep.subr.bf16.mxu0 %v7269_v42  ;;  %5154 = vmatprep.subr.bf16.mxu1 %v7271_v43  ;;  %v7353_v42 = vld [vmem:[%s8446_s26 + $0x840] ss:$48 sps:$4 sm:$0xff]   ;;  %v7356_v43 = vld [vmem:[%s8446_s26 + $0x848] ss:$48 sps:$4 sm:$0xff]  }
  0x34   : > { %4991 = vmatpush1.bf16.msra.mxu0 %v7273_v44  ;;  %5155 = vmatpush1.bf16.msra.mxu1 %v7274_v45  ;;  %v7361_v44 = vld [vmem:[%s8446_s26 + $0x8a4] ss:$48 sps:$4 sm:$0xff]   ;;  %v7364_v45 = vld [vmem:[%s8446_s26 + $0x8ac] ss:$48 sps:$4 sm:$0xff]  }
  0x35   : > { %4992 = vmatprep.subr.bf16.mxu0 %v7275_v46  ;;  %5156 = vmatprep.subr.bf16.mxu1 %v7277_v47  ;;  %v7359_v46 = vld [vmem:[%s8446_s26 + $0x8a0] ss:$48 sps:$4 sm:$0xff]   ;;  %v7362_v47 = vld [vmem:[%s8446_s26 + $0x8a8] ss:$48 sps:$4 sm:$0xff]  }
  0x38   : > { %4993 = vmatpush1.bf16.msra.mxu0 %v7279_v48  ;;  %5157 = vmatpush1.bf16.msra.mxu1 %v7280_v49  ;;  %v7367_v48 = vld [vmem:[%s8446_s26 + $0x904] ss:$48 sps:$4 sm:$0xff]   ;;  %v7370_v49 = vld [vmem:[%s8446_s26 + $0x90c] ss:$48 sps:$4 sm:$0xff]  }
  0x39   : > { %4994 = vmatprep.subr.bf16.mxu0 %v7281_v50  ;;  %5158 = vmatprep.subr.bf16.mxu1 %v7283_v51  ;;  %v7365_v50 = vld [vmem:[%s8446_s26 + $0x900] ss:$48 sps:$4 sm:$0xff]   ;;  %v7368_v51 = vld [vmem:[%s8446_s26 + $0x908] ss:$48 sps:$4 sm:$0xff]  }
  0x3c   : > { %4995 = vmatpush1.bf16.msra.mxu0 %v7285_v52  ;;  %5159 = vmatpush1.bf16.msra.mxu1 %v7286_v53  ;;  %v7373_v52 = vld [vmem:[%s8446_s26 + $0x964] ss:$48 sps:$4 sm:$0xff]   ;;  %v7376_v53 = vld [vmem:[%s8446_s26 + $0x96c] ss:$48 sps:$4 sm:$0xff]  }
  0x3d   : > { %4996 = vmatprep.subr.bf16.mxu0 %v7287_v54  ;;  %5160 = vmatprep.subr.bf16.mxu1 %v7289_v55  ;;  %v7371_v54 = vld [vmem:[%s8446_s26 + $0x960] ss:$48 sps:$4 sm:$0xff]   ;;  %v7374_v55 = vld [vmem:[%s8446_s26 + $0x968] ss:$48 sps:$4 sm:$0xff]  }
  0x40   : > { %4997 = vmatpush1.bf16.msra.mxu0 %v7291_v56  ;;  %5161 = vmatpush1.bf16.msra.mxu1 %v7292_v57  ;;  %v7379_v56 = vld [vmem:[%s8446_s26 + $0x9c4] ss:$48 sps:$4 sm:$0xff]   ;;  %v7382_v57 = vld [vmem:[%s8446_s26 + $0x9cc] ss:$48 sps:$4 sm:$0xff]  }
  0x41   : > { %4998 = vmatprep.subr.bf16.mxu0 %v7293_v58  ;;  %5162 = vmatprep.subr.bf16.mxu1 %v7295_v59  ;;  %v7377_v58 = vld [vmem:[%s8446_s26 + $0x9c0] ss:$48 sps:$4 sm:$0xff]   ;;  %v7380_v59 = vld [vmem:[%s8446_s26 + $0x9c8] ss:$48 sps:$4 sm:$0xff]  }
  0x44   : > { %4999 = vmatpush1.bf16.msra.mxu0 %v7297_v60  ;;  %5163 = vmatpush1.bf16.msra.mxu1 %v7298_v61  ;;  %v7385_v60 = vld [vmem:[%s8446_s26 + $0xa24] ss:$48 sps:$4 sm:$0xff]   ;;  %v7388_v61 = vld [vmem:[%s8446_s26 + $0xa2c] ss:$48 sps:$4 sm:$0xff]  }
  0x45   : > { %5000 = vmatprep.subr.bf16.mxu0 %v7299_v62  ;;  %5164 = vmatprep.subr.bf16.mxu1 %v7301_v63  ;;  %v7383_v62 = vld [vmem:[%s8446_s26 + $0xa20] ss:$48 sps:$4 sm:$0xff]   ;;  %v7386_v63 = vld [vmem:[%s8446_s26 + $0xa28] ss:$48 sps:$4 sm:$0xff]  }
  0x48   : > { %5001 = vmatpush1.bf16.msra.mxu0 %v7303_v0  ;;  %5165 = vmatpush1.bf16.msra.mxu1 %v7304_v1  ;;  %v7391_v0 = vld [vmem:[%s8446_s26 + $0xa84] ss:$48 sps:$4 sm:$0xff]   ;;  %v7394_v1 = vld [vmem:[%s8446_s26 + $0xa8c] ss:$48 sps:$4 sm:$0xff]  }
  0x49   : > { %5002 = vmatprep.subr.bf16.mxu0 %v7305_v2  ;;  %5166 = vmatprep.subr.bf16.mxu1 %v7307_v4  ;;  %v7389_v2 = vld [vmem:[%s8446_s26 + $0xa80] ss:$48 sps:$4 sm:$0xff]   ;;  %v7392_v4 = vld [vmem:[%s8446_s26 + $0xa88] ss:$48 sps:$4 sm:$0xff]  }
  0x4c   : > { %5003 = vmatpush1.bf16.msra.mxu0 %v7309_v7  ;;  %5167 = vmatpush1.bf16.msra.mxu1 %v7310_v9  ;;  %v7397_v7 = vld [vmem:[%s8446_s26 + $0xae4] ss:$48 sps:$4 sm:$0xff]   ;;  %v7400_v9 = vld [vmem:[%s8446_s26 + $0xaec] ss:$48 sps:$4 sm:$0xff]  }
  0x4d   : > { %5004 = vmatprep.subr.bf16.mxu0 %v7311_v10  ;;  %5168 = vmatprep.subr.bf16.mxu1 %v7313_v11  ;;  %v7395_v10 = vld [vmem:[%s8446_s26 + $0xae0] ss:$48 sps:$4 sm:$0xff]   ;;  %v7398_v11 = vld [vmem:[%s8446_s26 + $0xae8] ss:$48 sps:$4 sm:$0xff]  }
  0x50   : > { %5005 = vmatpush1.bf16.msra.mxu0 %v7315_v12  ;;  %5169 = vmatpush1.bf16.msra.mxu1 %v7316_v13  ;;  %v7403_v12 = vld [vmem:[%s8446_s26 + $0xb44] ss:$48 sps:$4 sm:$0xff]   ;;  %v7406_v13 = vld [vmem:[%s8446_s26 + $0xb4c] ss:$48 sps:$4 sm:$0xff]  }
  0x51   : > { %5015 = vmatprep.subr.bf16.mxu0 %v7319_v14  ;;  %5179 = vmatprep.subr.bf16.mxu1 %v7322_v15  ;;  %v1077_v14 = vcombine.high %v8438_v5, %v8438_v5  ;;  %v7401_v15 = vld [vmem:[%s8446_s26 + $0xb40] ss:$48 sps:$4 sm:$0xff]   ;;  %v7415_v5 = vld [vmem:[%s8446_s26 + $0xc04] ss:$48 sps:$4 sm:$0xff]  }
  0x53   : > { %5007 = vmatmul.mubr.bf16.vlgmr.msra.gmra.mrb[0].mxu0 %v8529_v19  ;;  %5171 = vmatmul.mubr.bf16.vlgmr.msra.gmra.mrb[0].mxu1 %v8529_v19 }
  0x54   : > { %5016 = vmatpush1.bf16.msra.mxu0 %v7317_v17  ;;  %5180 = vmatpush1.bf16.msra.mxu1 %v7320_v18  ;;  %v7404_v17 = vld [vmem:[%s8446_s26 + $0xb48] ss:$48 sps:$4 sm:$0xff]   ;;  %v7409_v18 = vld [vmem:[%s8446_s26 + $0xba4] ss:$48 sps:$4 sm:$0xff]  }
  0x55   : > { %5017 = vmatprep.subr.bf16.mxu0 %v7325_v20  ;;  %5181 = vmatprep.subr.bf16.mxu1 %v7328_v21  ;;  %v7412_v20 = vld [vmem:[%s8446_s26 + $0xbac] ss:$48 sps:$4 sm:$0xff]   ;;  %v8600_v21 = vrot.slane %v1077_v14, %v8441_v6  ;;  %v7487_v14 = vld [vmem:[%s8446_s26 + $0x1084] ss:$48 sps:$4 sm:$0xff]  }
  0x56   : > { %5047 = vmatprep.mubr.bf16.mxu0 %v8535_v22  ;;  %5211 = vmatprep.mubr.bf16.mxu1 %v8535_v22 }
  0x58   : > { %5018 = vmatpush1.bf16.msra.mxu0 %v7323_v8  ;;  %5182 = vmatpush1.bf16.msra.mxu1 %v7326_v23  ;;  %v7407_v8 = vld [vmem:[%s8446_s26 + $0xba0] ss:$48 sps:$4 sm:$0xff]   ;;  %v7410_v23 = vld [vmem:[%s8446_s26 + $0xba8] ss:$48 sps:$4 sm:$0xff]  }
  0x59   : > { %5019 = vmatprep.subr.bf16.mxu0 %v7331_v24  ;;  %5183 = vmatprep.subr.bf16.mxu1 %v7334_v25  ;;  %v7418_v24 = vld [vmem:[%s8446_s26 + $0xc0c] ss:$48 sps:$4 sm:$0xff]   ;;  %v1093_v25 = vcombine.high %v8600_v21, %v8600_v21 }
  0x5c   : > { %5020 = vmatpush1.bf16.msra.mxu0 %v7329_v26  ;;  %5184 = vmatpush1.bf16.msra.mxu1 %v7332_v27  ;;  %v7413_v26 = vld [vmem:[%s8446_s26 + $0xc00] ss:$48 sps:$4 sm:$0xff]   ;;  %v7416_v27 = vld [vmem:[%s8446_s26 + $0xc08] ss:$48 sps:$4 sm:$0xff]  }
  0x5d   : > { %5021 = vmatprep.subr.bf16.mxu0 %v7337_v28  ;;  %5185 = vmatprep.subr.bf16.mxu1 %v7340_v29  ;;  %v8612_v28 = vcombine.high %v8529_v19, %v8529_v19  ;;  %v7421_v29 = vld [vmem:[%s8446_s26 + $0xc64] ss:$48 sps:$4 sm:$0xff]  }
  0x60   : > { %5022 = vmatpush1.bf16.msra.mxu0 %v7335_v30  ;;  %5186 = vmatpush1.bf16.msra.mxu1 %v7338_v31  ;;  %v7424_v30 = vld [vmem:[%s8446_s26 + $0xc6c] ss:$48 sps:$4 sm:$0xff]   ;;  %v8617_v31 = vrot.slane %v1093_v25, %v8441_v6 }
  0x61   : > { %5023 = vmatprep.subr.bf16.mxu0 %v7343_v32  ;;  %5187 = vmatprep.subr.bf16.mxu1 %v7346_v33  ;;  %v7419_v32 = vld [vmem:[%s8446_s26 + $0xc60] ss:$48 sps:$4 sm:$0xff]   ;;  %v7422_v33 = vld [vmem:[%s8446_s26 + $0xc68] ss:$48 sps:$4 sm:$0xff]   ;;  %v7502_v25 = vld [vmem:[%s8446_s26 + $0x114c] ss:$48 sps:$4 sm:$0xff]  }
  0x64   : > { %5024 = vmatpush1.bf16.msra.mxu0 %v7341_v34  ;;  %5188 = vmatpush1.bf16.msra.mxu1 %v7344_v35  ;;  %v7427_v34 = vld [vmem:[%s8446_s26 + $0xcc4] ss:$48 sps:$4 sm:$0xff]   ;;  %v7430_v35 = vld [vmem:[%s8446_s26 + $0xccc] ss:$48 sps:$4 sm:$0xff]  }
  0x65   : > { %5025 = vmatprep.subr.bf16.mxu0 %v7349_v36  ;;  %5189 = vmatprep.subr.bf16.mxu1 %v7352_v37  ;;  %v7425_v36 = vld [vmem:[%s8446_s26 + $0xcc0] ss:$48 sps:$4 sm:$0xff]   ;;  %v7428_v37 = vld [vmem:[%s8446_s26 + $0xcc8] ss:$48 sps:$4 sm:$0xff]  }
  0x68   : > { %5026 = vmatpush1.bf16.msra.mxu0 %v7347_v38  ;;  %5190 = vmatpush1.bf16.msra.mxu1 %v7350_v39  ;;  %v7433_v38 = vld [vmem:[%s8446_s26 + $0xd24] ss:$48 sps:$4 sm:$0xff]   ;;  %v7436_v39 = vld [vmem:[%s8446_s26 + $0xd2c] ss:$48 sps:$4 sm:$0xff]  }
  0x69   : > { %5027 = vmatprep.subr.bf16.mxu0 %v7355_v40  ;;  %5191 = vmatprep.subr.bf16.mxu1 %v7358_v41  ;;  %v7431_v40 = vld [vmem:[%s8446_s26 + $0xd20] ss:$48 sps:$4 sm:$0xff]   ;;  %v7434_v41 = vld [vmem:[%s8446_s26 + $0xd28] ss:$48 sps:$4 sm:$0xff]  }
  0x6c   : > { %5028 = vmatpush1.bf16.msra.mxu0 %v7353_v42  ;;  %5192 = vmatpush1.bf16.msra.mxu1 %v7356_v43  ;;  %v7439_v42 = vld [vmem:[%s8446_s26 + $0xd84] ss:$48 sps:$4 sm:$0xff]   ;;  %v7442_v43 = vld [vmem:[%s8446_s26 + $0xd8c] ss:$48 sps:$4 sm:$0xff]  }
  0x6d   : > { %5029 = vmatprep.subr.bf16.mxu0 %v7361_v44  ;;  %5193 = vmatprep.subr.bf16.mxu1 %v7364_v45  ;;  %v7437_v44 = vld [vmem:[%s8446_s26 + $0xd80] ss:$48 sps:$4 sm:$0xff]   ;;  %v7440_v45 = vld [vmem:[%s8446_s26 + $0xd88] ss:$48 sps:$4 sm:$0xff]  }
  0x70   : > { %5030 = vmatpush1.bf16.msra.mxu0 %v7359_v46  ;;  %5194 = vmatpush1.bf16.msra.mxu1 %v7362_v47  ;;  %v7445_v46 = vld [vmem:[%s8446_s26 + $0xde4] ss:$48 sps:$4 sm:$0xff]   ;;  %v7448_v47 = vld [vmem:[%s8446_s26 + $0xdec] ss:$48 sps:$4 sm:$0xff]  }
  0x71   : > { %5031 = vmatprep.subr.bf16.mxu0 %v7367_v48  ;;  %5195 = vmatprep.subr.bf16.mxu1 %v7370_v49  ;;  %v7443_v48 = vld [vmem:[%s8446_s26 + $0xde0] ss:$48 sps:$4 sm:$0xff]   ;;  %v7446_v49 = vld [vmem:[%s8446_s26 + $0xde8] ss:$48 sps:$4 sm:$0xff]  }
  0x74   : > { %5032 = vmatpush1.bf16.msra.mxu0 %v7365_v50  ;;  %5196 = vmatpush1.bf16.msra.mxu1 %v7368_v51  ;;  %v7451_v50 = vld [vmem:[%s8446_s26 + $0xe44] ss:$48 sps:$4 sm:$0xff]   ;;  %v7454_v51 = vld [vmem:[%s8446_s26 + $0xe4c] ss:$48 sps:$4 sm:$0xff]  }
  0x75   : > { %5033 = vmatprep.subr.bf16.mxu0 %v7373_v52  ;;  %5197 = vmatprep.subr.bf16.mxu1 %v7376_v53  ;;  %v7449_v52 = vld [vmem:[%s8446_s26 + $0xe40] ss:$48 sps:$4 sm:$0xff]   ;;  %v7452_v53 = vld [vmem:[%s8446_s26 + $0xe48] ss:$48 sps:$4 sm:$0xff]  }
  0x78   : > { %5034 = vmatpush1.bf16.msra.mxu0 %v7371_v54  ;;  %5198 = vmatpush1.bf16.msra.mxu1 %v7374_v55  ;;  %v7457_v54 = vld [vmem:[%s8446_s26 + $0xea4] ss:$48 sps:$4 sm:$0xff]   ;;  %v7460_v55 = vld [vmem:[%s8446_s26 + $0xeac] ss:$48 sps:$4 sm:$0xff]  }
  0x79   : > { %5035 = vmatprep.subr.bf16.mxu0 %v7379_v56  ;;  %5199 = vmatprep.subr.bf16.mxu1 %v7382_v57  ;;  %v7455_v56 = vld [vmem:[%s8446_s26 + $0xea0] ss:$48 sps:$4 sm:$0xff]   ;;  %v7458_v57 = vld [vmem:[%s8446_s26 + $0xea8] ss:$48 sps:$4 sm:$0xff]  }
  0x7c   : > { %5036 = vmatpush1.bf16.msra.mxu0 %v7377_v58  ;;  %5200 = vmatpush1.bf16.msra.mxu1 %v7380_v59  ;;  %v7463_v58 = vld [vmem:[%s8446_s26 + $0xf04] ss:$48 sps:$4 sm:$0xff]   ;;  %v7466_v59 = vld [vmem:[%s8446_s26 + $0xf0c] ss:$48 sps:$4 sm:$0xff]  }
  0x7d   : > { %5037 = vmatprep.subr.bf16.mxu0 %v7385_v60  ;;  %5201 = vmatprep.subr.bf16.mxu1 %v7388_v61  ;;  %v7461_v60 = vld [vmem:[%s8446_s26 + $0xf00] ss:$48 sps:$4 sm:$0xff]   ;;  %v7464_v61 = vld [vmem:[%s8446_s26 + $0xf08] ss:$48 sps:$4 sm:$0xff]  }
  0x80   : > { %5038 = vmatpush1.bf16.msra.mxu0 %v7383_v62  ;;  %5202 = vmatpush1.bf16.msra.mxu1 %v7386_v63  ;;  %v7469_v62 = vld [vmem:[%s8446_s26 + $0xf64] ss:$48 sps:$4 sm:$0xff]   ;;  %v7472_v63 = vld [vmem:[%s8446_s26 + $0xf6c] ss:$48 sps:$4 sm:$0xff]  }
  0x81   : > { %5039 = vmatprep.subr.bf16.mxu0 %v7391_v0  ;;  %5203 = vmatprep.subr.bf16.mxu1 %v7394_v1  ;;  %v7467_v0 = vld [vmem:[%s8446_s26 + $0xf60] ss:$48 sps:$4 sm:$0xff]   ;;  %v7470_v1 = vld [vmem:[%s8446_s26 + $0xf68] ss:$48 sps:$4 sm:$0xff]  }
  0x84   : > { %5040 = vmatpush1.bf16.msra.mxu0 %v7389_v2  ;;  %5204 = vmatpush1.bf16.msra.mxu1 %v7392_v4  ;;  %v7475_v2 = vld [vmem:[%s8446_s26 + $0xfc4] ss:$48 sps:$4 sm:$0xff]   ;;  %v7478_v4 = vld [vmem:[%s8446_s26 + $0xfcc] ss:$48 sps:$4 sm:$0xff]  }
  0x85   : > { %5041 = vmatprep.subr.bf16.mxu0 %v7397_v7  ;;  %5205 = vmatprep.subr.bf16.mxu1 %v7400_v9  ;;  %v7473_v7 = vld [vmem:[%s8446_s26 + $0xfc0] ss:$48 sps:$4 sm:$0xff]   ;;  %v7476_v9 = vld [vmem:[%s8446_s26 + $0xfc8] ss:$48 sps:$4 sm:$0xff]  }
  0x88   : > { %5042 = vmatpush1.bf16.msra.mxu0 %v7395_v10  ;;  %5206 = vmatpush1.bf16.msra.mxu1 %v7398_v11  ;;  %v7481_v10 = vld [vmem:[%s8446_s26 + $0x1024] ss:$48 sps:$4 sm:$0xff]   ;;  %v7484_v11 = vld [vmem:[%s8446_s26 + $0x102c] ss:$48 sps:$4 sm:$0xff]  }
  0x89   : > { %5043 = vmatprep.subr.bf16.mxu0 %v7403_v12  ;;  %5207 = vmatprep.subr.bf16.mxu1 %v7406_v13  ;;  %v7479_v12 = vld [vmem:[%s8446_s26 + $0x1020] ss:$48 sps:$4 sm:$0xff]   ;;  %v7482_v13 = vld [vmem:[%s8446_s26 + $0x1028] ss:$48 sps:$4 sm:$0xff]  }
  0x8c   : > { %5044 = vmatpush1.bf16.msra.mxu0 %v7401_v15  ;;  %5208 = vmatpush1.bf16.msra.mxu1 %v7404_v17  ;;  %v7490_v15 = vld [vmem:[%s8446_s26 + $0x108c] ss:$48 sps:$4 sm:$0xff]   ;;  %v7485_v17 = vld [vmem:[%s8446_s26 + $0x1080] ss:$48 sps:$4 sm:$0xff]  }
  0x8d   : > { %5045 = vmatprep.subr.bf16.mxu0 %v7409_v18  ;;  %5209 = vmatprep.subr.bf16.mxu1 %v7412_v20  ;;  %v7488_v18 = vld [vmem:[%s8446_s26 + $0x1088] ss:$48 sps:$4 sm:$0xff]   ;;  %v7493_v20 = vld [vmem:[%s8446_s26 + $0x10e4] ss:$48 sps:$4 sm:$0xff]  }
  0x90   : > { %5046 = vmatpush1.bf16.msra.mxu0 %v7407_v8  ;;  %5210 = vmatpush1.bf16.msra.mxu1 %v7410_v23  ;;  %v7496_v8 = vld [vmem:[%s8446_s26 + $0x10ec] ss:$48 sps:$4 sm:$0xff]   ;;  %v7491_v23 = vld [vmem:[%s8446_s26 + $0x10e0] ss:$48 sps:$4 sm:$0xff]  }
  0x91   : > { %5056 = vmatprep.subr.bf16.mxu0 %v7415_v5  ;;  %5220 = vmatprep.subr.bf16.mxu1 %v7418_v24  ;;  %v7494_v5 = vld [vmem:[%s8446_s26 + $0x10e8] ss:$48 sps:$4 sm:$0xff]   ;;  %v7499_v24 = vld [vmem:[%s8446_s26 + $0x1144] ss:$48 sps:$4 sm:$0xff]  }
  0x93   : > { %5048 = vmatmul.mubr.bf16.vlgmr.msra.gmra.mrb[0].mxu0 %v8612_v28  ;;  %5212 = vmatmul.mubr.bf16.vlgmr.msra.gmra.mrb[0].mxu1 %v8612_v28 }
  0x94   : > { %5057 = vmatpush1.bf16.msra.mxu0 %v7413_v26  ;;  %5221 = vmatpush1.bf16.msra.mxu1 %v7416_v27  ;;  %v7497_v26 = vld [vmem:[%s8446_s26 + $0x1140] ss:$48 sps:$4 sm:$0xff]   ;;  %v7500_v27 = vld [vmem:[%s8446_s26 + $0x1148] ss:$48 sps:$4 sm:$0xff]  }
  0x95   : > { %5058 = vmatprep.subr.bf16.mxu0 %v7421_v29  ;;  %5222 = vmatprep.subr.bf16.mxu1 %v7424_v30  ;;  %v7505_v29 = vld [vmem:[%s8446_s26 + $0x11a4] ss:$48 sps:$4 sm:$0xff]   ;;  %v7508_v30 = vld [vmem:[%s8446_s26 + $0x11ac] ss:$48 sps:$4 sm:$0xff]  }
  0x96   : > { %5088 = vmatprep.mubr.bf16.mxu0 %v8617_v31  ;;  %5252 = vmatprep.mubr.bf16.mxu1 %v8617_v31 }
  0x98   : > { %5059 = vmatpush1.bf16.msra.mxu0 %v7419_v32  ;;  %5223 = vmatpush1.bf16.msra.mxu1 %v7422_v33  ;;  %v7503_v32 = vld [vmem:[%s8446_s26 + $0x11a0] ss:$48 sps:$4 sm:$0xff]   ;;  %v7506_v33 = vld [vmem:[%s8446_s26 + $0x11a8] ss:$48 sps:$4 sm:$0xff]  }
  0x99   : > { %5060 = vmatprep.subr.bf16.mxu0 %v7427_v34  ;;  %5224 = vmatprep.subr.bf16.mxu1 %v7430_v35  ;;  %v7512_v34 = vld [vmem:[%s8446_s26 + $0x1204] ss:$48 sps:$4 sm:$0xff]   ;;  %v7515_v35 = vld [vmem:[%s8446_s26 + $0x120c] ss:$48 sps:$4 sm:$0xff]  }
  0x9c   : > { %5061 = vmatpush1.bf16.msra.mxu0 %v7425_v36  ;;  %5225 = vmatpush1.bf16.msra.mxu1 %v7428_v37  ;;  %v7510_v36 = vld [vmem:[%s8446_s26 + $0x1200] ss:$48 sps:$4 sm:$0xff]   ;;  %v7513_v37 = vld [vmem:[%s8446_s26 + $0x1208] ss:$48 sps:$4 sm:$0xff]  }
  0x9d   : > { %5062 = vmatprep.subr.bf16.mxu0 %v7433_v38  ;;  %5226 = vmatprep.subr.bf16.mxu1 %v7436_v39  ;;  %v8687_v38 = vrot.slane %v8600_v21, %v8441_v6  ;;  %v7518_v39 = vld [vmem:[%s8446_s26 + $0x1264] ss:$48 sps:$4 sm:$0xff]   ;;  %v7516_v6 = vld [vmem:[%s8446_s26 + $0x1260] ss:$48 sps:$4 sm:$0xff]   ;;  %v7519_v21 = vld [vmem:[%s8446_s26 + $0x1268] ss:$48 sps:$4 sm:$0xff]  }
  0xa0   : > { %5063 = vmatpush1.bf16.msra.mxu0 %v7431_v40  ;;  %5227 = vmatpush1.bf16.msra.mxu1 %v7434_v41  ;;  %v7521_v40 = vld [vmem:[%s8446_s26 + $0x126c] ss:$48 sps:$4 sm:$0xff]   ;;  %v8693_v41 = vcombine.high %v8617_v31, %v8617_v31 }
  0xa1   : > { %5064 = vmatprep.subr.bf16.mxu0 %v7439_v42  ;;  %5228 = vmatprep.subr.bf16.mxu1 %v7442_v43  ;;  %v7524_v42 = vld [vmem:[%s8446_s26 + $0x12c4] ss:$48 sps:$4 sm:$0xff]   ;;  %v7527_v43 = vld [vmem:[%s8446_s26 + $0x12cc] ss:$48 sps:$4 sm:$0xff]  }
  0xa4   : > { %5065 = vmatpush1.bf16.msra.mxu0 %v7437_v44  ;;  %5229 = vmatpush1.bf16.msra.mxu1 %v7440_v45  ;;  %v7522_v44 = vld [vmem:[%s8446_s26 + $0x12c0] ss:$48 sps:$4 sm:$0xff]   ;;  %v7525_v45 = vld [vmem:[%s8446_s26 + $0x12c8] ss:$48 sps:$4 sm:$0xff]  }
  0xa5   : > { %5066 = vmatprep.subr.bf16.mxu0 %v7445_v46  ;;  %5230 = vmatprep.subr.bf16.mxu1 %v7448_v47  ;;  %v7530_v46 = vld [vmem:[%s8446_s26 + $0x1324] ss:$48 sps:$4 sm:$0xff]   ;;  %v7533_v47 = vld [vmem:[%s8446_s26 + $0x132c] ss:$48 sps:$4 sm:$0xff]  }
  0xa8   : > { %5067 = vmatpush1.bf16.msra.mxu0 %v7443_v48  ;;  %5231 = vmatpush1.bf16.msra.mxu1 %v7446_v49  ;;  %v7528_v48 = vld [vmem:[%s8446_s26 + $0x1320] ss:$48 sps:$4 sm:$0xff]   ;;  %v7531_v49 = vld [vmem:[%s8446_s26 + $0x1328] ss:$48 sps:$4 sm:$0xff]  }
  0xa9   : > { %5068 = vmatprep.subr.bf16.mxu0 %v7451_v50  ;;  %5232 = vmatprep.subr.bf16.mxu1 %v7454_v51  ;;  %v7536_v50 = vld [vmem:[%s8446_s26 + $0x1384] ss:$48 sps:$4 sm:$0xff]   ;;  %v7539_v51 = vld [vmem:[%s8446_s26 + $0x138c] ss:$48 sps:$4 sm:$0xff]  }
  0xac   : > { %5069 = vmatpush1.bf16.msra.mxu0 %v7449_v52  ;;  %5233 = vmatpush1.bf16.msra.mxu1 %v7452_v53  ;;  %v7534_v52 = vld [vmem:[%s8446_s26 + $0x1380] ss:$48 sps:$4 sm:$0xff]   ;;  %v7537_v53 = vld [vmem:[%s8446_s26 + $0x1388] ss:$48 sps:$4 sm:$0xff]  }
  0xad   : > { %5070 = vmatprep.subr.bf16.mxu0 %v7457_v54  ;;  %5234 = vmatprep.subr.bf16.mxu1 %v7460_v55  ;;  %v7542_v54 = vld [vmem:[%s8446_s26 + $0x13e4] ss:$48 sps:$4 sm:$0xff]   ;;  %v7545_v55 = vld [vmem:[%s8446_s26 + $0x13ec] ss:$48 sps:$4 sm:$0xff]  }
  0xb0   : > { %5071 = vmatpush1.bf16.msra.mxu0 %v7455_v56  ;;  %5235 = vmatpush1.bf16.msra.mxu1 %v7458_v57  ;;  %v7540_v56 = vld [vmem:[%s8446_s26 + $0x13e0] ss:$48 sps:$4 sm:$0xff]   ;;  %v7543_v57 = vld [vmem:[%s8446_s26 + $0x13e8] ss:$48 sps:$4 sm:$0xff]  }
  0xb1   : > { %5072 = vmatprep.subr.bf16.mxu0 %v7463_v58  ;;  %5236 = vmatprep.subr.bf16.mxu1 %v7466_v59  ;;  %v7548_v58 = vld [vmem:[%s8446_s26 + $0x1444] ss:$48 sps:$4 sm:$0xff]   ;;  %v7551_v59 = vld [vmem:[%s8446_s26 + $0x144c] ss:$48 sps:$4 sm:$0xff]  }
  0xb4   : > { %5073 = vmatpush1.bf16.msra.mxu0 %v7461_v60  ;;  %5237 = vmatpush1.bf16.msra.mxu1 %v7464_v61  ;;  %v7546_v60 = vld [vmem:[%s8446_s26 + $0x1440] ss:$48 sps:$4 sm:$0xff]   ;;  %v7549_v61 = vld [vmem:[%s8446_s26 + $0x1448] ss:$48 sps:$4 sm:$0xff]  }
  0xb5   : > { %5074 = vmatprep.subr.bf16.mxu0 %v7469_v62  ;;  %5238 = vmatprep.subr.bf16.mxu1 %v7472_v63  ;;  %v7554_v62 = vld [vmem:[%s8446_s26 + $0x14a4] ss:$48 sps:$4 sm:$0xff]   ;;  %v7557_v63 = vld [vmem:[%s8446_s26 + $0x14ac] ss:$48 sps:$4 sm:$0xff]  }
  0xb8   : > { %5075 = vmatpush1.bf16.msra.mxu0 %v7467_v0  ;;  %5239 = vmatpush1.bf16.msra.mxu1 %v7470_v1  ;;  %v7552_v0 = vld [vmem:[%s8446_s26 + $0x14a0] ss:$48 sps:$4 sm:$0xff]   ;;  %v7555_v1 = vld [vmem:[%s8446_s26 + $0x14a8] ss:$48 sps:$4 sm:$0xff]  }
  0xb9   : > { %5076 = vmatprep.subr.bf16.mxu0 %v7475_v2  ;;  %5240 = vmatprep.subr.bf16.mxu1 %v7478_v4  ;;  %v7560_v2 = vld [vmem:[%s8446_s26 + $0x1504] ss:$48 sps:$4 sm:$0xff]   ;;  %v7563_v4 = vld [vmem:[%s8446_s26 + $0x150c] ss:$48 sps:$4 sm:$0xff]  }
  0xbc   : > { %5077 = vmatpush1.bf16.msra.mxu0 %v7473_v7  ;;  %5241 = vmatpush1.bf16.msra.mxu1 %v7476_v9  ;;  %v7558_v7 = vld [vmem:[%s8446_s26 + $0x1500] ss:$48 sps:$4 sm:$0xff]   ;;  %v7561_v9 = vld [vmem:[%s8446_s26 + $0x1508] ss:$48 sps:$4 sm:$0xff]  }
  0xbd   : > { %5078 = vmatprep.subr.bf16.mxu0 %v7481_v10  ;;  %5242 = vmatprep.subr.bf16.mxu1 %v7484_v11  ;;  %v7566_v10 = vld [vmem:[%s8446_s26 + $0x1564] ss:$48 sps:$4 sm:$0xff]   ;;  %v7569_v11 = vld [vmem:[%s8446_s26 + $0x156c] ss:$48 sps:$4 sm:$0xff]  }
  0xc0   : > { %5079 = vmatpush1.bf16.msra.mxu0 %v7479_v12  ;;  %5243 = vmatpush1.bf16.msra.mxu1 %v7482_v13  ;;  %v7564_v12 = vld [vmem:[%s8446_s26 + $0x1560] ss:$48 sps:$4 sm:$0xff]   ;;  %v7567_v13 = vld [vmem:[%s8446_s26 + $0x1568] ss:$48 sps:$4 sm:$0xff]  }
  0xc1   : > { %5080 = vmatprep.subr.bf16.mxu0 %v7487_v14  ;;  %5244 = vmatprep.subr.bf16.mxu1 %v7490_v15  ;;  %v7572_v14 = vld [vmem:[%s8446_s26 + $0x15c4] ss:$48 sps:$4 sm:$0xff]   ;;  %v7575_v15 = vld [vmem:[%s8446_s26 + $0x15cc] ss:$48 sps:$4 sm:$0xff]  }
  0xc4   : > { %5081 = vmatpush1.bf16.msra.mxu0 %v7485_v17  ;;  %5245 = vmatpush1.bf16.msra.mxu1 %v7488_v18  ;;  %v7570_v17 = vld [vmem:[%s8446_s26 + $0x15c0] ss:$48 sps:$4 sm:$0xff]   ;;  %v7573_v18 = vld [vmem:[%s8446_s26 + $0x15c8] ss:$48 sps:$4 sm:$0xff]  }
  0xc5   : > { %5082 = vmatprep.subr.bf16.mxu0 %v7493_v20  ;;  %5246 = vmatprep.subr.bf16.mxu1 %v7496_v8  ;;  %v7578_v20 = vld [vmem:[%s8446_s26 + $0x1624] ss:$48 sps:$4 sm:$0xff]   ;;  %v7581_v8 = vld [vmem:[%s8446_s26 + $0x162c] ss:$48 sps:$4 sm:$0xff]  }
  0xc8   : > { %5083 = vmatpush1.bf16.msra.mxu0 %v7491_v23  ;;  %5247 = vmatpush1.bf16.msra.mxu1 %v7494_v5  ;;  %v7576_v23 = vld [vmem:[%s8446_s26 + $0x1620] ss:$48 sps:$4 sm:$0xff]   ;;  %v7579_v5 = vld [vmem:[%s8446_s26 + $0x1628] ss:$48 sps:$4 sm:$0xff]  }
  0xc9   : > { %5084 = vmatprep.subr.bf16.mxu0 %v7499_v24  ;;  %5248 = vmatprep.subr.bf16.mxu1 %v7502_v25  ;;  %v7584_v24 = vld [vmem:[%s8446_s26 + $0x1684] ss:$48 sps:$4 sm:$0xff]   ;;  %v7587_v25 = vld [vmem:[%s8446_s26 + $0x168c] ss:$48 sps:$4 sm:$0xff]  }
  0xcc   : > { %5085 = vmatpush1.bf16.msra.mxu0 %v7497_v26  ;;  %5249 = vmatpush1.bf16.msra.mxu1 %v7500_v27  ;;  %v7582_v26 = vld [vmem:[%s8446_s26 + $0x1680] ss:$48 sps:$4 sm:$0xff]   ;;  %v7585_v27 = vld [vmem:[%s8446_s26 + $0x1688] ss:$48 sps:$4 sm:$0xff]  }
  0xcd   : > { %5086 = vmatprep.subr.bf16.mxu0 %v7505_v29  ;;  %5250 = vmatprep.subr.bf16.mxu1 %v7508_v30  ;;  %v7590_v29 = vld [vmem:[%s8446_s26 + $0x16e4] ss:$48 sps:$4 sm:$0xff]   ;;  %v7593_v30 = vld [vmem:[%s8446_s26 + $0x16ec] ss:$48 sps:$4 sm:$0xff]  }
  0xd0   : > { %5087 = vmatpush1.bf16.msra.mxu0 %v7503_v32  ;;  %5251 = vmatpush1.bf16.msra.mxu1 %v7506_v33  ;;  %v7588_v32 = vld [vmem:[%s8446_s26 + $0x16e0] ss:$48 sps:$4 sm:$0xff]   ;;  %v7591_v33 = vld [vmem:[%s8446_s26 + $0x16e8] ss:$48 sps:$4 sm:$0xff]  }
  0xd1   : > { %5097 = vmatprep.subr.bf16.mxu0 %v7512_v34  ;;  %5261 = vmatprep.subr.bf16.mxu1 %v7515_v35  ;;  %v7596_v34 = vld [vmem:[%s8446_s26 + $0x1744] ss:$48 sps:$4 sm:$0xff]   ;;  %v7599_v35 = vld [vmem:[%s8446_s26 + $0x174c] ss:$48 sps:$4 sm:$0xff]  }
  0xd3   : > { %5089 = vmatmul.mubr.bf16.vlgmr.msra.gmra.mrb[0].mxu0 %v8687_v38  ;;  %5253 = vmatmul.mubr.bf16.vlgmr.msra.gmra.mrb[0].mxu1 %v8687_v38 }
  0xd4   : > { %5098 = vmatpush1.bf16.msra.mxu0 %v7510_v36  ;;  %5262 = vmatpush1.bf16.msra.mxu1 %v7513_v37  ;;  %v7594_v36 = vld [vmem:[%s8446_s26 + $0x1740] ss:$48 sps:$4 sm:$0xff]   ;;  %v7597_v37 = vld [vmem:[%s8446_s26 + $0x1748] ss:$48 sps:$4 sm:$0xff]  }
  0xd5   : > { %5099 = vmatprep.subr.bf16.mxu0 %v7518_v39  ;;  %5263 = vmatprep.subr.bf16.mxu1 %v7521_v40  ;;  %v7602_v39 = vld [vmem:[%s8446_s26 + $0x17a4] ss:$48 sps:$4 sm:$0xff]   ;;  %v7605_v40 = vld [vmem:[%s8446_s26 + $0x17ac] ss:$48 sps:$4 sm:$0xff]  }
  0xd6   : > { %5129 = vmatprep.mubr.bf16.mxu0 %v8693_v41  ;;  %5293 = vmatprep.mubr.bf16.mxu1 %v8693_v41 }
  0xd8   : > { %5100 = vmatpush1.bf16.msra.mxu0 %v7516_v6  ;;  %5264 = vmatpush1.bf16.msra.mxu1 %v7519_v21  ;;  %v7600_v6 = vld [vmem:[%s8446_s26 + $0x17a0] ss:$48 sps:$4 sm:$0xff]   ;;  %v7603_v21 = vld [vmem:[%s8446_s26 + $0x17a8] ss:$48 sps:$4 sm:$0xff]  }
  0xd9   : > { %5101 = vmatprep.subr.bf16.mxu0 %v7524_v42  ;;  %5265 = vmatprep.subr.bf16.mxu1 %v7527_v43  ;;  %v7608_v42 = vld [vmem:[%s8446_s26 + $0x14] ss:$48 sps:$4 sm:$0xff]   ;;  %v7611_v43 = vld [vmem:[%s8446_s26 + $0x1c] ss:$48 sps:$4 sm:$0xff]  }
  0xdc   : > { %5102 = vmatpush1.bf16.msra.mxu0 %v7522_v44  ;;  %5266 = vmatpush1.bf16.msra.mxu1 %v7525_v45  ;;  %v8761_v44 = vcombine.high %v8687_v38, %v8687_v38  ;;  %v7606_v45 = vld [vmem:[%s8446_s26 + $0x10] ss:$48 sps:$4 sm:$0xff]  }
  0xdd   : > { %5103 = vmatprep.subr.bf16.mxu0 %v7530_v46  ;;  %5267 = vmatprep.subr.bf16.mxu1 %v7533_v47  ;;  %v7609_v46 = vld [vmem:[%s8446_s26 + $0x18] ss:$48 sps:$4 sm:$0xff]   ;;  %v7614_v47 = vld [vmem:[%s8446_s26 + $0x74] ss:$48 sps:$4 sm:$0xff]  }
  0xe0   : > { %5104 = vmatpush1.bf16.msra.mxu0 %v7528_v48  ;;  %5268 = vmatpush1.bf16.msra.mxu1 %v7531_v49  ;;  %v7617_v48 = vld [vmem:[%s8446_s26 + $0x7c] ss:$48 sps:$4 sm:$0xff]   ;;  %v7612_v49 = vld [vmem:[%s8446_s26 + $0x70] ss:$48 sps:$4 sm:$0xff]  }
  0xe1   : > { %5105 = vmatprep.subr.bf16.mxu0 %v7536_v50  ;;  %5269 = vmatprep.subr.bf16.mxu1 %v7539_v51  ;;  %v7615_v50 = vld [vmem:[%s8446_s26 + $0x78] ss:$48 sps:$4 sm:$0xff]   ;;  %v7620_v51 = vld [vmem:[%s8446_s26 + $0xd4] ss:$48 sps:$4 sm:$0xff]  }
  0xe4   : > { %5106 = vmatpush1.bf16.msra.mxu0 %v7534_v52  ;;  %5270 = vmatpush1.bf16.msra.mxu1 %v7537_v53  ;;  %v7623_v52 = vld [vmem:[%s8446_s26 + $0xdc] ss:$48 sps:$4 sm:$0xff]   ;;  %v7618_v53 = vld [vmem:[%s8446_s26 + $0xd0] ss:$48 sps:$4 sm:$0xff]  }
  0xe5   : > { %5107 = vmatprep.subr.bf16.mxu0 %v7542_v54  ;;  %5271 = vmatprep.subr.bf16.mxu1 %v7545_v55  ;;  %v7621_v54 = vld [vmem:[%s8446_s26 + $0xd8] ss:$48 sps:$4 sm:$0xff]   ;;  %v7626_v55 = vld [vmem:[%s8446_s26 + $0x134] ss:$48 sps:$4 sm:$0xff]  }
  0xe8   : > { %5108 = vmatpush1.bf16.msra.mxu0 %v7540_v56  ;;  %5272 = vmatpush1.bf16.msra.mxu1 %v7543_v57  ;;  %v7629_v56 = vld [vmem:[%s8446_s26 + $0x13c] ss:$48 sps:$4 sm:$0xff]   ;;  %v7624_v57 = vld [vmem:[%s8446_s26 + $0x130] ss:$48 sps:$4 sm:$0xff]  }
  0xe9   : > { %5109 = vmatprep.subr.bf16.mxu0 %v7548_v58  ;;  %5273 = vmatprep.subr.bf16.mxu1 %v7551_v59  ;;  %v7627_v58 = vld [vmem:[%s8446_s26 + $0x138] ss:$48 sps:$4 sm:$0xff]   ;;  %v7632_v59 = vld [vmem:[%s8446_s26 + $0x194] ss:$48 sps:$4 sm:$0xff]  }
  0xec   : > { %5110 = vmatpush1.bf16.msra.mxu0 %v7546_v60  ;;  %5274 = vmatpush1.bf16.msra.mxu1 %v7549_v61  ;;  %v7635_v60 = vld [vmem:[%s8446_s26 + $0x19c] ss:$48 sps:$4 sm:$0xff]   ;;  %v7630_v61 = vld [vmem:[%s8446_s26 + $0x190] ss:$48 sps:$4 sm:$0xff]  }
  0xed   : > { %5111 = vmatprep.subr.bf16.mxu0 %v7554_v62  ;;  %5275 = vmatprep.subr.bf16.mxu1 %v7557_v63  ;;  %v7633_v62 = vld [vmem:[%s8446_s26 + $0x198] ss:$48 sps:$4 sm:$0xff]   ;;  %v7638_v63 = vld [vmem:[%s8446_s26 + $0x1f4] ss:$48 sps:$4 sm:$0xff]  }
  0xf0   : > { %5112 = vmatpush1.bf16.msra.mxu0 %v7552_v0  ;;  %5276 = vmatpush1.bf16.msra.mxu1 %v7555_v1  ;;  %v7641_v0 = vld [vmem:[%s8446_s26 + $0x1fc] ss:$48 sps:$4 sm:$0xff]   ;;  %v7636_v1 = vld [vmem:[%s8446_s26 + $0x1f0] ss:$48 sps:$4 sm:$0xff]  }
  0xf1   : > { %5113 = vmatprep.subr.bf16.mxu0 %v7560_v2  ;;  %5277 = vmatprep.subr.bf16.mxu1 %v7563_v4  ;;  %v7639_v2 = vld [vmem:[%s8446_s26 + $0x1f8] ss:$48 sps:$4 sm:$0xff]   ;;  %v7644_v4 = vld [vmem:[%s8446_s26 + $0x254] ss:$48 sps:$4 sm:$0xff]  }
  0xf4   : > { %5114 = vmatpush1.bf16.msra.mxu0 %v7558_v7  ;;  %5278 = vmatpush1.bf16.msra.mxu1 %v7561_v9  ;;  %v7647_v7 = vld [vmem:[%s8446_s26 + $0x25c] ss:$48 sps:$4 sm:$0xff]   ;;  %v7642_v9 = vld [vmem:[%s8446_s26 + $0x250] ss:$48 sps:$4 sm:$0xff]  }
  0xf5   : > { %5115 = vmatprep.subr.bf16.mxu0 %v7566_v10  ;;  %5279 = vmatprep.subr.bf16.mxu1 %v7569_v11  ;;  %v7645_v10 = vld [vmem:[%s8446_s26 + $0x258] ss:$48 sps:$4 sm:$0xff]   ;;  %v7650_v11 = vld [vmem:[%s8446_s26 + $0x2b4] ss:$48 sps:$4 sm:$0xff]  }
  0xf8   : > { %5116 = vmatpush1.bf16.msra.mxu0 %v7564_v12  ;;  %5280 = vmatpush1.bf16.msra.mxu1 %v7567_v13  ;;  %v7653_v12 = vld [vmem:[%s8446_s26 + $0x2bc] ss:$48 sps:$4 sm:$0xff]   ;;  %v7648_v13 = vld [vmem:[%s8446_s26 + $0x2b0] ss:$48 sps:$4 sm:$0xff]  }
  0xf9   : > { %5117 = vmatprep.subr.bf16.mxu0 %v7572_v14  ;;  %5281 = vmatprep.subr.bf16.mxu1 %v7575_v15  ;;  %v7651_v14 = vld [vmem:[%s8446_s26 + $0x2b8] ss:$48 sps:$4 sm:$0xff]   ;;  %v7656_v15 = vld [vmem:[%s8446_s26 + $0x314] ss:$48 sps:$4 sm:$0xff]  }
  0xfc   : > { %5118 = vmatpush1.bf16.msra.mxu0 %v7570_v17  ;;  %5282 = vmatpush1.bf16.msra.mxu1 %v7573_v18  ;;  %v7659_v17 = vld [vmem:[%s8446_s26 + $0x31c] ss:$48 sps:$4 sm:$0xff]   ;;  %v7654_v18 = vld [vmem:[%s8446_s26 + $0x310] ss:$48 sps:$4 sm:$0xff]  }
  0xfd   : > { %5119 = vmatprep.subr.bf16.mxu0 %v7578_v20  ;;  %5283 = vmatprep.subr.bf16.mxu1 %v7581_v8  ;;  %v7657_v20 = vld [vmem:[%s8446_s26 + $0x318] ss:$48 sps:$4 sm:$0xff]   ;;  %v7662_v8 = vld [vmem:[%s8446_s26 + $0x374] ss:$48 sps:$4 sm:$0xff]  }
 0x100   : > { %5120 = vmatpush1.bf16.msra.mxu0 %v7576_v23  ;;  %5284 = vmatpush1.bf16.msra.mxu1 %v7579_v5  ;;  %v7665_v23 = vld [vmem:[%s8446_s26 + $0x37c] ss:$48 sps:$4 sm:$0xff]   ;;  %v7660_v5 = vld [vmem:[%s8446_s26 + $0x370] ss:$48 sps:$4 sm:$0xff]  }
 0x101   : > { %5121 = vmatprep.subr.bf16.mxu0 %v7584_v24  ;;  %5285 = vmatprep.subr.bf16.mxu1 %v7587_v25  ;;  %v7663_v24 = vld [vmem:[%s8446_s26 + $0x378] ss:$48 sps:$4 sm:$0xff]   ;;  %v7668_v25 = vld [vmem:[%s8446_s26 + $0x3d4] ss:$48 sps:$4 sm:$0xff]  }
 0x104   : > { %5122 = vmatpush1.bf16.msra.mxu0 %v7582_v26  ;;  %5286 = vmatpush1.bf16.msra.mxu1 %v7585_v27  ;;  %v7671_v26 = vld [vmem:[%s8446_s26 + $0x3dc] ss:$48 sps:$4 sm:$0xff]   ;;  %v7666_v27 = vld [vmem:[%s8446_s26 + $0x3d0] ss:$48 sps:$4 sm:$0xff]  }
 0x105   : > { %5123 = vmatprep.subr.bf16.mxu0 %v7590_v29  ;;  %5287 = vmatprep.subr.bf16.mxu1 %v7593_v30  ;;  %v7669_v29 = vld [vmem:[%s8446_s26 + $0x3d8] ss:$48 sps:$4 sm:$0xff]   ;;  %v7674_v30 = vld [vmem:[%s8446_s26 + $0x434] ss:$48 sps:$4 sm:$0xff]  }
 0x108   : > { %5124 = vmatpush1.bf16.msra.mxu0 %v7588_v32  ;;  %5288 = vmatpush1.bf16.msra.mxu1 %v7591_v33  ;;  %v7677_v32 = vld [vmem:[%s8446_s26 + $0x43c] ss:$48 sps:$4 sm:$0xff]   ;;  %v7672_v33 = vld [vmem:[%s8446_s26 + $0x430] ss:$48 sps:$4 sm:$0xff]  }
 0x109   : > { %5125 = vmatprep.subr.bf16.mxu0 %v7596_v34  ;;  %5289 = vmatprep.subr.bf16.mxu1 %v7599_v35  ;;  %v7675_v34 = vld [vmem:[%s8446_s26 + $0x438] ss:$48 sps:$4 sm:$0xff]   ;;  %v7680_v35 = vld [vmem:[%s8446_s26 + $0x494] ss:$48 sps:$4 sm:$0xff]  }
 0x10c   : > { %5126 = vmatpush1.bf16.msra.mxu0 %v7594_v36  ;;  %5290 = vmatpush1.bf16.msra.mxu1 %v7597_v37  ;;  %v7683_v36 = vld [vmem:[%s8446_s26 + $0x49c] ss:$48 sps:$4 sm:$0xff]   ;;  %v7678_v37 = vld [vmem:[%s8446_s26 + $0x490] ss:$48 sps:$4 sm:$0xff]  }
 0x10d   : > { %5127 = vmatprep.subr.bf16.mxu0 %v7602_v39  ;;  %5291 = vmatprep.subr.bf16.mxu1 %v7605_v40  ;;  %v7681_v39 = vld [vmem:[%s8446_s26 + $0x498] ss:$48 sps:$4 sm:$0xff]   ;;  %v7686_v40 = vld [vmem:[%s8446_s26 + $0x4f4] ss:$48 sps:$4 sm:$0xff]  }
 0x110   : > { %5128 = vmatpush1.bf16.msra.mxu0 %v7600_v6  ;;  %5292 = vmatpush1.bf16.msra.mxu1 %v7603_v21  ;;  %v7689_v6 = vld [vmem:[%s8446_s26 + $0x4fc] ss:$48 sps:$4 sm:$0xff]   ;;  %v7684_v21 = vld [vmem:[%s8446_s26 + $0x4f0] ss:$48 sps:$4 sm:$0xff]  }
 0x111   : > { %5302 = vmatprep.subr.bf16.mxu0 %v7608_v42  ;;  %5466 = vmatprep.subr.bf16.mxu1 %v7611_v43  ;;  %v7687_v42 = vld [vmem:[%s8446_s26 + $0x4f8] ss:$48 sps:$4 sm:$0xff]   ;;  %v7692_v43 = vld [vmem:[%s8446_s26 + $0x554] ss:$48 sps:$4 sm:$0xff]  }
 0x113   : > { %5130 = vmatmul.mubr.bf16.vlgmr.msra.gmra.mrb[0].mxu0 %v8761_v44  ;;  %5294 = vmatmul.mubr.bf16.vlgmr.msra.gmra.mrb[0].mxu1 %v8761_v44 }
 0x114   : > { %5303 = vmatpush1.bf16.msra.mxu0 %v7606_v45  ;;  %5467 = vmatpush1.bf16.msra.mxu1 %v7609_v46  ;;  %v7695_v45 = vld [vmem:[%s8446_s26 + $0x55c] ss:$48 sps:$4 sm:$0xff]   ;;  %v7690_v46 = vld [vmem:[%s8446_s26 + $0x550] ss:$48 sps:$4 sm:$0xff]  }
 0x115   : > { %5304 = vmatprep.subr.bf16.mxu0 %v7614_v47  ;;  %5468 = vmatprep.subr.bf16.mxu1 %v7617_v48  ;;  %v7693_v47 = vld [vmem:[%s8446_s26 + $0x558] ss:$48 sps:$4 sm:$0xff]   ;;  %v7698_v48 = vld [vmem:[%s8446_s26 + $0x5b4] ss:$48 sps:$4 sm:$0xff]  }
 0x116   : > { %5334 = vmatprep.mubr.bf16.mxu0 %v8462_v16  ;;  %5498 = vmatprep.mubr.bf16.mxu1 %v8462_v16 }
 0x118   : > { %5305 = vmatpush1.bf16.msra.mxu0 %v7612_v49  ;;  %5469 = vmatpush1.bf16.msra.mxu1 %v7615_v50  ;;  %v7701_v49 = vld [vmem:[%s8446_s26 + $0x5bc] ss:$48 sps:$4 sm:$0xff]   ;;  %v7696_v50 = vld [vmem:[%s8446_s26 + $0x5b0] ss:$48 sps:$4 sm:$0xff]  }
 0x119   : > { %5306 = vmatprep.subr.bf16.mxu0 %v7620_v51  ;;  %5470 = vmatprep.subr.bf16.mxu1 %v7623_v52  ;;  %v7699_v51 = vld [vmem:[%s8446_s26 + $0x5b8] ss:$48 sps:$4 sm:$0xff]   ;;  %v7704_v52 = vld [vmem:[%s8446_s26 + $0x614] ss:$48 sps:$4 sm:$0xff]  }
 0x11c   : > { %5307 = vmatpush1.bf16.msra.mxu0 %v7618_v53  ;;  %5471 = vmatpush1.bf16.msra.mxu1 %v7621_v54  ;;  %v7707_v53 = vld [vmem:[%s8446_s26 + $0x61c] ss:$48 sps:$4 sm:$0xff]   ;;  %v7702_v54 = vld [vmem:[%s8446_s26 + $0x610] ss:$48 sps:$4 sm:$0xff]  }
 0x11d   : > { %5308 = vmatprep.subr.bf16.mxu0 %v7626_v55  ;;  %5472 = vmatprep.subr.bf16.mxu1 %v7629_v56  ;;  %v7705_v55 = vld [vmem:[%s8446_s26 + $0x618] ss:$48 sps:$4 sm:$0xff]   ;;  %v7710_v56 = vld [vmem:[%s8446_s26 + $0x674] ss:$48 sps:$4 sm:$0xff]  }
 0x120   : > { %5309 = vmatpush1.bf16.msra.mxu0 %v7624_v57  ;;  %5473 = vmatpush1.bf16.msra.mxu1 %v7627_v58  ;;  %v7713_v57 = vld [vmem:[%s8446_s26 + $0x67c] ss:$48 sps:$4 sm:$0xff]   ;;  %v7708_v58 = vld [vmem:[%s8446_s26 + $0x670] ss:$48 sps:$4 sm:$0xff]  }
 0x121   : > { %5310 = vmatprep.subr.bf16.mxu0 %v7632_v59  ;;  %5474 = vmatprep.subr.bf16.mxu1 %v7635_v60  ;;  %v7711_v59 = vld [vmem:[%s8446_s26 + $0x678] ss:$48 sps:$4 sm:$0xff]   ;;  %v7716_v60 = vld [vmem:[%s8446_s26 + $0x6d4] ss:$48 sps:$4 sm:$0xff]  }
 0x124   : > { %5311 = vmatpush1.bf16.msra.mxu0 %v7630_v61  ;;  %5475 = vmatpush1.bf16.msra.mxu1 %v7633_v62  ;;  %v7719_v61 = vld [vmem:[%s8446_s26 + $0x6dc] ss:$48 sps:$4 sm:$0xff]   ;;  %v7714_v62 = vld [vmem:[%s8446_s26 + $0x6d0] ss:$48 sps:$4 sm:$0xff]  }
 0x125   : > { %5312 = vmatprep.subr.bf16.mxu0 %v7638_v63  ;;  %5476 = vmatprep.subr.bf16.mxu1 %v7641_v0  ;;  %v7717_v63 = vld [vmem:[%s8446_s26 + $0x6d8] ss:$48 sps:$4 sm:$0xff]   ;;  %v7722_v0 = vld [vmem:[%s8446_s26 + $0x734] ss:$48 sps:$4 sm:$0xff]  }
 0x128   : > { %5313 = vmatpush1.bf16.msra.mxu0 %v7636_v1  ;;  %5477 = vmatpush1.bf16.msra.mxu1 %v7639_v2  ;;  %v7725_v1 = vld [vmem:[%s8446_s26 + $0x73c] ss:$48 sps:$4 sm:$0xff]   ;;  %v7720_v2 = vld [vmem:[%s8446_s26 + $0x730] ss:$48 sps:$4 sm:$0xff]  }
 0x129   : > { %5314 = vmatprep.subr.bf16.mxu0 %v7644_v4  ;;  %5478 = vmatprep.subr.bf16.mxu1 %v7647_v7  ;;  %v7723_v4 = vld [vmem:[%s8446_s26 + $0x738] ss:$48 sps:$4 sm:$0xff]   ;;  %v7728_v7 = vld [vmem:[%s8446_s26 + $0x794] ss:$48 sps:$4 sm:$0xff]  }
 0x12c   : > { %5315 = vmatpush1.bf16.msra.mxu0 %v7642_v9  ;;  %5479 = vmatpush1.bf16.msra.mxu1 %v7645_v10  ;;  %v7731_v9 = vld [vmem:[%s8446_s26 + $0x79c] ss:$48 sps:$4 sm:$0xff]   ;;  %v7726_v10 = vld [vmem:[%s8446_s26 + $0x790] ss:$48 sps:$4 sm:$0xff]  }
 0x12d   : > { %5316 = vmatprep.subr.bf16.mxu0 %v7650_v11  ;;  %5480 = vmatprep.subr.bf16.mxu1 %v7653_v12  ;;  %v7729_v11 = vld [vmem:[%s8446_s26 + $0x798] ss:$48 sps:$4 sm:$0xff]   ;;  %v7734_v12 = vld [vmem:[%s8446_s26 + $0x7f4] ss:$48 sps:$4 sm:$0xff]  }
 0x130   : > { %5317 = vmatpush1.bf16.msra.mxu0 %v7648_v13  ;;  %5481 = vmatpush1.bf16.msra.mxu1 %v7651_v14  ;;  %v7737_v13 = vld [vmem:[%s8446_s26 + $0x7fc] ss:$48 sps:$4 sm:$0xff]   ;;  %v7732_v14 = vld [vmem:[%s8446_s26 + $0x7f0] ss:$48 sps:$4 sm:$0xff]  }
 0x131   : > { %5318 = vmatprep.subr.bf16.mxu0 %v7656_v15  ;;  %5482 = vmatprep.subr.bf16.mxu1 %v7659_v17  ;;  %v7735_v15 = vld [vmem:[%s8446_s26 + $0x7f8] ss:$48 sps:$4 sm:$0xff]   ;;  %v7740_v17 = vld [vmem:[%s8446_s26 + $0x854] ss:$48 sps:$4 sm:$0xff]  }
 0x134   : > { %5319 = vmatpush1.bf16.msra.mxu0 %v7654_v18  ;;  %5483 = vmatpush1.bf16.msra.mxu1 %v7657_v20  ;;  %v7743_v18 = vld [vmem:[%s8446_s26 + $0x85c] ss:$48 sps:$4 sm:$0xff]   ;;  %v7738_v20 = vld [vmem:[%s8446_s26 + $0x850] ss:$48 sps:$4 sm:$0xff]  }
 0x135   : > { %5320 = vmatprep.subr.bf16.mxu0 %v7662_v8  ;;  %5484 = vmatprep.subr.bf16.mxu1 %v7665_v23  ;;  %v7741_v8 = vld [vmem:[%s8446_s26 + $0x858] ss:$48 sps:$4 sm:$0xff]   ;;  %v7746_v23 = vld [vmem:[%s8446_s26 + $0x8b4] ss:$48 sps:$4 sm:$0xff]  }
 0x138   : > { %5321 = vmatpush1.bf16.msra.mxu0 %v7660_v5  ;;  %5485 = vmatpush1.bf16.msra.mxu1 %v7663_v24  ;;  %v7749_v5 = vld [vmem:[%s8446_s26 + $0x8bc] ss:$48 sps:$4 sm:$0xff]   ;;  %v7744_v24 = vld [vmem:[%s8446_s26 + $0x8b0] ss:$48 sps:$4 sm:$0xff]  }
 0x139   : > { %5322 = vmatprep.subr.bf16.mxu0 %v7668_v25  ;;  %5486 = vmatprep.subr.bf16.mxu1 %v7671_v26  ;;  %v7747_v25 = vld [vmem:[%s8446_s26 + $0x8b8] ss:$48 sps:$4 sm:$0xff]   ;;  %v7752_v26 = vld [vmem:[%s8446_s26 + $0x914] ss:$48 sps:$4 sm:$0xff]  }
 0x13c   : > { %5323 = vmatpush1.bf16.msra.mxu0 %v7666_v27  ;;  %5487 = vmatpush1.bf16.msra.mxu1 %v7669_v29  ;;  %v7755_v27 = vld [vmem:[%s8446_s26 + $0x91c] ss:$48 sps:$4 sm:$0xff]   ;;  %v7750_v29 = vld [vmem:[%s8446_s26 + $0x910] ss:$48 sps:$4 sm:$0xff]  }
 0x13d   : > { %5324 = vmatprep.subr.bf16.mxu0 %v7674_v30  ;;  %5488 = vmatprep.subr.bf16.mxu1 %v7677_v32  ;;  %v7753_v30 = vld [vmem:[%s8446_s26 + $0x918] ss:$48 sps:$4 sm:$0xff]   ;;  %v7758_v32 = vld [vmem:[%s8446_s26 + $0x974] ss:$48 sps:$4 sm:$0xff]  }
 0x140   : > { %5325 = vmatpush1.bf16.msra.mxu0 %v7672_v33  ;;  %5489 = vmatpush1.bf16.msra.mxu1 %v7675_v34  ;;  %v7761_v33 = vld [vmem:[%s8446_s26 + $0x97c] ss:$48 sps:$4 sm:$0xff]   ;;  %v7756_v34 = vld [vmem:[%s8446_s26 + $0x970] ss:$48 sps:$4 sm:$0xff]  }
 0x141   : > { %5326 = vmatprep.subr.bf16.mxu0 %v7680_v35  ;;  %5490 = vmatprep.subr.bf16.mxu1 %v7683_v36  ;;  %v7759_v35 = vld [vmem:[%s8446_s26 + $0x978] ss:$48 sps:$4 sm:$0xff]   ;;  %v7764_v36 = vld [vmem:[%s8446_s26 + $0x9d4] ss:$48 sps:$4 sm:$0xff]  }
 0x144   : > { %5327 = vmatpush1.bf16.msra.mxu0 %v7678_v37  ;;  %5491 = vmatpush1.bf16.msra.mxu1 %v7681_v39  ;;  %v7767_v37 = vld [vmem:[%s8446_s26 + $0x9dc] ss:$48 sps:$4 sm:$0xff]   ;;  %v7762_v39 = vld [vmem:[%s8446_s26 + $0x9d0] ss:$48 sps:$4 sm:$0xff]  }
 0x145   : > { %5328 = vmatprep.subr.bf16.mxu0 %v7686_v40  ;;  %5492 = vmatprep.subr.bf16.mxu1 %v7689_v6  ;;  %v7765_v40 = vld [vmem:[%s8446_s26 + $0x9d8] ss:$48 sps:$4 sm:$0xff]   ;;  %v7770_v6 = vld [vmem:[%s8446_s26 + $0xa34] ss:$48 sps:$4 sm:$0xff]  }
 0x148   : > { %5329 = vmatpush1.bf16.msra.mxu0 %v7684_v21  ;;  %5493 = vmatpush1.bf16.msra.mxu1 %v7687_v42  ;;  %v7773_v21 = vld [vmem:[%s8446_s26 + $0xa3c] ss:$48 sps:$4 sm:$0xff]   ;;  %v7768_v42 = vld [vmem:[%s8446_s26 + $0xa30] ss:$48 sps:$4 sm:$0xff]  }
 0x149   : > { %5330 = vmatprep.subr.bf16.mxu0 %v7692_v43  ;;  %5494 = vmatprep.subr.bf16.mxu1 %v7695_v45  ;;  %v7771_v43 = vld [vmem:[%s8446_s26 + $0xa38] ss:$48 sps:$4 sm:$0xff]   ;;  %v7776_v45 = vld [vmem:[%s8446_s26 + $0xa94] ss:$48 sps:$4 sm:$0xff]  }
 0x14c   : > { %5331 = vmatpush1.bf16.msra.mxu0 %v7690_v46  ;;  %5495 = vmatpush1.bf16.msra.mxu1 %v7693_v47  ;;  %v7779_v46 = vld [vmem:[%s8446_s26 + $0xa9c] ss:$48 sps:$4 sm:$0xff]   ;;  %v7774_v47 = vld [vmem:[%s8446_s26 + $0xa90] ss:$48 sps:$4 sm:$0xff]  }
 0x14d   : > { %5332 = vmatprep.subr.bf16.mxu0 %v7698_v48  ;;  %5496 = vmatprep.subr.bf16.mxu1 %v7701_v49  ;;  %v7777_v48 = vld [vmem:[%s8446_s26 + $0xa98] ss:$48 sps:$4 sm:$0xff]   ;;  %v7782_v49 = vld [vmem:[%s8446_s26 + $0xaf4] ss:$48 sps:$4 sm:$0xff]  }
 0x150   : > { %5333 = vmatpush1.bf16.msra.mxu0 %v7696_v50  ;;  %5497 = vmatpush1.bf16.msra.mxu1 %v7699_v51  ;;  %v7785_v50 = vld [vmem:[%s8446_s26 + $0xafc] ss:$48 sps:$4 sm:$0xff]   ;;  %v7780_v51 = vld [vmem:[%s8446_s26 + $0xaf0] ss:$48 sps:$4 sm:$0xff]  }
 0x151   : > { %5343 = vmatprep.subr.bf16.mxu0 %v7704_v52  ;;  %5507 = vmatprep.subr.bf16.mxu1 %v7707_v53  ;;  %v7783_v52 = vld [vmem:[%s8446_s26 + $0xaf8] ss:$48 sps:$4 sm:$0xff]   ;;  %v7788_v53 = vld [vmem:[%s8446_s26 + $0xb54] ss:$48 sps:$4 sm:$0xff]  }
 0x153   : > { %5335 = vmatmul.mubr.bf16.vlgmr.msra.gmra.mrb[4].mxu0 %v8529_v19  ;;  %5499 = vmatmul.mubr.bf16.vlgmr.msra.gmra.mrb[4].mxu1 %v8529_v19 }
 0x154   : > { %5344 = vmatpush1.bf16.msra.mxu0 %v7702_v54  ;;  %5508 = vmatpush1.bf16.msra.mxu1 %v7705_v55  ;;  %v7791_v54 = vld [vmem:[%s8446_s26 + $0xb5c] ss:$48 sps:$4 sm:$0xff]   ;;  %v7786_v55 = vld [vmem:[%s8446_s26 + $0xb50] ss:$48 sps:$4 sm:$0xff]  }
 0x155   : > { %5345 = vmatprep.subr.bf16.mxu0 %v7710_v56  ;;  %5509 = vmatprep.subr.bf16.mxu1 %v7713_v57  ;;  %v7789_v56 = vld [vmem:[%s8446_s26 + $0xb58] ss:$48 sps:$4 sm:$0xff]   ;;  %v7794_v57 = vld [vmem:[%s8446_s26 + $0xbb4] ss:$48 sps:$4 sm:$0xff]  }
 0x156   : > { %5375 = vmatprep.mubr.bf16.mxu0 %v8535_v22  ;;  %5539 = vmatprep.mubr.bf16.mxu1 %v8535_v22 }
 0x158   : > { %5346 = vmatpush1.bf16.msra.mxu0 %v7708_v58  ;;  %5510 = vmatpush1.bf16.msra.mxu1 %v7711_v59  ;;  %v7797_v58 = vld [vmem:[%s8446_s26 + $0xbbc] ss:$48 sps:$4 sm:$0xff]   ;;  %v7792_v59 = vld [vmem:[%s8446_s26 + $0xbb0] ss:$48 sps:$4 sm:$0xff]  }
 0x159   : > { %5347 = vmatprep.subr.bf16.mxu0 %v7716_v60  ;;  %5511 = vmatprep.subr.bf16.mxu1 %v7719_v61  ;;  %v7795_v60 = vld [vmem:[%s8446_s26 + $0xbb8] ss:$48 sps:$4 sm:$0xff]   ;;  %v7800_v61 = vld [vmem:[%s8446_s26 + $0xc14] ss:$48 sps:$4 sm:$0xff]  }
 0x15c   : > { %5348 = vmatpush1.bf16.msra.mxu0 %v7714_v62  ;;  %5512 = vmatpush1.bf16.msra.mxu1 %v7717_v63  ;;  %v7803_v62 = vld [vmem:[%s8446_s26 + $0xc1c] ss:$48 sps:$4 sm:$0xff]   ;;  %v7798_v63 = vld [vmem:[%s8446_s26 + $0xc10] ss:$48 sps:$4 sm:$0xff]  }
 0x15d   : > { %5349 = vmatprep.subr.bf16.mxu0 %v7722_v0  ;;  %5513 = vmatprep.subr.bf16.mxu1 %v7725_v1  ;;  %v7801_v0 = vld [vmem:[%s8446_s26 + $0xc18] ss:$48 sps:$4 sm:$0xff]   ;;  %v7806_v1 = vld [vmem:[%s8446_s26 + $0xc74] ss:$48 sps:$4 sm:$0xff]  }
 0x160   : > { %5350 = vmatpush1.bf16.msra.mxu0 %v7720_v2  ;;  %5514 = vmatpush1.bf16.msra.mxu1 %v7723_v4  ;;  %v7809_v2 = vld [vmem:[%s8446_s26 + $0xc7c] ss:$48 sps:$4 sm:$0xff]   ;;  %v7804_v4 = vld [vmem:[%s8446_s26 + $0xc70] ss:$48 sps:$4 sm:$0xff]  }
 0x161   : > { %5351 = vmatprep.subr.bf16.mxu0 %v7728_v7  ;;  %5515 = vmatprep.subr.bf16.mxu1 %v7731_v9  ;;  %v7807_v7 = vld [vmem:[%s8446_s26 + $0xc78] ss:$48 sps:$4 sm:$0xff]   ;;  %v7812_v9 = vld [vmem:[%s8446_s26 + $0xcd4] ss:$48 sps:$4 sm:$0xff]  }
 0x164   : > { %5352 = vmatpush1.bf16.msra.mxu0 %v7726_v10  ;;  %5516 = vmatpush1.bf16.msra.mxu1 %v7729_v11  ;;  %v7815_v10 = vld [vmem:[%s8446_s26 + $0xcdc] ss:$48 sps:$4 sm:$0xff]   ;;  %v7810_v11 = vld [vmem:[%s8446_s26 + $0xcd0] ss:$48 sps:$4 sm:$0xff]  }
 0x165   : > { %5353 = vmatprep.subr.bf16.mxu0 %v7734_v12  ;;  %5517 = vmatprep.subr.bf16.mxu1 %v7737_v13  ;;  %v7813_v12 = vld [vmem:[%s8446_s26 + $0xcd8] ss:$48 sps:$4 sm:$0xff]   ;;  %v7818_v13 = vld [vmem:[%s8446_s26 + $0xd34] ss:$48 sps:$4 sm:$0xff]  }
 0x168   : > { %5354 = vmatpush1.bf16.msra.mxu0 %v7732_v14  ;;  %5518 = vmatpush1.bf16.msra.mxu1 %v7735_v15  ;;  %v7821_v14 = vld [vmem:[%s8446_s26 + $0xd3c] ss:$48 sps:$4 sm:$0xff]   ;;  %v7816_v15 = vld [vmem:[%s8446_s26 + $0xd30] ss:$48 sps:$4 sm:$0xff]  }
 0x169   : > { %5355 = vmatprep.subr.bf16.mxu0 %v7740_v17  ;;  %5519 = vmatprep.subr.bf16.mxu1 %v7743_v18  ;;  %v7819_v17 = vld [vmem:[%s8446_s26 + $0xd38] ss:$48 sps:$4 sm:$0xff]   ;;  %v7824_v18 = vld [vmem:[%s8446_s26 + $0xd94] ss:$48 sps:$4 sm:$0xff]  }
 0x16c   : > { %5356 = vmatpush1.bf16.msra.mxu0 %v7738_v20  ;;  %5520 = vmatpush1.bf16.msra.mxu1 %v7741_v8  ;;  %v7827_v20 = vld [vmem:[%s8446_s26 + $0xd9c] ss:$48 sps:$4 sm:$0xff]   ;;  %v7822_v8 = vld [vmem:[%s8446_s26 + $0xd90] ss:$48 sps:$4 sm:$0xff]  }
 0x16d   : > { %5357 = vmatprep.subr.bf16.mxu0 %v7746_v23  ;;  %5521 = vmatprep.subr.bf16.mxu1 %v7749_v5  ;;  %v7825_v23 = vld [vmem:[%s8446_s26 + $0xd98] ss:$48 sps:$4 sm:$0xff]   ;;  %v7830_v5 = vld [vmem:[%s8446_s26 + $0xdf4] ss:$48 sps:$4 sm:$0xff]  }
 0x170   : > { %5358 = vmatpush1.bf16.msra.mxu0 %v7744_v24  ;;  %5522 = vmatpush1.bf16.msra.mxu1 %v7747_v25  ;;  %v7833_v24 = vld [vmem:[%s8446_s26 + $0xdfc] ss:$48 sps:$4 sm:$0xff]   ;;  %v7828_v25 = vld [vmem:[%s8446_s26 + $0xdf0] ss:$48 sps:$4 sm:$0xff]  }
 0x171   : > { %5359 = vmatprep.subr.bf16.mxu0 %v7752_v26  ;;  %5523 = vmatprep.subr.bf16.mxu1 %v7755_v27  ;;  %v7831_v26 = vld [vmem:[%s8446_s26 + $0xdf8] ss:$48 sps:$4 sm:$0xff]   ;;  %v7836_v27 = vld [vmem:[%s8446_s26 + $0xe54] ss:$48 sps:$4 sm:$0xff]  }
 0x174   : > { %5360 = vmatpush1.bf16.msra.mxu0 %v7750_v29  ;;  %5524 = vmatpush1.bf16.msra.mxu1 %v7753_v30  ;;  %v7839_v29 = vld [vmem:[%s8446_s26 + $0xe5c] ss:$48 sps:$4 sm:$0xff]   ;;  %v7834_v30 = vld [vmem:[%s8446_s26 + $0xe50] ss:$48 sps:$4 sm:$0xff]  }
 0x175   : > { %5361 = vmatprep.subr.bf16.mxu0 %v7758_v32  ;;  %5525 = vmatprep.subr.bf16.mxu1 %v7761_v33  ;;  %v7837_v32 = vld [vmem:[%s8446_s26 + $0xe58] ss:$48 sps:$4 sm:$0xff]   ;;  %v7842_v33 = vld [vmem:[%s8446_s26 + $0xeb4] ss:$48 sps:$4 sm:$0xff]  }
 0x178   : > { %5362 = vmatpush1.bf16.msra.mxu0 %v7756_v34  ;;  %5526 = vmatpush1.bf16.msra.mxu1 %v7759_v35  ;;  %v7845_v34 = vld [vmem:[%s8446_s26 + $0xebc] ss:$48 sps:$4 sm:$0xff]   ;;  %v7840_v35 = vld [vmem:[%s8446_s26 + $0xeb0] ss:$48 sps:$4 sm:$0xff]  }
 0x179   : > { %5363 = vmatprep.subr.bf16.mxu0 %v7764_v36  ;;  %5527 = vmatprep.subr.bf16.mxu1 %v7767_v37  ;;  %v7843_v36 = vld [vmem:[%s8446_s26 + $0xeb8] ss:$48 sps:$4 sm:$0xff]   ;;  %v7848_v37 = vld [vmem:[%s8446_s26 + $0xf14] ss:$48 sps:$4 sm:$0xff]  }
 0x17c   : > { %5364 = vmatpush1.bf16.msra.mxu0 %v7762_v39  ;;  %5528 = vmatpush1.bf16.msra.mxu1 %v7765_v40  ;;  %v7851_v39 = vld [vmem:[%s8446_s26 + $0xf1c] ss:$48 sps:$4 sm:$0xff]   ;;  %v7846_v40 = vld [vmem:[%s8446_s26 + $0xf10] ss:$48 sps:$4 sm:$0xff]  }
 0x17d   : > { %5365 = vmatprep.subr.bf16.mxu0 %v7770_v6  ;;  %5529 = vmatprep.subr.bf16.mxu1 %v7773_v21  ;;  %v7849_v6 = vld [vmem:[%s8446_s26 + $0xf18] ss:$48 sps:$4 sm:$0xff]   ;;  %v7854_v21 = vld [vmem:[%s8446_s26 + $0xf74] ss:$48 sps:$4 sm:$0xff]  }
 0x180   : > { %5366 = vmatpush1.bf16.msra.mxu0 %v7768_v42  ;;  %5530 = vmatpush1.bf16.msra.mxu1 %v7771_v43  ;;  %v7857_v42 = vld [vmem:[%s8446_s26 + $0xf7c] ss:$48 sps:$4 sm:$0xff]   ;;  %v7852_v43 = vld [vmem:[%s8446_s26 + $0xf70] ss:$48 sps:$4 sm:$0xff]  }
 0x181   : > { %5367 = vmatprep.subr.bf16.mxu0 %v7776_v45  ;;  %5531 = vmatprep.subr.bf16.mxu1 %v7779_v46  ;;  %v7855_v45 = vld [vmem:[%s8446_s26 + $0xf78] ss:$48 sps:$4 sm:$0xff]   ;;  %v7860_v46 = vld [vmem:[%s8446_s26 + $0xfd4] ss:$48 sps:$4 sm:$0xff]  }
 0x184   : > { %5368 = vmatpush1.bf16.msra.mxu0 %v7774_v47  ;;  %5532 = vmatpush1.bf16.msra.mxu1 %v7777_v48  ;;  %v7863_v47 = vld [vmem:[%s8446_s26 + $0xfdc] ss:$48 sps:$4 sm:$0xff]   ;;  %v7858_v48 = vld [vmem:[%s8446_s26 + $0xfd0] ss:$48 sps:$4 sm:$0xff]  }
 0x185   : > { %5369 = vmatprep.subr.bf16.mxu0 %v7782_v49  ;;  %5533 = vmatprep.subr.bf16.mxu1 %v7785_v50  ;;  %v7861_v49 = vld [vmem:[%s8446_s26 + $0xfd8] ss:$48 sps:$4 sm:$0xff]   ;;  %v7866_v50 = vld [vmem:[%s8446_s26 + $0x1034] ss:$48 sps:$4 sm:$0xff]  }
 0x188   : > { %5370 = vmatpush1.bf16.msra.mxu0 %v7780_v51  ;;  %5534 = vmatpush1.bf16.msra.mxu1 %v7783_v52  ;;  %v7869_v51 = vld [vmem:[%s8446_s26 + $0x103c] ss:$48 sps:$4 sm:$0xff]   ;;  %v7864_v52 = vld [vmem:[%s8446_s26 + $0x1030] ss:$48 sps:$4 sm:$0xff]  }
 0x189   : > { %5371 = vmatprep.subr.bf16.mxu0 %v7788_v53  ;;  %5535 = vmatprep.subr.bf16.mxu1 %v7791_v54  ;;  %v7867_v53 = vld [vmem:[%s8446_s26 + $0x1038] ss:$48 sps:$4 sm:$0xff]   ;;  %v7872_v54 = vld [vmem:[%s8446_s26 + $0x1094] ss:$48 sps:$4 sm:$0xff]  }
 0x18c   : > { %5372 = vmatpush1.bf16.msra.mxu0 %v7786_v55  ;;  %5536 = vmatpush1.bf16.msra.mxu1 %v7789_v56  ;;  %v7875_v55 = vld [vmem:[%s8446_s26 + $0x109c] ss:$48 sps:$4 sm:$0xff]   ;;  %v7870_v56 = vld [vmem:[%s8446_s26 + $0x1090] ss:$48 sps:$4 sm:$0xff]  }
 0x18d   : > { %5373 = vmatprep.subr.bf16.mxu0 %v7794_v57  ;;  %5537 = vmatprep.subr.bf16.mxu1 %v7797_v58  ;;  %v7873_v57 = vld [vmem:[%s8446_s26 + $0x1098] ss:$48 sps:$4 sm:$0xff]   ;;  %v7878_v58 = vld [vmem:[%s8446_s26 + $0x10f4] ss:$48 sps:$4 sm:$0xff]  }
 0x190   : > { %5374 = vmatpush1.bf16.msra.mxu0 %v7792_v59  ;;  %5538 = vmatpush1.bf16.msra.mxu1 %v7795_v60  ;;  %v7881_v59 = vld [vmem:[%s8446_s26 + $0x10fc] ss:$48 sps:$4 sm:$0xff]   ;;  %v7876_v60 = vld [vmem:[%s8446_s26 + $0x10f0] ss:$48 sps:$4 sm:$0xff]  }
 0x191   : > { %5384 = vmatprep.subr.bf16.mxu0 %v7800_v61  ;;  %5548 = vmatprep.subr.bf16.mxu1 %v7803_v62  ;;  %v7879_v61 = vld [vmem:[%s8446_s26 + $0x10f8] ss:$48 sps:$4 sm:$0xff]   ;;  %v7884_v62 = vld [vmem:[%s8446_s26 + $0x1154] ss:$48 sps:$4 sm:$0xff]  }
 0x193   : > { %5376 = vmatmul.mubr.bf16.vlgmr.msra.gmra.mrb[4].mxu0 %v8612_v28  ;;  %5540 = vmatmul.mubr.bf16.vlgmr.msra.gmra.mrb[4].mxu1 %v8612_v28 }
 0x194   : > { %5385 = vmatpush1.bf16.msra.mxu0 %v7798_v63  ;;  %5549 = vmatpush1.bf16.msra.mxu1 %v7801_v0  ;;  %v7887_v63 = vld [vmem:[%s8446_s26 + $0x115c] ss:$48 sps:$4 sm:$0xff]   ;;  %v7882_v0 = vld [vmem:[%s8446_s26 + $0x1150] ss:$48 sps:$4 sm:$0xff]  }
 0x195   : > { %5386 = vmatprep.subr.bf16.mxu0 %v7806_v1  ;;  %5550 = vmatprep.subr.bf16.mxu1 %v7809_v2  ;;  %v7885_v1 = vld [vmem:[%s8446_s26 + $0x1158] ss:$48 sps:$4 sm:$0xff]   ;;  %v7890_v2 = vld [vmem:[%s8446_s26 + $0x11b4] ss:$48 sps:$4 sm:$0xff]  }
 0x196   : > { %5416 = vmatprep.mubr.bf16.mxu0 %v8617_v31  ;;  %5580 = vmatprep.mubr.bf16.mxu1 %v8617_v31 }
 0x198   : > { %5387 = vmatpush1.bf16.msra.mxu0 %v7804_v4  ;;  %5551 = vmatpush1.bf16.msra.mxu1 %v7807_v7  ;;  %v7893_v4 = vld [vmem:[%s8446_s26 + $0x11bc] ss:$48 sps:$4 sm:$0xff]   ;;  %v7888_v7 = vld [vmem:[%s8446_s26 + $0x11b0] ss:$48 sps:$4 sm:$0xff]  }
 0x199   : > { %5388 = vmatprep.subr.bf16.mxu0 %v7812_v9  ;;  %5552 = vmatprep.subr.bf16.mxu1 %v7815_v10  ;;  %v7891_v9 = vld [vmem:[%s8446_s26 + $0x11b8] ss:$48 sps:$4 sm:$0xff]   ;;  %v7896_v10 = vld [vmem:[%s8446_s26 + $0x1214] ss:$48 sps:$4 sm:$0xff]  }
 0x19c   : > { %5389 = vmatpush1.bf16.msra.mxu0 %v7810_v11  ;;  %5553 = vmatpush1.bf16.msra.mxu1 %v7813_v12  ;;  %v7899_v11 = vld [vmem:[%s8446_s26 + $0x121c] ss:$48 sps:$4 sm:$0xff]   ;;  %v7894_v12 = vld [vmem:[%s8446_s26 + $0x1210] ss:$48 sps:$4 sm:$0xff]  }
 0x19d   : > { %5390 = vmatprep.subr.bf16.mxu0 %v7818_v13  ;;  %5554 = vmatprep.subr.bf16.mxu1 %v7821_v14  ;;  %v7897_v13 = vld [vmem:[%s8446_s26 + $0x1218] ss:$48 sps:$4 sm:$0xff]   ;;  %v7902_v14 = vld [vmem:[%s8446_s26 + $0x1274] ss:$48 sps:$4 sm:$0xff]  }
 0x1a0   : > { %5391 = vmatpush1.bf16.msra.mxu0 %v7816_v15  ;;  %5555 = vmatpush1.bf16.msra.mxu1 %v7819_v17  ;;  %v7905_v15 = vld [vmem:[%s8446_s26 + $0x127c] ss:$48 sps:$4 sm:$0xff]   ;;  %v7900_v17 = vld [vmem:[%s8446_s26 + $0x1270] ss:$48 sps:$4 sm:$0xff]  }
 0x1a1   : > { %5392 = vmatprep.subr.bf16.mxu0 %v7824_v18  ;;  %5556 = vmatprep.subr.bf16.mxu1 %v7827_v20  ;;  %v7903_v18 = vld [vmem:[%s8446_s26 + $0x1278] ss:$48 sps:$4 sm:$0xff]   ;;  %v7908_v20 = vld [vmem:[%s8446_s26 + $0x12d4] ss:$48 sps:$4 sm:$0xff]  }
 0x1a4   : > { %5393 = vmatpush1.bf16.msra.mxu0 %v7822_v8  ;;  %5557 = vmatpush1.bf16.msra.mxu1 %v7825_v23  ;;  %v7911_v8 = vld [vmem:[%s8446_s26 + $0x12dc] ss:$48 sps:$4 sm:$0xff]   ;;  %v7906_v23 = vld [vmem:[%s8446_s26 + $0x12d0] ss:$48 sps:$4 sm:$0xff]  }
 0x1a5   : > { %5394 = vmatprep.subr.bf16.mxu0 %v7830_v5  ;;  %5558 = vmatprep.subr.bf16.mxu1 %v7833_v24  ;;  %v7909_v5 = vld [vmem:[%s8446_s26 + $0x12d8] ss:$48 sps:$4 sm:$0xff]   ;;  %v7914_v24 = vld [vmem:[%s8446_s26 + $0x1334] ss:$48 sps:$4 sm:$0xff]  }
 0x1a8   : > { %5395 = vmatpush1.bf16.msra.mxu0 %v7828_v25  ;;  %5559 = vmatpush1.bf16.msra.mxu1 %v7831_v26  ;;  %v7917_v25 = vld [vmem:[%s8446_s26 + $0x133c] ss:$48 sps:$4 sm:$0xff]   ;;  %v7912_v26 = vld [vmem:[%s8446_s26 + $0x1330] ss:$48 sps:$4 sm:$0xff]  }
 0x1a9   : > { %5396 = vmatprep.subr.bf16.mxu0 %v7836_v27  ;;  %5560 = vmatprep.subr.bf16.mxu1 %v7839_v29  ;;  %v7915_v27 = vld [vmem:[%s8446_s26 + $0x1338] ss:$48 sps:$4 sm:$0xff]   ;;  %v7920_v29 = vld [vmem:[%s8446_s26 + $0x1394] ss:$48 sps:$4 sm:$0xff]  }
 0x1ac   : > { %5397 = vmatpush1.bf16.msra.mxu0 %v7834_v30  ;;  %5561 = vmatpush1.bf16.msra.mxu1 %v7837_v32  ;;  %v7923_v30 = vld [vmem:[%s8446_s26 + $0x139c] ss:$48 sps:$4 sm:$0xff]   ;;  %v7918_v32 = vld [vmem:[%s8446_s26 + $0x1390] ss:$48 sps:$4 sm:$0xff]  }
 0x1ad   : > { %5398 = vmatprep.subr.bf16.mxu0 %v7842_v33  ;;  %5562 = vmatprep.subr.bf16.mxu1 %v7845_v34  ;;  %v7921_v33 = vld [vmem:[%s8446_s26 + $0x1398] ss:$48 sps:$4 sm:$0xff]   ;;  %v7926_v34 = vld [vmem:[%s8446_s26 + $0x13f4] ss:$48 sps:$4 sm:$0xff]  }
 0x1b0   : > { %5399 = vmatpush1.bf16.msra.mxu0 %v7840_v35  ;;  %5563 = vmatpush1.bf16.msra.mxu1 %v7843_v36  ;;  %v7929_v35 = vld [vmem:[%s8446_s26 + $0x13fc] ss:$48 sps:$4 sm:$0xff]   ;;  %v7924_v36 = vld [vmem:[%s8446_s26 + $0x13f0] ss:$48 sps:$4 sm:$0xff]  }
 0x1b1   : > { %5400 = vmatprep.subr.bf16.mxu0 %v7848_v37  ;;  %5564 = vmatprep.subr.bf16.mxu1 %v7851_v39  ;;  %v7927_v37 = vld [vmem:[%s8446_s26 + $0x13f8] ss:$48 sps:$4 sm:$0xff]   ;;  %v7932_v39 = vld [vmem:[%s8446_s26 + $0x1454] ss:$48 sps:$4 sm:$0xff]  }
 0x1b4   : > { %5401 = vmatpush1.bf16.msra.mxu0 %v7846_v40  ;;  %5565 = vmatpush1.bf16.msra.mxu1 %v7849_v6  ;;  %v7935_v40 = vld [vmem:[%s8446_s26 + $0x145c] ss:$48 sps:$4 sm:$0xff]  }
 0x1b5   : > { %5402 = vmatprep.subr.bf16.mxu0 %v7854_v21  ;;  %5566 = vmatprep.subr.bf16.mxu1 %v7857_v42 }
 0x1b8   : > { %5403 = vmatpush1.bf16.msra.mxu0 %v7852_v43  ;;  %5567 = vmatpush1.bf16.msra.mxu1 %v7855_v45 }
 0x1b9   : > { %5404 = vmatprep.subr.bf16.mxu0 %v7860_v46  ;;  %5568 = vmatprep.subr.bf16.mxu1 %v7863_v47  ;;  %v7930_v47 = vld [vmem:[%s8446_s26 + $0x1450] ss:$48 sps:$4 sm:$0xff]  }
 0x1bc   : > { %5405 = vmatpush1.bf16.msra.mxu0 %v7858_v48  ;;  %5569 = vmatpush1.bf16.msra.mxu1 %v7861_v49  ;;  %v7933_v48 = vld [vmem:[%s8446_s26 + $0x1458] ss:$48 sps:$4 sm:$0xff]  }
 0x1bd   : > { %5406 = vmatprep.subr.bf16.mxu0 %v7866_v50  ;;  %5570 = vmatprep.subr.bf16.mxu1 %v7869_v51  ;;  %v7938_v51 = vld [vmem:[%s8446_s26 + $0x14b4] ss:$48 sps:$4 sm:$0xff]  }
 0x1c0   : > { %5407 = vmatpush1.bf16.msra.mxu0 %v7864_v52  ;;  %5571 = vmatpush1.bf16.msra.mxu1 %v7867_v53  ;;  %v7941_v52 = vld [vmem:[%s8446_s26 + $0x14bc] ss:$48 sps:$4 sm:$0xff]   ;;  %v7936_v53 = vld [vmem:[%s8446_s26 + $0x14b0] ss:$48 sps:$4 sm:$0xff]  }
 0x1c1   : > { %5408 = vmatprep.subr.bf16.mxu0 %v7872_v54  ;;  %5572 = vmatprep.subr.bf16.mxu1 %v7875_v55  ;;  %v7939_v54 = vld [vmem:[%s8446_s26 + $0x14b8] ss:$48 sps:$4 sm:$0xff]   ;;  %v7944_v55 = vld [vmem:[%s8446_s26 + $0x1514] ss:$48 sps:$4 sm:$0xff]  }
 0x1c4   : > { %5409 = vmatpush1.bf16.msra.mxu0 %v7870_v56  ;;  %5573 = vmatpush1.bf16.msra.mxu1 %v7873_v57  ;;  %v7947_v56 = vld [vmem:[%s8446_s26 + $0x151c] ss:$48 sps:$4 sm:$0xff]   ;;  %v7942_v57 = vld [vmem:[%s8446_s26 + $0x1510] ss:$48 sps:$4 sm:$0xff]  }
 0x1c5   : > { %5410 = vmatprep.subr.bf16.mxu0 %v7878_v58  ;;  %5574 = vmatprep.subr.bf16.mxu1 %v7881_v59  ;;  %v7945_v58 = vld [vmem:[%s8446_s26 + $0x1518] ss:$48 sps:$4 sm:$0xff]   ;;  %v7950_v59 = vld [vmem:[%s8446_s26 + $0x1574] ss:$48 sps:$4 sm:$0xff]  }
 0x1c8   : > { %5411 = vmatpush1.bf16.msra.mxu0 %v7876_v60  ;;  %5575 = vmatpush1.bf16.msra.mxu1 %v7879_v61  ;;  %v7953_v60 = vld [vmem:[%s8446_s26 + $0x157c] ss:$48 sps:$4 sm:$0xff]   ;;  %v7948_v61 = vld [vmem:[%s8446_s26 + $0x1570] ss:$48 sps:$4 sm:$0xff]  }
 0x1c9   : > { %5412 = vmatprep.subr.bf16.mxu0 %v7884_v62  ;;  %5576 = vmatprep.subr.bf16.mxu1 %v7887_v63  ;;  %v7951_v62 = vld [vmem:[%s8446_s26 + $0x1578] ss:$48 sps:$4 sm:$0xff]   ;;  %v7956_v63 = vld [vmem:[%s8446_s26 + $0x15d4] ss:$48 sps:$4 sm:$0xff]  }
 0x1cc   : > { %5413 = vmatpush1.bf16.msra.mxu0 %v7882_v0  ;;  %5577 = vmatpush1.bf16.msra.mxu1 %v7885_v1  ;;  %v7959_v0 = vld [vmem:[%s8446_s26 + $0x15dc] ss:$48 sps:$4 sm:$0xff]   ;;  %v7954_v1 = vld [vmem:[%s8446_s26 + $0x15d0] ss:$48 sps:$4 sm:$0xff]  }
 0x1cd   : > { %5414 = vmatprep.subr.bf16.mxu0 %v7890_v2  ;;  %5578 = vmatprep.subr.bf16.mxu1 %v7893_v4  ;;  %v7957_v2 = vld [vmem:[%s8446_s26 + $0x15d8] ss:$48 sps:$4 sm:$0xff]   ;;  %v7962_v4 = vld [vmem:[%s8446_s26 + $0x1634] ss:$48 sps:$4 sm:$0xff]  }
 0x1d0   : > { %5415 = vmatpush1.bf16.msra.mxu0 %v7888_v7  ;;  %5579 = vmatpush1.bf16.msra.mxu1 %v7891_v9  ;;  %v7965_v7 = vld [vmem:[%s8446_s26 + $0x163c] ss:$48 sps:$4 sm:$0xff]   ;;  %v7960_v9 = vld [vmem:[%s8446_s26 + $0x1630] ss:$48 sps:$4 sm:$0xff]  }
 0x1d1   : > { %5425 = vmatprep.subr.bf16.mxu0 %v7896_v10  ;;  %5589 = vmatprep.subr.bf16.mxu1 %v7899_v11  ;;  %v7963_v10 = vld [vmem:[%s8446_s26 + $0x1638] ss:$48 sps:$4 sm:$0xff]   ;;  %v7968_v11 = vld [vmem:[%s8446_s26 + $0x1694] ss:$48 sps:$4 sm:$0xff]  }
 0x1d3   : > { %5417 = vmatmul.mubr.bf16.vlgmr.msra.gmra.mrb[4].mxu0 %v8687_v38  ;;  %5581 = vmatmul.mubr.bf16.vlgmr.msra.gmra.mrb[4].mxu1 %v8687_v38 }
 0x1d4   : > { %5426 = vmatpush1.bf16.msra.mxu0 %v7894_v12  ;;  %5590 = vmatpush1.bf16.msra.mxu1 %v7897_v13  ;;  %v7971_v12 = vld [vmem:[%s8446_s26 + $0x169c] ss:$48 sps:$4 sm:$0xff]   ;;  %v7966_v13 = vld [vmem:[%s8446_s26 + $0x1690] ss:$48 sps:$4 sm:$0xff]  }
 0x1d5   : > { %5427 = vmatprep.subr.bf16.mxu0 %v7902_v14  ;;  %5591 = vmatprep.subr.bf16.mxu1 %v7905_v15  ;;  %v7969_v14 = vld [vmem:[%s8446_s26 + $0x1698] ss:$48 sps:$4 sm:$0xff]   ;;  %v7974_v15 = vld [vmem:[%s8446_s26 + $0x16f4] ss:$48 sps:$4 sm:$0xff]  }
 0x1d6   : > { %5457 = vmatprep.mubr.bf16.mxu0 %v8693_v41  ;;  %5621 = vmatprep.mubr.bf16.mxu1 %v8693_v41 }
 0x1d8   : > { %5428 = vmatpush1.bf16.msra.mxu0 %v7900_v17  ;;  %5592 = vmatpush1.bf16.msra.mxu1 %v7903_v18  ;;  %v7977_v17 = vld [vmem:[%s8446_s26 + $0x16fc] ss:$48 sps:$4 sm:$0xff]   ;;  %v7972_v18 = vld [vmem:[%s8446_s26 + $0x16f0] ss:$48 sps:$4 sm:$0xff]  }
 0x1d9   : > { %5429 = vmatprep.subr.bf16.mxu0 %v7908_v20  ;;  %5593 = vmatprep.subr.bf16.mxu1 %v7911_v8  ;;  %v7975_v20 = vld [vmem:[%s8446_s26 + $0x16f8] ss:$48 sps:$4 sm:$0xff]   ;;  %v7980_v8 = vld [vmem:[%s8446_s26 + $0x1754] ss:$48 sps:$4 sm:$0xff]  }
 0x1dc   : > { %5430 = vmatpush1.bf16.msra.mxu0 %v7906_v23  ;;  %5594 = vmatpush1.bf16.msra.mxu1 %v7909_v5  ;;  %v7983_v23 = vld [vmem:[%s8446_s26 + $0x175c] ss:$48 sps:$4 sm:$0xff]   ;;  %v7978_v5 = vld [vmem:[%s8446_s26 + $0x1750] ss:$48 sps:$4 sm:$0xff]  }
 0x1dd   : > { %5431 = vmatprep.subr.bf16.mxu0 %v7914_v24  ;;  %5595 = vmatprep.subr.bf16.mxu1 %v7917_v25  ;;  %v7981_v24 = vld [vmem:[%s8446_s26 + $0x1758] ss:$48 sps:$4 sm:$0xff]   ;;  %v7986_v25 = vld [vmem:[%s8446_s26 + $0x17b4] ss:$48 sps:$4 sm:$0xff]  }
 0x1e0   : > { %5432 = vmatpush1.bf16.msra.mxu0 %v7912_v26  ;;  %5596 = vmatpush1.bf16.msra.mxu1 %v7915_v27  ;;  %v7989_v26 = vld [vmem:[%s8446_s26 + $0x17bc] ss:$48 sps:$4 sm:$0xff]   ;;  %v7984_v27 = vld [vmem:[%s8446_s26 + $0x17b0] ss:$48 sps:$4 sm:$0xff]  }
 0x1e1   : > { %5433 = vmatprep.subr.bf16.mxu0 %v7920_v29  ;;  %5597 = vmatprep.subr.bf16.mxu1 %v7923_v30  ;;  %v7987_v29 = vld [vmem:[%s8446_s26 + $0x17b8] ss:$48 sps:$4 sm:$0xff]   ;;  %v7992_v30 = vld [vmem:[%s8446_s26 + $0x24] ss:$48 sps:$4 sm:$0xff]  }
 0x1e4   : > { %5434 = vmatpush1.bf16.msra.mxu0 %v7918_v32  ;;  %5598 = vmatpush1.bf16.msra.mxu1 %v7921_v33  ;;  %v7995_v32 = vld [vmem:[%s8446_s26 + $0x2c] ss:$48 sps:$4 sm:$0xff]   ;;  %v7990_v33 = vld [vmem:[%s8446_s26 + $0x20] ss:$48 sps:$4 sm:$0xff]  }
 0x1e5   : > { %5435 = vmatprep.subr.bf16.mxu0 %v7926_v34  ;;  %5599 = vmatprep.subr.bf16.mxu1 %v7929_v35  ;;  %v7993_v34 = vld [vmem:[%s8446_s26 + $0x28] ss:$48 sps:$4 sm:$0xff]   ;;  %v7998_v35 = vld [vmem:[%s8446_s26 + $0x84] ss:$48 sps:$4 sm:$0xff]  }
 0x1e6   : > { %v8995_v6 = vpop.f32.mrb[0].mxu0  ;;  %v8997_v21 = vpop.f32.mrb[0].mxu1 }
 0x1e7   : > { %v8999_v42 = vpop.f32.mrb[1].mxu0  ;;  %v9001_v43 = vpop.f32.mrb[1].mxu1 }
 0x1e8   : > { %v5135_v45 = vpop.f32.mrb[2].mxu0  ;;  %v5299_v46 = vpop.f32.mrb[2].mxu1  ;;  %5436 = vmatpush1.bf16.msra.mxu0 %v7924_v36  ;;  %5600 = vmatpush1.bf16.msra.mxu1 %v7927_v37  ;;  %v8001_v36 = vld [vmem:[%s8446_s26 + $0x8c] ss:$48 sps:$4 sm:$0xff]   ;;  %v7996_v37 = vld [vmem:[%s8446_s26 + $0x80] ss:$48 sps:$4 sm:$0xff]  }
 0x1e9   : > { %v5136_v49 = vpop.f32.mrb[3].mxu0  ;;  %v5300_v50 = vpop.f32.mrb[3].mxu1  ;;  %5437 = vmatprep.subr.bf16.mxu0 %v7932_v39  ;;  %5601 = vmatprep.subr.bf16.mxu1 %v7935_v40  ;;  %v7999_v39 = vld [vmem:[%s8446_s26 + $0x88] ss:$48 sps:$4 sm:$0xff]   ;;  %v8004_v40 = vld [vmem:[%s8446_s26 + $0xe4] ss:$48 sps:$4 sm:$0xff]  }
 0x1ea   : > { %v8007_v45 = vld [vmem:[%s8446_s26 + $0xec] ss:$48 sps:$4 sm:$0xff]   ;;  %v8002_v46 = vld [vmem:[%s8446_s26 + $0xe0] ss:$48 sps:$4 sm:$0xff]  }
 0x1eb   : > { %v8013_v49 = vld [vmem:[%s8446_s26 + $0x14c] ss:$48 sps:$4 sm:$0xff]   ;;  %v8008_v50 = vld [vmem:[%s8446_s26 + $0x140] ss:$48 sps:$4 sm:$0xff]  }
 0x1ec   : > { %5438 = vmatpush1.bf16.msra.mxu0 %v7930_v47  ;;  %5602 = vmatpush1.bf16.msra.mxu1 %v7933_v48  ;;  %v8005_v47 = vld [vmem:[%s8446_s26 + $0xe8] ss:$48 sps:$4 sm:$0xff]   ;;  %v8010_v48 = vld [vmem:[%s8446_s26 + $0x144] ss:$48 sps:$4 sm:$0xff]  }
 0x1ed   : > { %5439 = vmatprep.subr.bf16.mxu0 %v7938_v51  ;;  %5603 = vmatprep.subr.bf16.mxu1 %v7941_v52  ;;  %v8011_v51 = vld [vmem:[%s8446_s26 + $0x148] ss:$48 sps:$4 sm:$0xff]   ;;  %v8019_v52 = vld [vmem:[%s8446_s26 + $0x1ac] ss:$48 sps:$4 sm:$0xff]  }
 0x1f0   : > { %5440 = vmatpush1.bf16.msra.mxu0 %v7936_v53  ;;  %5604 = vmatpush1.bf16.msra.mxu1 %v7939_v54  ;;  %v8014_v53 = vld [vmem:[%s8446_s26 + $0x1a0] ss:$48 sps:$4 sm:$0xff]   ;;  %v8017_v54 = vld [vmem:[%s8446_s26 + $0x1a8] ss:$48 sps:$4 sm:$0xff]  }
 0x1f1   : > { %5441 = vmatprep.subr.bf16.mxu0 %v7944_v55  ;;  %5605 = vmatprep.subr.bf16.mxu1 %v7947_v56  ;;  %v8022_v55 = vld [vmem:[%s8446_s26 + $0x204] ss:$48 sps:$4 sm:$0xff]   ;;  %v8025_v56 = vld [vmem:[%s8446_s26 + $0x20c] ss:$48 sps:$4 sm:$0xff]  }
 0x1f4   : > { %5442 = vmatpush1.bf16.msra.mxu0 %v7942_v57  ;;  %5606 = vmatpush1.bf16.msra.mxu1 %v7945_v58  ;;  %v8020_v57 = vld [vmem:[%s8446_s26 + $0x200] ss:$48 sps:$4 sm:$0xff]   ;;  %v8023_v58 = vld [vmem:[%s8446_s26 + $0x208] ss:$48 sps:$4 sm:$0xff]  }
 0x1f5   : > { %5443 = vmatprep.subr.bf16.mxu0 %v7950_v59  ;;  %5607 = vmatprep.subr.bf16.mxu1 %v7953_v60  ;;  %v8028_v59 = vld [vmem:[%s8446_s26 + $0x264] ss:$48 sps:$4 sm:$0xff]   ;;  %v8031_v60 = vld [vmem:[%s8446_s26 + $0x26c] ss:$48 sps:$4 sm:$0xff]  }
 0x1f8   : > { %5444 = vmatpush1.bf16.msra.mxu0 %v7948_v61  ;;  %5608 = vmatpush1.bf16.msra.mxu1 %v7951_v62  ;;  %v8026_v61 = vld [vmem:[%s8446_s26 + $0x260] ss:$48 sps:$4 sm:$0xff]   ;;  %v8029_v62 = vld [vmem:[%s8446_s26 + $0x268] ss:$48 sps:$4 sm:$0xff]  }
 0x1f9   : > { %5445 = vmatprep.subr.bf16.mxu0 %v7956_v63  ;;  %5609 = vmatprep.subr.bf16.mxu1 %v7959_v0  ;;  %v8034_v63 = vld [vmem:[%s8446_s26 + $0x2c4] ss:$48 sps:$4 sm:$0xff]   ;;  %v8037_v0 = vld [vmem:[%s8446_s26 + $0x2cc] ss:$48 sps:$4 sm:$0xff]  }
 0x1fc   : > { %5446 = vmatpush1.bf16.msra.mxu0 %v7954_v1  ;;  %5610 = vmatpush1.bf16.msra.mxu1 %v7957_v2  ;;  %v8032_v1 = vld [vmem:[%s8446_s26 + $0x2c0] ss:$48 sps:$4 sm:$0xff]   ;;  %v8035_v2 = vld [vmem:[%s8446_s26 + $0x2c8] ss:$48 sps:$4 sm:$0xff]  }
 0x1fd   : > { %5447 = vmatprep.subr.bf16.mxu0 %v7962_v4  ;;  %5611 = vmatprep.subr.bf16.mxu1 %v7965_v7  ;;  %v8040_v4 = vld [vmem:[%s8446_s26 + $0x324] ss:$48 sps:$4 sm:$0xff]   ;;  %v8043_v7 = vld [vmem:[%s8446_s26 + $0x32c] ss:$48 sps:$4 sm:$0xff]  }
 0x200   : > { %5448 = vmatpush1.bf16.msra.mxu0 %v7960_v9  ;;  %5612 = vmatpush1.bf16.msra.mxu1 %v7963_v10  ;;  %v8038_v9 = vld [vmem:[%s8446_s26 + $0x320] ss:$48 sps:$4 sm:$0xff]   ;;  %v8041_v10 = vld [vmem:[%s8446_s26 + $0x328] ss:$48 sps:$4 sm:$0xff]  }
 0x201   : > { %5449 = vmatprep.subr.bf16.mxu0 %v7968_v11  ;;  %5613 = vmatprep.subr.bf16.mxu1 %v7971_v12  ;;  %v8046_v11 = vld [vmem:[%s8446_s26 + $0x384] ss:$48 sps:$4 sm:$0xff]   ;;  %v8049_v12 = vld [vmem:[%s8446_s26 + $0x38c] ss:$48 sps:$4 sm:$0xff]  }
 0x204   : > { %5450 = vmatpush1.bf16.msra.mxu0 %v7966_v13  ;;  %5614 = vmatpush1.bf16.msra.mxu1 %v7969_v14  ;;  %v8044_v13 = vld [vmem:[%s8446_s26 + $0x380] ss:$48 sps:$4 sm:$0xff]   ;;  %v8047_v14 = vld [vmem:[%s8446_s26 + $0x388] ss:$48 sps:$4 sm:$0xff]  }
 0x205   : > { %5451 = vmatprep.subr.bf16.mxu0 %v7974_v15  ;;  %5615 = vmatprep.subr.bf16.mxu1 %v7977_v17  ;;  %v8052_v15 = vld [vmem:[%s8446_s26 + $0x3e4] ss:$48 sps:$4 sm:$0xff]   ;;  %v8055_v17 = vld [vmem:[%s8446_s26 + $0x3ec] ss:$48 sps:$4 sm:$0xff]  }
 0x208   : > { %5452 = vmatpush1.bf16.msra.mxu0 %v7972_v18  ;;  %5616 = vmatpush1.bf16.msra.mxu1 %v7975_v20  ;;  %v8050_v18 = vld [vmem:[%s8446_s26 + $0x3e0] ss:$48 sps:$4 sm:$0xff]   ;;  %v8053_v20 = vld [vmem:[%s8446_s26 + $0x3e8] ss:$48 sps:$4 sm:$0xff]  }
 0x209   : > { %5453 = vmatprep.subr.bf16.mxu0 %v7980_v8  ;;  %5617 = vmatprep.subr.bf16.mxu1 %v7983_v23  ;;  %v8058_v8 = vld [vmem:[%s8446_s26 + $0x444] ss:$48 sps:$4 sm:$0xff]   ;;  %v8061_v23 = vld [vmem:[%s8446_s26 + $0x44c] ss:$48 sps:$4 sm:$0xff]  }
 0x20c   : > { %5454 = vmatpush1.bf16.msra.mxu0 %v7978_v5  ;;  %5618 = vmatpush1.bf16.msra.mxu1 %v7981_v24  ;;  %v8056_v5 = vld [vmem:[%s8446_s26 + $0x440] ss:$48 sps:$4 sm:$0xff]   ;;  %v8059_v24 = vld [vmem:[%s8446_s26 + $0x448] ss:$48 sps:$4 sm:$0xff]  }
 0x20d   : > { %5455 = vmatprep.subr.bf16.mxu0 %v7986_v25  ;;  %5619 = vmatprep.subr.bf16.mxu1 %v7989_v26  ;;  %v8064_v25 = vld [vmem:[%s8446_s26 + $0x4a4] ss:$48 sps:$4 sm:$0xff]   ;;  %v8067_v26 = vld [vmem:[%s8446_s26 + $0x4ac] ss:$48 sps:$4 sm:$0xff]  }
 0x210   : > { %5456 = vmatpush1.bf16.msra.mxu0 %v7984_v27  ;;  %5620 = vmatpush1.bf16.msra.mxu1 %v7987_v29  ;;  %v8062_v27 = vld [vmem:[%s8446_s26 + $0x4a0] ss:$48 sps:$4 sm:$0xff]   ;;  %v8065_v29 = vld [vmem:[%s8446_s26 + $0x4a8] ss:$48 sps:$4 sm:$0xff]  }
 0x211   : > { %5630 = vmatprep.subr.bf16.mxu0 %v7992_v30  ;;  %5794 = vmatprep.subr.bf16.mxu1 %v7995_v32  ;;  %v8070_v30 = vld [vmem:[%s8446_s26 + $0x504] ss:$48 sps:$4 sm:$0xff]   ;;  %v8073_v32 = vld [vmem:[%s8446_s26 + $0x50c] ss:$48 sps:$4 sm:$0xff]  }
 0x213   : > { %5458 = vmatmul.mubr.bf16.vlgmr.msra.gmra.mrb[4].mxu0 %v8761_v44  ;;  %5622 = vmatmul.mubr.bf16.vlgmr.msra.gmra.mrb[4].mxu1 %v8761_v44 }
 0x214   : > { %5631 = vmatpush1.bf16.msra.mxu0 %v7990_v33  ;;  %5795 = vmatpush1.bf16.msra.mxu1 %v7993_v34  ;;  %v8068_v33 = vld [vmem:[%s8446_s26 + $0x500] ss:$48 sps:$4 sm:$0xff]   ;;  %v8071_v34 = vld [vmem:[%s8446_s26 + $0x508] ss:$48 sps:$4 sm:$0xff]  }
 0x215   : > { %5632 = vmatprep.subr.bf16.mxu0 %v7998_v35  ;;  %5796 = vmatprep.subr.bf16.mxu1 %v8001_v36  ;;  %v8076_v35 = vld [vmem:[%s8446_s26 + $0x564] ss:$48 sps:$4 sm:$0xff]   ;;  %v8079_v36 = vld [vmem:[%s8446_s26 + $0x56c] ss:$48 sps:$4 sm:$0xff]  }
 0x216   : > { %5662 = vmatprep.mubr.bf16.mxu0 %v8462_v16  ;;  %5826 = vmatprep.mubr.bf16.mxu1 %v8462_v16  ;;  %v8016_v16 = vld [vmem:[%s8446_s26 + $0x1a4] ss:$48 sps:$4 sm:$0xff]  }
 0x218   : > { %5633 = vmatpush1.bf16.msra.mxu0 %v7996_v37  ;;  %5797 = vmatpush1.bf16.msra.mxu1 %v7999_v39  ;;  %v8074_v37 = vld [vmem:[%s8446_s26 + $0x560] ss:$48 sps:$4 sm:$0xff]   ;;  %v8077_v39 = vld [vmem:[%s8446_s26 + $0x568] ss:$48 sps:$4 sm:$0xff]  }
 0x219   : > { %5634 = vmatprep.subr.bf16.mxu0 %v8004_v40  ;;  %5798 = vmatprep.subr.bf16.mxu1 %v8007_v45  ;;  %v8082_v40 = vld [vmem:[%s8446_s26 + $0x5c4] ss:$48 sps:$4 sm:$0xff]   ;;  %v8085_v45 = vld [vmem:[%s8446_s26 + $0x5cc] ss:$48 sps:$4 sm:$0xff]  }
 0x21c   : > { %5635 = vmatpush1.bf16.msra.mxu0 %v8002_v46  ;;  %5799 = vmatpush1.bf16.msra.mxu1 %v8005_v47  ;;  %v8080_v46 = vld [vmem:[%s8446_s26 + $0x5c0] ss:$48 sps:$4 sm:$0xff]   ;;  %v8083_v47 = vld [vmem:[%s8446_s26 + $0x5c8] ss:$48 sps:$4 sm:$0xff]  }
 0x21d   : > { %5636 = vmatprep.subr.bf16.mxu0 %v8010_v48  ;;  %5800 = vmatprep.subr.bf16.mxu1 %v8013_v49  ;;  %v8088_v48 = vld [vmem:[%s8446_s26 + $0x624] ss:$48 sps:$4 sm:$0xff]   ;;  %v8091_v49 = vld [vmem:[%s8446_s26 + $0x62c] ss:$48 sps:$4 sm:$0xff]  }
 0x220   : > { %5637 = vmatpush1.bf16.msra.mxu0 %v8008_v50  ;;  %5801 = vmatpush1.bf16.msra.mxu1 %v8011_v51  ;;  %v8086_v50 = vld [vmem:[%s8446_s26 + $0x620] ss:$48 sps:$4 sm:$0xff]   ;;  %v8089_v51 = vld [vmem:[%s8446_s26 + $0x628] ss:$48 sps:$4 sm:$0xff]  }
 0x221   : > { %5638 = vmatprep.subr.bf16.mxu0 %v8016_v16  ;;  %5802 = vmatprep.subr.bf16.mxu1 %v8019_v52  ;;  %v8094_v16 = vld [vmem:[%s8446_s26 + $0x684] ss:$48 sps:$4 sm:$0xff]   ;;  %v8097_v52 = vld [vmem:[%s8446_s26 + $0x68c] ss:$48 sps:$4 sm:$0xff]  }
 0x224   : > { %5639 = vmatpush1.bf16.msra.mxu0 %v8014_v53  ;;  %5803 = vmatpush1.bf16.msra.mxu1 %v8017_v54  ;;  %v8092_v53 = vld [vmem:[%s8446_s26 + $0x680] ss:$48 sps:$4 sm:$0xff]   ;;  %v8095_v54 = vld [vmem:[%s8446_s26 + $0x688] ss:$48 sps:$4 sm:$0xff]  }
 0x225   : > { %5640 = vmatprep.subr.bf16.mxu0 %v8022_v55  ;;  %5804 = vmatprep.subr.bf16.mxu1 %v8025_v56  ;;  %v8100_v55 = vld [vmem:[%s8446_s26 + $0x6e4] ss:$48 sps:$4 sm:$0xff]   ;;  %v8103_v56 = vld [vmem:[%s8446_s26 + $0x6ec] ss:$48 sps:$4 sm:$0xff]  }
 0x228   : > { %5641 = vmatpush1.bf16.msra.mxu0 %v8020_v57  ;;  %5805 = vmatpush1.bf16.msra.mxu1 %v8023_v58  ;;  %v8101_v57 = vld [vmem:[%s8446_s26 + $0x6e8] ss:$48 sps:$4 sm:$0xff]   ;;  %v8106_v58 = vld [vmem:[%s8446_s26 + $0x744] ss:$48 sps:$4 sm:$0xff]  }
 0x229   : > { %5642 = vmatprep.subr.bf16.mxu0 %v8028_v59  ;;  %5806 = vmatprep.subr.bf16.mxu1 %v8031_v60  ;;  %v8109_v59 = vld [vmem:[%s8446_s26 + $0x74c] ss:$48 sps:$4 sm:$0xff]   ;;  %v8104_v60 = vld [vmem:[%s8446_s26 + $0x740] ss:$48 sps:$4 sm:$0xff]  }
 0x22c   : > { %5643 = vmatpush1.bf16.msra.mxu0 %v8026_v61  ;;  %5807 = vmatpush1.bf16.msra.mxu1 %v8029_v62  ;;  %v8107_v61 = vld [vmem:[%s8446_s26 + $0x748] ss:$48 sps:$4 sm:$0xff]   ;;  %v8115_v62 = vld [vmem:[%s8446_s26 + $0x7ac] ss:$48 sps:$4 sm:$0xff]  }
 0x22d   : > { %5644 = vmatprep.subr.bf16.mxu0 %v8034_v63  ;;  %5808 = vmatprep.subr.bf16.mxu1 %v8037_v0  ;;  %v8110_v63 = vld [vmem:[%s8446_s26 + $0x7a0] ss:$48 sps:$4 sm:$0xff]   ;;  %v8113_v0 = vld [vmem:[%s8446_s26 + $0x7a8] ss:$48 sps:$4 sm:$0xff]  }
 0x230   : > { %5645 = vmatpush1.bf16.msra.mxu0 %v8032_v1  ;;  %5809 = vmatpush1.bf16.msra.mxu1 %v8035_v2  ;;  %v8118_v1 = vld [vmem:[%s8446_s26 + $0x804] ss:$48 sps:$4 sm:$0xff]   ;;  %v8121_v2 = vld [vmem:[%s8446_s26 + $0x80c] ss:$48 sps:$4 sm:$0xff]  }
 0x231   : > { %5646 = vmatprep.subr.bf16.mxu0 %v8040_v4  ;;  %5810 = vmatprep.subr.bf16.mxu1 %v8043_v7  ;;  %v8116_v4 = vld [vmem:[%s8446_s26 + $0x800] ss:$48 sps:$4 sm:$0xff]   ;;  %v8119_v7 = vld [vmem:[%s8446_s26 + $0x808] ss:$48 sps:$4 sm:$0xff]  }
 0x234   : > { %5647 = vmatpush1.bf16.msra.mxu0 %v8038_v9  ;;  %5811 = vmatpush1.bf16.msra.mxu1 %v8041_v10  ;;  %v8124_v9 = vld [vmem:[%s8446_s26 + $0x864] ss:$48 sps:$4 sm:$0xff]   ;;  %v8127_v10 = vld [vmem:[%s8446_s26 + $0x86c] ss:$48 sps:$4 sm:$0xff]  }
 0x235   : > { %5648 = vmatprep.subr.bf16.mxu0 %v8046_v11  ;;  %5812 = vmatprep.subr.bf16.mxu1 %v8049_v12  ;;  %v8122_v11 = vld [vmem:[%s8446_s26 + $0x860] ss:$48 sps:$4 sm:$0xff]   ;;  %v8125_v12 = vld [vmem:[%s8446_s26 + $0x868] ss:$48 sps:$4 sm:$0xff]  }
 0x238   : > { %5649 = vmatpush1.bf16.msra.mxu0 %v8044_v13  ;;  %5813 = vmatpush1.bf16.msra.mxu1 %v8047_v14  ;;  %v8130_v13 = vld [vmem:[%s8446_s26 + $0x8c4] ss:$48 sps:$4 sm:$0xff]   ;;  %v8133_v14 = vld [vmem:[%s8446_s26 + $0x8cc] ss:$48 sps:$4 sm:$0xff]  }
 0x239   : > { %5650 = vmatprep.subr.bf16.mxu0 %v8052_v15  ;;  %5814 = vmatprep.subr.bf16.mxu1 %v8055_v17  ;;  %v8128_v15 = vld [vmem:[%s8446_s26 + $0x8c0] ss:$48 sps:$4 sm:$0xff]   ;;  %v8131_v17 = vld [vmem:[%s8446_s26 + $0x8c8] ss:$48 sps:$4 sm:$0xff]  }
 0x23c   : > { %5651 = vmatpush1.bf16.msra.mxu0 %v8050_v18  ;;  %5815 = vmatpush1.bf16.msra.mxu1 %v8053_v20  ;;  %v8136_v18 = vld [vmem:[%s8446_s26 + $0x924] ss:$48 sps:$4 sm:$0xff]   ;;  %v8139_v20 = vld [vmem:[%s8446_s26 + $0x92c] ss:$48 sps:$4 sm:$0xff]  }
 0x23d   : > { %5652 = vmatprep.subr.bf16.mxu0 %v8058_v8  ;;  %5816 = vmatprep.subr.bf16.mxu1 %v8061_v23  ;;  %v8134_v8 = vld [vmem:[%s8446_s26 + $0x920] ss:$48 sps:$4 sm:$0xff]   ;;  %v8137_v23 = vld [vmem:[%s8446_s26 + $0x928] ss:$48 sps:$4 sm:$0xff]  }
 0x240   : > { %5653 = vmatpush1.bf16.msra.mxu0 %v8056_v5  ;;  %5817 = vmatpush1.bf16.msra.mxu1 %v8059_v24  ;;  %v8142_v5 = vld [vmem:[%s8446_s26 + $0x984] ss:$48 sps:$4 sm:$0xff]   ;;  %v8145_v24 = vld [vmem:[%s8446_s26 + $0x98c] ss:$48 sps:$4 sm:$0xff]  }
 0x241   : > { %5654 = vmatprep.subr.bf16.mxu0 %v8064_v25  ;;  %5818 = vmatprep.subr.bf16.mxu1 %v8067_v26  ;;  %v8140_v25 = vld [vmem:[%s8446_s26 + $0x980] ss:$48 sps:$4 sm:$0xff]   ;;  %v8143_v26 = vld [vmem:[%s8446_s26 + $0x988] ss:$48 sps:$4 sm:$0xff]  }
 0x244   : > { %5655 = vmatpush1.bf16.msra.mxu0 %v8062_v27  ;;  %5819 = vmatpush1.bf16.msra.mxu1 %v8065_v29  ;;  %v8148_v27 = vld [vmem:[%s8446_s26 + $0x9e4] ss:$48 sps:$4 sm:$0xff]   ;;  %v8151_v29 = vld [vmem:[%s8446_s26 + $0x9ec] ss:$48 sps:$4 sm:$0xff]  }
 0x245   : > { %5656 = vmatprep.subr.bf16.mxu0 %v8070_v30  ;;  %5820 = vmatprep.subr.bf16.mxu1 %v8073_v32  ;;  %v8146_v30 = vld [vmem:[%s8446_s26 + $0x9e0] ss:$48 sps:$4 sm:$0xff]   ;;  %v8149_v32 = vld [vmem:[%s8446_s26 + $0x9e8] ss:$48 sps:$4 sm:$0xff]  }
 0x248   : > { %5657 = vmatpush1.bf16.msra.mxu0 %v8068_v33  ;;  %5821 = vmatpush1.bf16.msra.mxu1 %v8071_v34  ;;  %v8154_v33 = vld [vmem:[%s8446_s26 + $0xa44] ss:$48 sps:$4 sm:$0xff]   ;;  %v8157_v34 = vld [vmem:[%s8446_s26 + $0xa4c] ss:$48 sps:$4 sm:$0xff]  }
 0x249   : > { %5658 = vmatprep.subr.bf16.mxu0 %v8076_v35  ;;  %5822 = vmatprep.subr.bf16.mxu1 %v8079_v36  ;;  %v8152_v35 = vld [vmem:[%s8446_s26 + $0xa40] ss:$48 sps:$4 sm:$0xff]   ;;  %v8155_v36 = vld [vmem:[%s8446_s26 + $0xa48] ss:$48 sps:$4 sm:$0xff]  }
 0x24c   : > { %5659 = vmatpush1.bf16.msra.mxu0 %v8074_v37  ;;  %5823 = vmatpush1.bf16.msra.mxu1 %v8077_v39  ;;  %v8160_v37 = vld [vmem:[%s8446_s26 + $0xaa4] ss:$48 sps:$4 sm:$0xff]   ;;  %v8163_v39 = vld [vmem:[%s8446_s26 + $0xaac] ss:$48 sps:$4 sm:$0xff]  }
 0x24d   : > { %5660 = vmatprep.subr.bf16.mxu0 %v8082_v40  ;;  %5824 = vmatprep.subr.bf16.mxu1 %v8085_v45  ;;  %v8158_v40 = vld [vmem:[%s8446_s26 + $0xaa0] ss:$48 sps:$4 sm:$0xff]   ;;  %v8161_v45 = vld [vmem:[%s8446_s26 + $0xaa8] ss:$48 sps:$4 sm:$0xff]  }
 0x250   : > { %5661 = vmatpush1.bf16.msra.mxu0 %v8080_v46  ;;  %5825 = vmatpush1.bf16.msra.mxu1 %v8083_v47  ;;  %v8166_v46 = vld [vmem:[%s8446_s26 + $0xb04] ss:$48 sps:$4 sm:$0xff]   ;;  %v8169_v47 = vld [vmem:[%s8446_s26 + $0xb0c] ss:$48 sps:$4 sm:$0xff]  }
 0x251   : > { %5671 = vmatprep.subr.bf16.mxu0 %v8088_v48  ;;  %5835 = vmatprep.subr.bf16.mxu1 %v8091_v49  ;;  %v8164_v48 = vld [vmem:[%s8446_s26 + $0xb00] ss:$48 sps:$4 sm:$0xff]   ;;  %v8167_v49 = vld [vmem:[%s8446_s26 + $0xb08] ss:$48 sps:$4 sm:$0xff]  }
 0x253   : > { %5663 = vmatmul.mubr.bf16.vlgmr.msra.gmra.mrb[8].mxu0 %v8529_v19  ;;  %5827 = vmatmul.mubr.bf16.vlgmr.msra.gmra.mrb[8].mxu1 %v8529_v19  ;;  %v8098_v19 = vld [vmem:[%s8446_s26 + $0x6e0] ss:$48 sps:$4 sm:$0xff]  }
 0x254   : > { %5672 = vmatpush1.bf16.msra.mxu0 %v8086_v50  ;;  %5836 = vmatpush1.bf16.msra.mxu1 %v8089_v51  ;;  %v8172_v50 = vld [vmem:[%s8446_s26 + $0xb64] ss:$48 sps:$4 sm:$0xff]   ;;  %v8175_v51 = vld [vmem:[%s8446_s26 + $0xb6c] ss:$48 sps:$4 sm:$0xff]  }
 0x255   : > { %5673 = vmatprep.subr.bf16.mxu0 %v8094_v16  ;;  %5837 = vmatprep.subr.bf16.mxu1 %v8097_v52  ;;  %v8170_v16 = vld [vmem:[%s8446_s26 + $0xb60] ss:$48 sps:$4 sm:$0xff]   ;;  %v8173_v52 = vld [vmem:[%s8446_s26 + $0xb68] ss:$48 sps:$4 sm:$0xff]  }
 0x256   : > { %5703 = vmatprep.mubr.bf16.mxu0 %v8535_v22  ;;  %5867 = vmatprep.mubr.bf16.mxu1 %v8535_v22  ;;  %v8112_v22 = vld [vmem:[%s8446_s26 + $0x7a4] ss:$48 sps:$4 sm:$0xff]  }
 0x258   : > { %5674 = vmatpush1.bf16.msra.mxu0 %v8092_v53  ;;  %5838 = vmatpush1.bf16.msra.mxu1 %v8095_v54  ;;  %v8178_v53 = vld [vmem:[%s8446_s26 + $0xbc4] ss:$48 sps:$4 sm:$0xff]   ;;  %v8181_v54 = vld [vmem:[%s8446_s26 + $0xbcc] ss:$48 sps:$4 sm:$0xff]  }
 0x259   : > { %5675 = vmatprep.subr.bf16.mxu0 %v8100_v55  ;;  %5839 = vmatprep.subr.bf16.mxu1 %v8103_v56  ;;  %v8176_v55 = vld [vmem:[%s8446_s26 + $0xbc0] ss:$48 sps:$4 sm:$0xff]   ;;  %v8179_v56 = vld [vmem:[%s8446_s26 + $0xbc8] ss:$48 sps:$4 sm:$0xff]  }
 0x25c   : > { %5676 = vmatpush1.bf16.msra.mxu0 %v8098_v19  ;;  %5840 = vmatpush1.bf16.msra.mxu1 %v8101_v57  ;;  %v8184_v19 = vld [vmem:[%s8446_s26 + $0xc24] ss:$48 sps:$4 sm:$0xff]   ;;  %v8187_v57 = vld [vmem:[%s8446_s26 + $0xc2c] ss:$48 sps:$4 sm:$0xff]  }
 0x25d   : > { %5677 = vmatprep.subr.bf16.mxu0 %v8106_v58  ;;  %5841 = vmatprep.subr.bf16.mxu1 %v8109_v59  ;;  %v8182_v58 = vld [vmem:[%s8446_s26 + $0xc20] ss:$48 sps:$4 sm:$0xff]   ;;  %v8185_v59 = vld [vmem:[%s8446_s26 + $0xc28] ss:$48 sps:$4 sm:$0xff]  }
 0x260   : > { %5678 = vmatpush1.bf16.msra.mxu0 %v8104_v60  ;;  %5842 = vmatpush1.bf16.msra.mxu1 %v8107_v61  ;;  %v8190_v60 = vld [vmem:[%s8446_s26 + $0xc84] ss:$48 sps:$4 sm:$0xff]   ;;  %v8193_v61 = vld [vmem:[%s8446_s26 + $0xc8c] ss:$48 sps:$4 sm:$0xff]  }
 0x261   : > { %5679 = vmatprep.subr.bf16.mxu0 %v8112_v22  ;;  %5843 = vmatprep.subr.bf16.mxu1 %v8115_v62  ;;  %v8188_v22 = vld [vmem:[%s8446_s26 + $0xc80] ss:$48 sps:$4 sm:$0xff]   ;;  %v8191_v62 = vld [vmem:[%s8446_s26 + $0xc88] ss:$48 sps:$4 sm:$0xff]  }
 0x264   : > { %5680 = vmatpush1.bf16.msra.mxu0 %v8110_v63  ;;  %5844 = vmatpush1.bf16.msra.mxu1 %v8113_v0  ;;  %v8196_v63 = vld [vmem:[%s8446_s26 + $0xce4] ss:$48 sps:$4 sm:$0xff]   ;;  %v8199_v0 = vld [vmem:[%s8446_s26 + $0xcec] ss:$48 sps:$4 sm:$0xff]  }
 0x265   : > { %5681 = vmatprep.subr.bf16.mxu0 %v8118_v1  ;;  %5845 = vmatprep.subr.bf16.mxu1 %v8121_v2  ;;  %v8197_v1 = vld [vmem:[%s8446_s26 + $0xce8] ss:$48 sps:$4 sm:$0xff]   ;;  %v8202_v2 = vld [vmem:[%s8446_s26 + $0xd44] ss:$48 sps:$4 sm:$0xff]  }
 0x268   : > { %5682 = vmatpush1.bf16.msra.mxu0 %v8116_v4  ;;  %5846 = vmatpush1.bf16.msra.mxu1 %v8119_v7  ;;  %v8205_v4 = vld [vmem:[%s8446_s26 + $0xd4c] ss:$48 sps:$4 sm:$0xff]   ;;  %v8200_v7 = vld [vmem:[%s8446_s26 + $0xd40] ss:$48 sps:$4 sm:$0xff]  }
 0x269   : > { %5683 = vmatprep.subr.bf16.mxu0 %v8124_v9  ;;  %5847 = vmatprep.subr.bf16.mxu1 %v8127_v10  ;;  %v8203_v9 = vld [vmem:[%s8446_s26 + $0xd48] ss:$48 sps:$4 sm:$0xff]   ;;  %v8211_v10 = vld [vmem:[%s8446_s26 + $0xdac] ss:$48 sps:$4 sm:$0xff]  }
 0x26c   : > { %5684 = vmatpush1.bf16.msra.mxu0 %v8122_v11  ;;  %5848 = vmatpush1.bf16.msra.mxu1 %v8125_v12  ;;  %v8206_v11 = vld [vmem:[%s8446_s26 + $0xda0] ss:$48 sps:$4 sm:$0xff]   ;;  %v8209_v12 = vld [vmem:[%s8446_s26 + $0xda8] ss:$48 sps:$4 sm:$0xff]  }
 0x26d   : > { %5685 = vmatprep.subr.bf16.mxu0 %v8130_v13  ;;  %5849 = vmatprep.subr.bf16.mxu1 %v8133_v14  ;;  %v8214_v13 = vld [vmem:[%s8446_s26 + $0xe04] ss:$48 sps:$4 sm:$0xff]   ;;  %v8217_v14 = vld [vmem:[%s8446_s26 + $0xe0c] ss:$48 sps:$4 sm:$0xff]  }
 0x270   : > { %5686 = vmatpush1.bf16.msra.mxu0 %v8128_v15  ;;  %5850 = vmatpush1.bf16.msra.mxu1 %v8131_v17  ;;  %v8212_v15 = vld [vmem:[%s8446_s26 + $0xe00] ss:$48 sps:$4 sm:$0xff]   ;;  %v8215_v17 = vld [vmem:[%s8446_s26 + $0xe08] ss:$48 sps:$4 sm:$0xff]  }
 0x271   : > { %5687 = vmatprep.subr.bf16.mxu0 %v8136_v18  ;;  %5851 = vmatprep.subr.bf16.mxu1 %v8139_v20  ;;  %v8220_v18 = vld [vmem:[%s8446_s26 + $0xe64] ss:$48 sps:$4 sm:$0xff]   ;;  %v8223_v20 = vld [vmem:[%s8446_s26 + $0xe6c] ss:$48 sps:$4 sm:$0xff]  }
 0x274   : > { %5688 = vmatpush1.bf16.msra.mxu0 %v8134_v8  ;;  %5852 = vmatpush1.bf16.msra.mxu1 %v8137_v23  ;;  %v8218_v8 = vld [vmem:[%s8446_s26 + $0xe60] ss:$48 sps:$4 sm:$0xff]   ;;  %v8221_v23 = vld [vmem:[%s8446_s26 + $0xe68] ss:$48 sps:$4 sm:$0xff]  }
 0x275   : > { %5689 = vmatprep.subr.bf16.mxu0 %v8142_v5  ;;  %5853 = vmatprep.subr.bf16.mxu1 %v8145_v24  ;;  %v8226_v5 = vld [vmem:[%s8446_s26 + $0xec4] ss:$48 sps:$4 sm:$0xff]   ;;  %v8229_v24 = vld [vmem:[%s8446_s26 + $0xecc] ss:$48 sps:$4 sm:$0xff]  }
 0x278   : > { %5690 = vmatpush1.bf16.msra.mxu0 %v8140_v25  ;;  %5854 = vmatpush1.bf16.msra.mxu1 %v8143_v26  ;;  %v8224_v25 = vld [vmem:[%s8446_s26 + $0xec0] ss:$48 sps:$4 sm:$0xff]   ;;  %v8227_v26 = vld [vmem:[%s8446_s26 + $0xec8] ss:$48 sps:$4 sm:$0xff]  }
 0x279   : > { %5691 = vmatprep.subr.bf16.mxu0 %v8148_v27  ;;  %5855 = vmatprep.subr.bf16.mxu1 %v8151_v29  ;;  %v8232_v27 = vld [vmem:[%s8446_s26 + $0xf24] ss:$48 sps:$4 sm:$0xff]   ;;  %v8235_v29 = vld [vmem:[%s8446_s26 + $0xf2c] ss:$48 sps:$4 sm:$0xff]  }
 0x27c   : > { %5692 = vmatpush1.bf16.msra.mxu0 %v8146_v30  ;;  %5856 = vmatpush1.bf16.msra.mxu1 %v8149_v32  ;;  %v8230_v30 = vld [vmem:[%s8446_s26 + $0xf20] ss:$48 sps:$4 sm:$0xff]   ;;  %v8233_v32 = vld [vmem:[%s8446_s26 + $0xf28] ss:$48 sps:$4 sm:$0xff]  }
 0x27d   : > { %5693 = vmatprep.subr.bf16.mxu0 %v8154_v33  ;;  %5857 = vmatprep.subr.bf16.mxu1 %v8157_v34  ;;  %v8238_v33 = vld [vmem:[%s8446_s26 + $0xf84] ss:$48 sps:$4 sm:$0xff]   ;;  %v8241_v34 = vld [vmem:[%s8446_s26 + $0xf8c] ss:$48 sps:$4 sm:$0xff]  }
 0x280   : > { %5694 = vmatpush1.bf16.msra.mxu0 %v8152_v35  ;;  %5858 = vmatpush1.bf16.msra.mxu1 %v8155_v36  ;;  %v8236_v35 = vld [vmem:[%s8446_s26 + $0xf80] ss:$48 sps:$4 sm:$0xff]   ;;  %v8239_v36 = vld [vmem:[%s8446_s26 + $0xf88] ss:$48 sps:$4 sm:$0xff]  }
 0x281   : > { %5695 = vmatprep.subr.bf16.mxu0 %v8160_v37  ;;  %5859 = vmatprep.subr.bf16.mxu1 %v8163_v39  ;;  %v8244_v37 = vld [vmem:[%s8446_s26 + $0xfe4] ss:$48 sps:$4 sm:$0xff]   ;;  %v8247_v39 = vld [vmem:[%s8446_s26 + $0xfec] ss:$48 sps:$4 sm:$0xff]  }
 0x284   : > { %5696 = vmatpush1.bf16.msra.mxu0 %v8158_v40  ;;  %5860 = vmatpush1.bf16.msra.mxu1 %v8161_v45  ;;  %v8242_v40 = vld [vmem:[%s8446_s26 + $0xfe0] ss:$48 sps:$4 sm:$0xff]   ;;  %v8245_v45 = vld [vmem:[%s8446_s26 + $0xfe8] ss:$48 sps:$4 sm:$0xff]  }
 0x285   : > { %5697 = vmatprep.subr.bf16.mxu0 %v8166_v46  ;;  %5861 = vmatprep.subr.bf16.mxu1 %v8169_v47  ;;  %v8250_v46 = vld [vmem:[%s8446_s26 + $0x1044] ss:$48 sps:$4 sm:$0xff]   ;;  %v8253_v47 = vld [vmem:[%s8446_s26 + $0x104c] ss:$48 sps:$4 sm:$0xff]  }
 0x288   : > { %5698 = vmatpush1.bf16.msra.mxu0 %v8164_v48  ;;  %5862 = vmatpush1.bf16.msra.mxu1 %v8167_v49  ;;  %v8248_v48 = vld [vmem:[%s8446_s26 + $0x1040] ss:$48 sps:$4 sm:$0xff]   ;;  %v8251_v49 = vld [vmem:[%s8446_s26 + $0x1048] ss:$48 sps:$4 sm:$0xff]  }
 0x289   : > { %5699 = vmatprep.subr.bf16.mxu0 %v8172_v50  ;;  %5863 = vmatprep.subr.bf16.mxu1 %v8175_v51  ;;  %v8256_v50 = vld [vmem:[%s8446_s26 + $0x10a4] ss:$48 sps:$4 sm:$0xff]   ;;  %v8259_v51 = vld [vmem:[%s8446_s26 + $0x10ac] ss:$48 sps:$4 sm:$0xff]  }
 0x28c   : > { %5700 = vmatpush1.bf16.msra.mxu0 %v8170_v16  ;;  %5864 = vmatpush1.bf16.msra.mxu1 %v8173_v52  ;;  %v8254_v16 = vld [vmem:[%s8446_s26 + $0x10a0] ss:$48 sps:$4 sm:$0xff]   ;;  %v8257_v52 = vld [vmem:[%s8446_s26 + $0x10a8] ss:$48 sps:$4 sm:$0xff]  }
 0x28d   : > { %5701 = vmatprep.subr.bf16.mxu0 %v8178_v53  ;;  %5865 = vmatprep.subr.bf16.mxu1 %v8181_v54  ;;  %v8262_v53 = vld [vmem:[%s8446_s26 + $0x1104] ss:$48 sps:$4 sm:$0xff]   ;;  %v8265_v54 = vld [vmem:[%s8446_s26 + $0x110c] ss:$48 sps:$4 sm:$0xff]  }
 0x290   : > { %5702 = vmatpush1.bf16.msra.mxu0 %v8176_v55  ;;  %5866 = vmatpush1.bf16.msra.mxu1 %v8179_v56  ;;  %v8260_v55 = vld [vmem:[%s8446_s26 + $0x1100] ss:$48 sps:$4 sm:$0xff]   ;;  %v8263_v56 = vld [vmem:[%s8446_s26 + $0x1108] ss:$48 sps:$4 sm:$0xff]  }
 0x291   : > { %5712 = vmatprep.subr.bf16.mxu0 %v8184_v19  ;;  %5876 = vmatprep.subr.bf16.mxu1 %v8187_v57  ;;  %v8268_v19 = vld [vmem:[%s8446_s26 + $0x1164] ss:$48 sps:$4 sm:$0xff]   ;;  %v8271_v57 = vld [vmem:[%s8446_s26 + $0x116c] ss:$48 sps:$4 sm:$0xff]  }
 0x293   : > { %5704 = vmatmul.mubr.bf16.vlgmr.msra.gmra.mrb[8].mxu0 %v8612_v28  ;;  %5868 = vmatmul.mubr.bf16.vlgmr.msra.gmra.mrb[8].mxu1 %v8612_v28  ;;  %v8194_v28 = vld [vmem:[%s8446_s26 + $0xce0] ss:$48 sps:$4 sm:$0xff]  }
 0x294   : > { %5713 = vmatpush1.bf16.msra.mxu0 %v8182_v58  ;;  %5877 = vmatpush1.bf16.msra.mxu1 %v8185_v59  ;;  %v8266_v58 = vld [vmem:[%s8446_s26 + $0x1160] ss:$48 sps:$4 sm:$0xff]   ;;  %v8269_v59 = vld [vmem:[%s8446_s26 + $0x1168] ss:$48 sps:$4 sm:$0xff]  }
 0x295   : > { %5714 = vmatprep.subr.bf16.mxu0 %v8190_v60  ;;  %5878 = vmatprep.subr.bf16.mxu1 %v8193_v61  ;;  %v8274_v60 = vld [vmem:[%s8446_s26 + $0x11c4] ss:$48 sps:$4 sm:$0xff]   ;;  %v8277_v61 = vld [vmem:[%s8446_s26 + $0x11cc] ss:$48 sps:$4 sm:$0xff]  }
 0x296   : > { %5744 = vmatprep.mubr.bf16.mxu0 %v8617_v31  ;;  %5908 = vmatprep.mubr.bf16.mxu1 %v8617_v31  ;;  %v8208_v31 = vld [vmem:[%s8446_s26 + $0xda4] ss:$48 sps:$4 sm:$0xff]  }
 0x298   : > { %5715 = vmatpush1.bf16.msra.mxu0 %v8188_v22  ;;  %5879 = vmatpush1.bf16.msra.mxu1 %v8191_v62  ;;  %v8272_v22 = vld [vmem:[%s8446_s26 + $0x11c0] ss:$48 sps:$4 sm:$0xff]   ;;  %v8275_v62 = vld [vmem:[%s8446_s26 + $0x11c8] ss:$48 sps:$4 sm:$0xff]  }
 0x299   : > { %5716 = vmatprep.subr.bf16.mxu0 %v8196_v63  ;;  %5880 = vmatprep.subr.bf16.mxu1 %v8199_v0  ;;  %v8280_v63 = vld [vmem:[%s8446_s26 + $0x1224] ss:$48 sps:$4 sm:$0xff]   ;;  %v8283_v0 = vld [vmem:[%s8446_s26 + $0x122c] ss:$48 sps:$4 sm:$0xff]  }
 0x29c   : > { %5717 = vmatpush1.bf16.msra.mxu0 %v8194_v28  ;;  %5881 = vmatpush1.bf16.msra.mxu1 %v8197_v1  ;;  %v8278_v28 = vld [vmem:[%s8446_s26 + $0x1220] ss:$48 sps:$4 sm:$0xff]   ;;  %v8281_v1 = vld [vmem:[%s8446_s26 + $0x1228] ss:$48 sps:$4 sm:$0xff]  }
 0x29d   : > { %5718 = vmatprep.subr.bf16.mxu0 %v8202_v2  ;;  %5882 = vmatprep.subr.bf16.mxu1 %v8205_v4  ;;  %v9256_v2 = vsub.s32 0, %v8432_v3  ;;  %v9259_v4 = vsub.s32 1, %v8432_v3 }
 0x2a0   : > { %5719 = vmatpush1.bf16.msra.mxu0 %v8200_v7  ;;  %5883 = vmatpush1.bf16.msra.mxu1 %v8203_v9  ;;  %v8286_v7 = vld [vmem:[%s8446_s26 + $0x1284] ss:$48 sps:$4 sm:$0xff]   ;;  %v8289_v9 = vld [vmem:[%s8446_s26 + $0x128c] ss:$48 sps:$4 sm:$0xff]  }
 0x2a1   : > { %5720 = vmatprep.subr.bf16.mxu0 %v8208_v31  ;;  %5884 = vmatprep.subr.bf16.mxu1 %v8211_v10  ;;  %v9264_v31 = vld [vmem:[%s9251_s30] sm:$0xff] }
 0x2a2   : > { %v8284_v10 = vld [vmem:[%s8446_s26 + $0x1280] ss:$48 sps:$4 sm:$0xff]  }
 0x2a4   : > { %5721 = vmatpush1.bf16.msra.mxu0 %v8206_v11  ;;  %5885 = vmatpush1.bf16.msra.mxu1 %v8209_v12  ;;  %v8287_v11 = vld [vmem:[%s8446_s26 + $0x1288] ss:$48 sps:$4 sm:$0xff]   ;;  %v1019_v12 = vrot.slane %v9264_v31, %v9256_v2 }
 0x2a5   : > { %5722 = vmatprep.subr.bf16.mxu0 %v8214_v13  ;;  %5886 = vmatprep.subr.bf16.mxu1 %v8217_v14  ;;  %v1023_v13 = vrot.slane %v9264_v31, %v9259_v4  ;;  %v8292_v14 = vld [vmem:[%s8446_s26 + $0x12e4] ss:$48 sps:$4 sm:$0xff]  }
 0x2a8   : > { %5723 = vmatpush1.bf16.msra.mxu0 %v8212_v15  ;;  %5887 = vmatpush1.bf16.msra.mxu1 %v8215_v17  ;;  %v8295_v15 = vld [vmem:[%s8446_s26 + $0x12ec] ss:$48 sps:$4 sm:$0xff]   ;;  %v8290_v17 = vld [vmem:[%s8446_s26 + $0x12e0] ss:$48 sps:$4 sm:$0xff]  }
 0x2a9   : > { %5724 = vmatprep.subr.bf16.mxu0 %v8220_v18  ;;  %5888 = vmatprep.subr.bf16.mxu1 %v8223_v20  ;;  %v8293_v18 = vld [vmem:[%s8446_s26 + $0x12e8] ss:$48 sps:$4 sm:$0xff]   ;;  %v9284_v20 = vadd.f32 %v8995_v6, %v1019_v12  ;;  %v8296_v6 = vld [vmem:[%s8446_s26 + $0x1340] ss:$48 sps:$4 sm:$0xff]   ;;  %v8328_v12 = vld [vmem:[%s8446_s26 + $0x1524] ss:$48 sps:$4 sm:$0xff]  }
 0x2ac   : > { %5725 = vmatpush1.bf16.msra.mxu0 %v8218_v8  ;;  %5889 = vmatpush1.bf16.msra.mxu1 %v8221_v23  ;;  %v9287_v8 = vadd.f32 %v8999_v42, %v1023_v13  ;;  %v8301_v23 = vld [vmem:[%s8446_s26 + $0x134c] ss:$48 sps:$4 sm:$0xff]   ;;  %v8299_v42 = vld [vmem:[%s8446_s26 + $0x1348] ss:$48 sps:$4 sm:$0xff]  }
 0x2ad   : > { %5726 = vmatprep.subr.bf16.mxu0 %v8226_v5  ;;  %5890 = vmatprep.subr.bf16.mxu1 %v8229_v24  ;;  %v9294_v24 = vsub.s32 3, %v8432_v3  ;;  %v8331_v13 = vld [vmem:[%s8446_s26 + $0x152c] ss:$48 sps:$4 sm:$0xff]  }
 0x2b0   : > { %5727 = vmatpush1.bf16.msra.mxu0 %v8224_v25  ;;  %5891 = vmatpush1.bf16.msra.mxu1 %v8227_v26  ;;  %v5959_v25 = vsel %vm5958_vm0, %v9284_v20, 0.0  ;;  %v5960_v26 = vsel %vm5958_vm0, %v9287_v8, 0.0 }
 0x2b1   : > { %5728 = vmatprep.subr.bf16.mxu0 %v8232_v27  ;;  %5892 = vmatprep.subr.bf16.mxu1 %v8235_v29  ;;  %v8304_v27 = vld [vmem:[%s8446_s26 + $0x13a4] ss:$48 sps:$4 sm:$0xff]   ;;  %v8307_v29 = vld [vmem:[%s8446_s26 + $0x13ac] ss:$48 sps:$4 sm:$0xff]  }
 0x2b4   : > { %5729 = vmatpush1.bf16.msra.mxu0 %v8230_v30  ;;  %5893 = vmatpush1.bf16.msra.mxu1 %v8233_v32  ;;  %v1031_v32 = vrot.slane %v9264_v31, %v9294_v24 }
 0x2b5   : > { %5730 = vmatprep.subr.bf16.mxu0 %v8238_v33  ;;  %5894 = vmatprep.subr.bf16.mxu1 %v8241_v34  ;;  %v9310_v33 = vsub.s32 4, %v8432_v3  ;;  %v5961_v34 = vadd.f32 %v5960_v26, %v5959_v25  ;;  %v8341_v25 = vld [vmem:[%s8446_s26 + $0x15e8] ss:$48 sps:$4 sm:$0xff]   ;;  %v8346_v26 = vld [vmem:[%s8446_s26 + $0x1644] ss:$48 sps:$4 sm:$0xff]  }
 0x2b8   : > { %5731 = vmatpush1.bf16.msra.mxu0 %v8236_v35  ;;  %5895 = vmatpush1.bf16.msra.mxu1 %v8239_v36  ;;  %v8302_v35 = vld [vmem:[%s8446_s26 + $0x13a0] ss:$48 sps:$4 sm:$0xff]   ;;  %v8305_v36 = vld [vmem:[%s8446_s26 + $0x13a8] ss:$48 sps:$4 sm:$0xff]  }
 0x2b9   : > { %5732 = vmatprep.subr.bf16.mxu0 %v8244_v37  ;;  %5896 = vmatprep.subr.bf16.mxu1 %v8247_v39  ;;  %v9315_v37 = vsub.s32 5, %v8432_v3  ;;  %v8313_v39 = vld [vmem:[%s8446_s26 + $0x140c] ss:$48 sps:$4 sm:$0xff]  }
 0x2bc   : > { %5733 = vmatpush1.bf16.msra.mxu0 %v8242_v40  ;;  %5897 = vmatpush1.bf16.msra.mxu1 %v8245_v45  ;;  %v9322_v45 = vadd.f32 %v9001_v43, %v1031_v32  ;;  %v8347_v32 = vld [vmem:[%s8446_s26 + $0x1648] ss:$48 sps:$4 sm:$0xff]  }
 0x2bd   : > { %5734 = vmatprep.subr.bf16.mxu0 %v8250_v46  ;;  %5898 = vmatprep.subr.bf16.mxu1 %v8253_v47  ;;  %v1035_v46 = vrot.slane %v9264_v31, %v9310_v33 }
 0x2c0   : > { %5735 = vmatpush1.bf16.msra.mxu0 %v8248_v48  ;;  %5899 = vmatpush1.bf16.msra.mxu1 %v8251_v49  ;;  %v1039_v48 = vrot.slane %v9264_v31, %v9315_v37  ;;  %v8308_v49 = vld [vmem:[%s8446_s26 + $0x1400] ss:$48 sps:$4 sm:$0xff]  }
 0x2c1   : > { %5736 = vmatprep.subr.bf16.mxu0 %v8256_v50  ;;  %5900 = vmatprep.subr.bf16.mxu1 %v8259_v51  ;;  %v8311_v50 = vld [vmem:[%s8446_s26 + $0x1408] ss:$48 sps:$4 sm:$0xff]   ;;  %v8316_v51 = vld [vmem:[%s8446_s26 + $0x1464] ss:$48 sps:$4 sm:$0xff]  }
 0x2c4   : > { %5737 = vmatpush1.bf16.msra.mxu0 %v8254_v16  ;;  %5901 = vmatpush1.bf16.msra.mxu1 %v8257_v52  ;;  %v8319_v16 = vld [vmem:[%s8446_s26 + $0x146c] ss:$48 sps:$4 sm:$0xff]  }
 0x2c5   : > { %5738 = vmatprep.subr.bf16.mxu0 %v8262_v53  ;;  %5902 = vmatprep.subr.bf16.mxu1 %v8265_v54  ;;  %v5964_v53 = vsel %vm5958_vm0, %v9322_v45, 0.0 }
 0x2c8   : > { %5739 = vmatpush1.bf16.msra.mxu0 %v8260_v55  ;;  %5903 = vmatpush1.bf16.msra.mxu1 %v8263_v56 }
 0x2c9   : > { %5740 = vmatprep.subr.bf16.mxu0 %v8268_v19  ;;  %5904 = vmatprep.subr.bf16.mxu1 %v8271_v57  ;;  %v8314_v19 = vld [vmem:[%s8446_s26 + $0x1460] ss:$48 sps:$4 sm:$0xff]  }
 0x2cc   : > { %5741 = vmatpush1.bf16.msra.mxu0 %v8266_v58  ;;  %5905 = vmatpush1.bf16.msra.mxu1 %v8269_v59 }
 0x2cd   : > { %5742 = vmatprep.subr.bf16.mxu0 %v8274_v60  ;;  %5906 = vmatprep.subr.bf16.mxu1 %v8277_v61  ;;  %v8317_v61 = vld [vmem:[%s8446_s26 + $0x1468] ss:$48 sps:$4 sm:$0xff]  }
 0x2d0   : > { %5743 = vmatpush1.bf16.msra.mxu0 %v8272_v22  ;;  %5907 = vmatpush1.bf16.msra.mxu1 %v8275_v62  ;;  %v8322_v22 = vld [vmem:[%s8446_s26 + $0x14c4] ss:$48 sps:$4 sm:$0xff]  }
 0x2d1   : > { %5753 = vmatprep.subr.bf16.mxu0 %v8280_v63  ;;  %5917 = vmatprep.subr.bf16.mxu1 %v8283_v0 }
 0x2d3   : > { %5745 = vmatmul.mubr.bf16.vlgmr.msra.gmra.mrb[8].mxu0 %v8687_v38  ;;  %5909 = vmatmul.mubr.bf16.vlgmr.msra.gmra.mrb[8].mxu1 %v8687_v38  ;;  %v9279_v38 = vsub.s32 2, %v8432_v3 }
 0x2d4   : > { %5754 = vmatpush1.bf16.msra.mxu0 %v8278_v28  ;;  %5918 = vmatpush1.bf16.msra.mxu1 %v8281_v1  ;;  %v8325_v28 = vld [vmem:[%s8446_s26 + $0x14cc] ss:$48 sps:$4 sm:$0xff]  }
 0x2d5   : > { %5755 = vmatprep.subr.bf16.mxu0 %v8286_v7  ;;  %5919 = vmatprep.subr.bf16.mxu1 %v8289_v9  ;;  %v1027_v5 = vrot.slane %v9264_v31, %v9279_v38 }
 0x2d6   : > { %5785 = vmatprep.mubr.bf16.mxu0 %v8693_v41  ;;  %5949 = vmatprep.mubr.bf16.mxu1 %v8693_v41  ;;  %v8298_v41 = vld [vmem:[%s8446_s26 + $0x1344] ss:$48 sps:$4 sm:$0xff]  }
 0x2d7   : > { %v9305_v30 = vadd.f32 %v8997_v21, %v1027_v5  ;;  %v8310_v21 = vld [vmem:[%s8446_s26 + $0x1404] ss:$48 sps:$4 sm:$0xff]  }
 0x2d8   : > { %5756 = vmatpush1.bf16.msra.mxu0 %v8284_v10  ;;  %5920 = vmatpush1.bf16.msra.mxu1 %v8287_v11  ;;  %v8320_v10 = vld [vmem:[%s8446_s26 + $0x14c0] ss:$48 sps:$4 sm:$0xff]   ;;  %v8323_v11 = vld [vmem:[%s8446_s26 + $0x14c8] ss:$48 sps:$4 sm:$0xff]   ;;  %v8340_v5 = vld [vmem:[%s8446_s26 + $0x15e4] ss:$48 sps:$4 sm:$0xff]  }
 0x2d9   : > { %5757 = vmatprep.subr.bf16.mxu0 %v8292_v14  ;;  %5921 = vmatprep.subr.bf16.mxu1 %v8295_v15  ;;  %v5962_v40 = vsel %vm5958_vm0, %v9305_v30, 0.0  ;;  %v8326_v14 = vld [vmem:[%s8446_s26 + $0x1520] ss:$48 sps:$4 sm:$0xff]   ;;  %v8329_v15 = vld [vmem:[%s8446_s26 + $0x1528] ss:$48 sps:$4 sm:$0xff]  }
 0x2da   : > { %v5963_v47 = vadd.f32 %v5962_v40, %v5961_v34  ;;  %v8352_v34 = vld [vmem:[%s8446_s26 + $0x16a4] ss:$48 sps:$4 sm:$0xff]   ;;  %v8361_v40 = vld [vmem:[%s8446_s26 + $0x170c] ss:$48 sps:$4 sm:$0xff]  }
 0x2dc   : > { %5758 = vmatpush1.bf16.msra.mxu0 %v8290_v17  ;;  %5922 = vmatpush1.bf16.msra.mxu1 %v8293_v18  ;;  %v5965_v57 = vadd.f32 %v5964_v53, %v5963_v47  ;;  %v8334_v17 = vld [vmem:[%s8446_s26 + $0x1584] ss:$48 sps:$4 sm:$0xff]   ;;  %v8337_v18 = vld [vmem:[%s8446_s26 + $0x158c] ss:$48 sps:$4 sm:$0xff]   ;;  %v8359_v47 = vld [vmem:[%s8446_s26 + $0x1708] ss:$48 sps:$4 sm:$0xff]  }
 0x2dd   : > { %5759 = vmatprep.subr.bf16.mxu0 %v8298_v41  ;;  %5923 = vmatprep.subr.bf16.mxu1 %v8301_v23  ;;  %v8332_v41 = vld [vmem:[%s8446_s26 + $0x1580] ss:$48 sps:$4 sm:$0xff]   ;;  %v8335_v23 = vld [vmem:[%s8446_s26 + $0x1588] ss:$48 sps:$4 sm:$0xff]  }
 0x2de   : > { %v8368_v53 = vld [vmem:[%s8446_s26 + $0x17c0] ss:$48 sps:$4 sm:$0xff]  }
 0x2e0   : > { %5760 = vmatpush1.bf16.msra.mxu0 %v8296_v6  ;;  %5924 = vmatpush1.bf16.msra.mxu1 %v8299_v42  ;;  %v8343_v6 = vld [vmem:[%s8446_s26 + $0x15ec] ss:$48 sps:$4 sm:$0xff]   ;;  %v8338_v42 = vld [vmem:[%s8446_s26 + $0x15e0] ss:$48 sps:$4 sm:$0xff]  }
 0x2e1   : > { %5761 = vmatprep.subr.bf16.mxu0 %v8304_v27  ;;  %5925 = vmatprep.subr.bf16.mxu1 %v8307_v29  ;;  %v8349_v27 = vld [vmem:[%s8446_s26 + $0x164c] ss:$48 sps:$4 sm:$0xff]   ;;  %v8344_v29 = vld [vmem:[%s8446_s26 + $0x1640] ss:$48 sps:$4 sm:$0xff]  }
 0x2e4   : > { %5762 = vmatpush1.bf16.msra.mxu0 %v8302_v35  ;;  %5926 = vmatpush1.bf16.msra.mxu1 %v8305_v36  ;;  %v8355_v35 = vld [vmem:[%s8446_s26 + $0x16ac] ss:$48 sps:$4 sm:$0xff]   ;;  %v8350_v36 = vld [vmem:[%s8446_s26 + $0x16a0] ss:$48 sps:$4 sm:$0xff]  }
 0x2e5   : > { %5763 = vmatprep.subr.bf16.mxu0 %v8310_v21  ;;  %5927 = vmatprep.subr.bf16.mxu1 %v8313_v39  ;;  %v8353_v21 = vld [vmem:[%s8446_s26 + $0x16a8] ss:$48 sps:$4 sm:$0xff]   ;;  %v8358_v39 = vld [vmem:[%s8446_s26 + $0x1704] ss:$48 sps:$4 sm:$0xff]  }
 0x2e6   : > { %v5459_v43 = vpop.f32.mrb[4].mxu0  ;;  %v9332_v52 = vpop.f32.mrb[4].mxu1 }
 0x2e7   : > { %v9336_v54 = vadd.f32 %v5459_v43, %v1035_v46  ;;  %v5461_v55 = vpop.f32.mrb[5].mxu0  ;;  %v9338_v56 = vpop.f32.mrb[5].mxu1  ;;  %v8356_v46 = vld [vmem:[%s8446_s26 + $0x1700] ss:$48 sps:$4 sm:$0xff]   ;;  %v8373_v43 = vld [vmem:[%s8446_s26 + $0x17cc] ss:$48 sps:$4 sm:$0xff]  }
 0x2e8   : > { %v9341_v58 = vadd.f32 %v5461_v55, %v1039_v48  ;;  %v5463_v59 = vpop.f32.mrb[6].mxu0  ;;  %v5627_v60 = vpop.f32.mrb[6].mxu1  ;;  %5764 = vmatpush1.bf16.msra.mxu0 %v8308_v49  ;;  %5928 = vmatpush1.bf16.msra.mxu1 %v8311_v50  ;;  %v8364_v48 = vld [vmem:[%s8446_s26 + $0x1764] ss:$48 sps:$4 sm:$0xff]   ;;  %v8367_v49 = vld [vmem:[%s8446_s26 + $0x176c] ss:$48 sps:$4 sm:$0xff]  }
 0x2e9   : > { %v5966_v62 = vsel %vm5958_vm0, %v9336_v54, 0.0  ;;  %v5464_v63 = vpop.f32.mrb[7].mxu0  ;;  %v5628_v0 = vpop.f32.mrb[7].mxu1  ;;  %5765 = vmatprep.subr.bf16.mxu0 %v8316_v51  ;;  %5929 = vmatprep.subr.bf16.mxu1 %v8319_v16  ;;  %v8362_v50 = vld [vmem:[%s8446_s26 + $0x1760] ss:$48 sps:$4 sm:$0xff]  }
 0x2ea   : > { %v5967_v1 = vadd.f32 %v5966_v62, %v5965_v57  ;;  %v5968_v7 = vsel %vm5958_vm0, %v9341_v58, 0.0  ;;  %v8365_v51 = vld [vmem:[%s8446_s26 + $0x1768] ss:$48 sps:$4 sm:$0xff]   ;;  %v8370_v16 = vld [vmem:[%s8446_s26 + $0x17c4] ss:$48 sps:$4 sm:$0xff]  }
 0x2eb   : > { %v8371_v55 = vld [vmem:[%s8446_s26 + $0x17c8] ss:$48 sps:$4 sm:$0xff]  }
 0x2ec   : > { %5766 = vmatpush1.bf16.msra.mxu0 %v8314_v19  ;;  %5930 = vmatpush1.bf16.msra.mxu1 %v8317_v61  ;;  %v5969_v9 = vadd.f32 %v5968_v7, %v5967_v1 }
 0x2ed   : > { %5767 = vmatprep.subr.bf16.mxu0 %v8322_v22  ;;  %5931 = vmatprep.subr.bf16.mxu1 %v8325_v28 }
 0x2ee   : > { %5970 = vadd.xlane.f32.xlu0 %v5969_v9 }
 0x2f0   : > { %5768 = vmatpush1.bf16.msra.mxu0 %v8320_v10  ;;  %5932 = vmatpush1.bf16.msra.mxu1 %v8323_v11 }
 0x2f1   : > { %5769 = vmatprep.subr.bf16.mxu0 %v8328_v12  ;;  %5933 = vmatprep.subr.bf16.mxu1 %v8331_v13 }
 0x2f4   : > { %5770 = vmatpush1.bf16.msra.mxu0 %v8326_v14  ;;  %5934 = vmatpush1.bf16.msra.mxu1 %v8329_v15  ;;  %v1042_v15 = vsub.s32 6, %v8432_v3 }
 0x2f5   : > { %5771 = vmatprep.subr.bf16.mxu0 %v8334_v17  ;;  %5935 = vmatprep.subr.bf16.mxu1 %v8337_v18  ;;  %v1046_v17 = vsub.s32 7, %v8432_v3 }
 0x2f6   : > { %v1043_v18 = vrot.slane %v9264_v31, %v1042_v15 }
 0x2f8   : > { %5772 = vmatpush1.bf16.msra.mxu0 %v8332_v41  ;;  %5936 = vmatpush1.bf16.msra.mxu1 %v8335_v23  ;;  %v1047_v41 = vrot.slane %v9264_v31, %v1046_v17  ;;  %v1013_v23 = vld [vmem:[%s9251_s30 + $0x8] sm:$0xf] }
 0x2f9   : > { %5773 = vmatprep.subr.bf16.mxu0 %v8340_v5  ;;  %5937 = vmatprep.subr.bf16.mxu1 %v8343_v6  ;;  %v9428_v5 = vadd.f32 %v9332_v52, %v1043_v18 }
 0x2fa   : > { %v9431_v6 = vadd.f32 %v9338_v56, %v1047_v41  ;;  %v1063_v56 = vrot.slane %v1013_v23, %v9294_v24 }
 0x2fc   : > { %5774 = vmatpush1.bf16.msra.mxu0 %v8338_v42  ;;  %5938 = vmatpush1.bf16.msra.mxu1 %v8341_v25  ;;  %v1051_v42 = vrot.slane %v1013_v23, %v9256_v2  ;;  %v1055_v25 = vrot.slane %v1013_v23, %v9259_v4 }
 0x2fd   : > { %5775 = vmatprep.subr.bf16.mxu0 %v8346_v26  ;;  %5939 = vmatprep.subr.bf16.mxu1 %v8349_v27  ;;  %v6119_v26 = vsel %vm5958_vm0, %v9428_v5, 0.0  ;;  %v6120_v27 = vsel %vm5958_vm0, %v9431_v6, 0.0 }
 0x300   : > { %5776 = vmatpush1.bf16.msra.mxu0 %v8344_v29  ;;  %5940 = vmatpush1.bf16.msra.mxu1 %v8347_v32  ;;  %v1059_v29 = vrot.slane %v1013_v23, %v9279_v38 }
 0x301   : > { %5777 = vmatprep.subr.bf16.mxu0 %v8352_v34  ;;  %5941 = vmatprep.subr.bf16.mxu1 %v8355_v35 }
 0x304   : > { %5778 = vmatpush1.bf16.msra.mxu0 %v8350_v36  ;;  %5942 = vmatpush1.bf16.msra.mxu1 %v8353_v21  ;;  %v6121_v36 = vadd.f32 %v6120_v27, %v6119_v26 }
 0x305   : > { %5779 = vmatprep.subr.bf16.mxu0 %v8358_v39  ;;  %5943 = vmatprep.subr.bf16.mxu1 %v8361_v40 }
 0x308   : > { %5780 = vmatpush1.bf16.msra.mxu0 %v8356_v46  ;;  %5944 = vmatpush1.bf16.msra.mxu1 %v8359_v47 }
 0x309   : > { %5781 = vmatprep.subr.bf16.mxu0 %v8364_v48  ;;  %5945 = vmatprep.subr.bf16.mxu1 %v8367_v49 }
 0x30c   : > { %5782 = vmatpush1.bf16.msra.mxu0 %v8362_v50  ;;  %5946 = vmatpush1.bf16.msra.mxu1 %v8365_v51 }
 0x30d   : > { %5783 = vmatprep.subr.bf16.mxu0 %v8370_v16  ;;  %5947 = vmatprep.subr.bf16.mxu1 %v8373_v43 }
 0x310   : > { %5784 = vmatpush1.bf16.msra.mxu0 %v8368_v53  ;;  %5948 = vmatpush1.bf16.msra.mxu1 %v8371_v55 }
 0x313   : > { %5786 = vmatmul.mubr.bf16.vlgmr.msra.gmra.mrb[8].mxu0 %v8761_v44  ;;  %5950 = vmatmul.mubr.bf16.vlgmr.msra.gmra.mrb[8].mxu1 %v8761_v44 }
 0x37b   : > { %v5971_v19 = vpop.xlane.xlu0 %5970 }
 0x37c   : > { %v5973_v57 = vmul.f32 0.0013020834, %v5971_v19 }
 0x37e   : > { %v9387_v59 = vsub.f32 %v9284_v20, %v5973_v57  ;;  %v9390_v60 = vsub.f32 %v9287_v8, %v5973_v57  ;;  %v9393_v61 = vsub.f32 %v9305_v30, %v5973_v57  ;;  %v9396_v22 = vsub.f32 %v9322_v45, %v5973_v57 }
 0x37f   : > { %v9399_v62 = vsub.f32 %v9336_v54, %v5973_v57  ;;  %v9408_v8 = vsub.f32 %v9341_v58, %v5973_v57 }
 0x380   : > { %v5980_v44 = vmul.f32 %v9387_v59, %v9387_v59  ;;  %v5981_v63 = vmul.f32 %v9390_v60, %v9390_v60  ;;  %v5982_v20 = vmul.f32 %v9393_v61, %v9393_v61  ;;  %v5983_v30 = vmul.f32 %v9396_v22, %v9396_v22 }
 0x381   : > { %v5984_v28 = vmul.f32 %v9399_v62, %v9399_v62  ;;  %v5985_v9 = vmul.f32 %v9408_v8, %v9408_v8 }
 0x382   : > { %v5986_v45 = vsel %vm5958_vm0, %v5980_v44, 0.0  ;;  %v5987_v54 = vsel %vm5958_vm0, %v5981_v63, 0.0  ;;  %v5989_v1 = vsel %vm5958_vm0, %v5982_v20, 0.0  ;;  %v5991_v58 = vsel %vm5958_vm0, %v5983_v30, 0.0  ;;  %v6008_v30 = vld [vmem:[%s9540_s3] sm:$0x3f] }
 0x383   : > { %v5988_v0 = vadd.f32 %v5987_v54, %v5986_v45  ;;  %v5993_v11 = vsel %vm5958_vm0, %v5984_v28, 0.0  ;;  %v5995_v13 = vsel %vm5958_vm0, %v5985_v9, 0.0  ;;  %v6046_v45 = vld [vmem:[%s9541_s4] sm:$0x3f]  ;;  %v8387_v54 = vmov 1983009808  }
 0x384   : > { %v6013_v28 = vrot.slane %v6008_v30, %v9256_v2  ;;  %v6025_v9 = vrot.slane %v6008_v30, %v9294_v24  ;;  %v6033_v15 = vrot.slane %v6008_v30, %v9315_v37  ;;  %v6071_v26 = vrot.slane %v6046_v45, %v9315_v37 }
 0x385   : > { %v5990_v7 = vadd.f32 %v5989_v1, %v5988_v0  ;;  %v6093_v0 = vunpack.c.l.s4 %v8387_v54  ;;  %v6017_v1 = vrot.slane %v6008_v30, %v9259_v4 }
 0x387   : > { %v5992_v10 = vadd.f32 %v5991_v58, %v5990_v7  ;;  %v6021_v7 = vrot.slane %v6008_v30, %v9279_v38  ;;  %v6029_v58 = vrot.slane %v6008_v30, %v9310_v33  ;;  %v6094_v17 = vunpack.c.0.s8 %v6093_v0 }
 0x389   : > { %v5994_v12 = vadd.f32 %v5993_v11, %v5992_v10  ;;  %v6051_v10 = vrot.slane %v6046_v45, %v9256_v2  ;;  %v6055_v11 = vrot.slane %v6046_v45, %v9259_v4 }
 0x38b   : > { %v5996_v14 = vadd.f32 %v5995_v13, %v5994_v12  ;;  %v6059_v13 = vrot.slane %v6046_v45, %v9279_v38 }
 0x38d   : > { %5997 = vadd.xlane.f32.xlu1 %v5996_v14  ;;  %v6063_v14 = vrot.slane %v6046_v45, %v9294_v24 }
 0x3e6   : > { %v5787_v31 = vpop.f32.mrb[8].mxu0  ;;  %v5951_v32 = vpop.f32.mrb[8].mxu1 }
 0x3e7   : > { %v9440_v34 = vadd.f32 %v5787_v31, %v1051_v42  ;;  %v5789_v52 = vpop.f32.mrb[9].mxu0  ;;  %v5953_v35 = vpop.f32.mrb[9].mxu1  ;;  %v9447_v47 = vadd.f32 %v5951_v32, %v1059_v29 }
 0x3e8   : > { %v9443_v21 = vadd.f32 %v5789_v52, %v1055_v25  ;;  %v5791_v39 = vpop.f32.mrb[10].mxu0  ;;  %v5955_v40 = vpop.f32.mrb[10].mxu1  ;;  %v9451_v16 = vadd.f32 %v5953_v35, %v1063_v56  ;;  %v6067_v25 = vrot.slane %v6046_v45, %v9310_v33 }
 0x3e9   : > { %v6122_v46 = vsel %vm5958_vm0, %v9440_v34, 0.0  ;;  %v5792_v48 = vpop.f32.mrb[11].mxu0  ;;  %v5956_v49 = vpop.f32.mrb[11].mxu1  ;;  %v6126_v53 = vsel %vm5958_vm0, %v9447_v47, 0.0 }
 0x3ea   : > { %v6123_v50 = vadd.f32 %v6122_v46, %v6121_v36  ;;  %v6124_v51 = vsel %vm5958_vm0, %v9443_v21, 0.0  ;;  %v6128_v19 = vsel %vm5958_vm0, %v9451_v16, 0.0 }
 0x3ec   : > { %v6125_v43 = vadd.f32 %v6124_v51, %v6123_v50 }
 0x3ee   : > { %v6127_v55 = vadd.f32 %v6126_v53, %v6125_v43 }
 0x3f0   : > { %v6129_v57 = vadd.f32 %v6128_v19, %v6127_v55 }
 0x3f2   : > { %6130 = vadd.xlane.f32.xlu0 %v6129_v57 }
 0x41a   : > { %v5998_v44 = vpop.xlane.xlu1 %5997 }
 0x41b   : > { %v5999_v63 = vmul.f32 0.0013020834, %v5998_v44 }
 0x41d   : > { %v6000_v20 = vadd.f32 1e-05, %v5999_v63 }
 0x41f   : > { %8374 = vrsqrt.f32 %v6000_v20 }
 0x429   : > { %v8375_v12 = vpop.eup %8374 }
 0x42a   : > { %v6002_v18 = vmul.f32 %v8375_v12, %v9387_v59  ;;  %v6003_v41 = vmul.f32 %v8375_v12, %v9390_v60  ;;  %v6004_v23 = vmul.f32 %v8375_v12, %v9393_v61  ;;  %v6005_v42 = vmul.f32 %v8375_v12, %v9396_v22 }
 0x42b   : > { %v6006_v27 = vmul.f32 %v8375_v12, %v9399_v62  ;;  %v6007_v29 = vmul.f32 %v8375_v12, %v9408_v8  ;;  %v9489_v59 = vsub.s32 %v6094_v17, %v8432_v3 }
 0x42c   : > { %v6040_v31 = vmul.f32 %v6013_v28, %v6002_v18  ;;  %v6041_v32 = vmul.f32 %v6017_v1, %v6003_v41  ;;  %v6042_v52 = vmul.f32 %v6021_v7, %v6004_v23  ;;  %v6043_v56 = vmul.f32 %v6025_v9, %v6005_v42 }
 0x42d   : > { %v6044_v60 = vmul.f32 %v6029_v58, %v6006_v27  ;;  %v6045_v61 = vmul.f32 %v6033_v15, %v6007_v29  ;;  %v6205_v15 = vld [vmem:[%s9541_s4] sm:$0x3f] }
 0x42e   : > { %v6078_v35 = vadd.f32 %v6051_v10, %v6040_v31  ;;  %v6079_v22 = vadd.f32 %v6055_v11, %v6041_v32  ;;  %v6080_v36 = vadd.f32 %v6059_v13, %v6042_v52  ;;  %v6081_v39 = vadd.f32 %v6063_v14, %v6043_v56  ;;  %v6167_v14 = vld [vmem:[%s9540_s3] sm:$0x3f] }
 0x42f   : > { %v6082_v40 = vadd.f32 %v6067_v25, %v6044_v60  ;;  %v6083_v46 = vadd.f32 %v6071_v26, %v6045_v61  ;;  %v6172_v17 = vrot.slane %v6167_v14, %v9256_v2  ;;  %v6176_v18 = vrot.slane %v6167_v14, %v9259_v4 }
 0x430   : > { %v6090_v62 = vcombine.low %v6078_v35, %v6079_v22  ;;  %v6091_v8 = vcombine.low %v6080_v36, %v6081_v39  ;;  %v6180_v41 = vrot.slane %v6167_v14, %v9279_v38  ;;  %v6184_v23 = vrot.slane %v6167_v14, %v9294_v24 }
 0x431   : > { %v6107_v48 = vcombine.low %v6082_v40, %v6083_v46  ;;  %v6188_v42 = vrot.slane %v6167_v14, %v9310_v33  ;;  %v6210_v25 = vrot.slane %v6205_v15, %v9256_v2  ;;  %v6214_v27 = vrot.slane %v6205_v15, %v9259_v4 }
 0x432   : > { %v6098_v3 = vrot.slane %v6090_v62, %v9489_v59  ;;  %v6105_v49 = vrot.slane %v6091_v8, %v9489_v59  ;;  %v6218_v29 = vrot.slane %v6205_v15, %v9279_v38  ;;  %v6222_v31 = vrot.slane %v6205_v15, %v9294_v24 }
 0x433   : > { %7121 = vst.sshfl [vmem:[%s9494_s15 + $0x8] sm:$0x33 pattern:$0x76325410] %v6107_v48  ;;  %v6192_v32 = vrot.slane %v6167_v14, %v9315_v37  ;;  %v6226_v35 = vrot.slane %v6205_v15, %v9310_v33  ;;  %v6230_v22 = vrot.slane %v6205_v15, %v9315_v37 }
 0x434   : > { %v6106_v50 = vcombine.low %v6098_v3, %v6105_v49 }
 0x436   : > { %6117 = vst [vmem:[%s9494_s15] sm:$0xff] %v6106_v50 }
 0x47f   : > { %v6131_v51 = vpop.xlane.xlu0 %6130 }
 0x480   : > { %v6132_v43 = vmul.f32 0.0013020834, %v6131_v51 }
 0x482   : > { %v6133_v53 = vsub.f32 %v9428_v5, %v6132_v43  ;;  %v6134_v55 = vsub.f32 %v9431_v6, %v6132_v43  ;;  %v6135_v19 = vsub.f32 %v9440_v34, %v6132_v43  ;;  %v6136_v57 = vsub.f32 %v9443_v21, %v6132_v43 }
 0x483   : > { %v6137_v44 = vsub.f32 %v9447_v47, %v6132_v43  ;;  %v6138_v45 = vsub.f32 %v9451_v16, %v6132_v43 }
 0x484   : > { %v6139_v63 = vmul.f32 %v6133_v53, %v6133_v53  ;;  %v6140_v20 = vmul.f32 %v6134_v55, %v6134_v55  ;;  %v6141_v30 = vmul.f32 %v6135_v19, %v6135_v19  ;;  %v6142_v54 = vmul.f32 %v6136_v57, %v6136_v57 }
 0x485   : > { %v6143_v5 = vmul.f32 %v6137_v44, %v6137_v44  ;;  %v6144_v34 = vmul.f32 %v6138_v45, %v6138_v45 }
 0x486   : > { %v6145_v0 = vsel %vm5958_vm0, %v6139_v63, 0.0  ;;  %v6146_v28 = vsel %vm5958_vm0, %v6140_v20, 0.0  ;;  %v6148_v6 = vsel %vm5958_vm0, %v6141_v30, 0.0  ;;  %v6150_v21 = vsel %vm5958_vm0, %v6142_v54, 0.0 }
 0x487   : > { %v6147_v1 = vadd.f32 %v6146_v28, %v6145_v0  ;;  %v6152_v47 = vsel %vm5958_vm0, %v6143_v5, 0.0  ;;  %v6154_v10 = vsel %vm5958_vm0, %v6144_v34, 0.0 }
 0x489   : > { %v6149_v7 = vadd.f32 %v6148_v6, %v6147_v1 }
 0x48b   : > { %v6151_v9 = vadd.f32 %v6150_v21, %v6149_v7 }
 0x48d   : > { %v6153_v58 = vadd.f32 %v6152_v47, %v6151_v9 }
 0x48f   : > { %v6155_v16 = vadd.f32 %v6154_v10, %v6153_v58 }
 0x491   : > { %6156 = vadd.xlane.f32.xlu1 %v6155_v16 }
 0x51e   : > { %v6157_v11 = vpop.xlane.xlu1 %6156 }
 0x51f   : > { %v6158_v12 = vmul.f32 0.0013020834, %v6157_v11 }
 0x521   : > { %v6159_v13 = vadd.f32 1e-05, %v6158_v12 }
 0x523   : > { %8376 = vrsqrt.f32 %v6159_v13 }
 0x52d   : > { %v8377_v26 = vpop.eup %8376 }
 0x52e   : > { %v6161_v52 = vmul.f32 %v8377_v26, %v6133_v53  ;;  %v6162_v56 = vmul.f32 %v8377_v26, %v6134_v55  ;;  %v6163_v60 = vmul.f32 %v8377_v26, %v6135_v19  ;;  %v6164_v61 = vmul.f32 %v8377_v26, %v6136_v57 }
 0x52f   : > { %v6165_v36 = vmul.f32 %v8377_v26, %v6137_v44  ;;  %v6166_v39 = vmul.f32 %v8377_v26, %v6138_v45 }
 0x530   : > { %v6199_v2 = vmul.f32 %v6172_v17, %v6161_v52  ;;  %v6200_v40 = vmul.f32 %v6176_v18, %v6162_v56  ;;  %v6201_v4 = vmul.f32 %v6180_v41, %v6163_v60  ;;  %v6202_v46 = vmul.f32 %v6184_v23, %v6164_v61 }
 0x531   : > { %v6203_v38 = vmul.f32 %v6188_v42, %v6165_v36  ;;  %v6204_v24 = vmul.f32 %v6192_v32, %v6166_v39 }
 0x532   : > { %v6237_v62 = vadd.f32 %v6210_v25, %v6199_v2  ;;  %v6238_v8 = vadd.f32 %v6214_v27, %v6200_v40  ;;  %v6239_v48 = vadd.f32 %v6218_v29, %v6201_v4  ;;  %v6240_v3 = vadd.f32 %v6222_v31, %v6202_v46 }
 0x533   : > { %v6241_v49 = vadd.f32 %v6226_v35, %v6203_v38  ;;  %v6242_v50 = vadd.f32 %v6230_v22, %v6204_v24 }
 0x534   : > { %v6249_v51 = vcombine.low %v6237_v62, %v6238_v8  ;;  %v6250_v33 = vcombine.low %v6239_v48, %v6240_v3 }
 0x535   : > { %v6266_v43 = vcombine.low %v6241_v49, %v6242_v50 }
 0x536   : > { %v6257_v37 = vrot.slane %v6249_v51, %v9489_v59  ;;  %v6264_v53 = vrot.slane %v6250_v33, %v9489_v59 }
 0x537   : > { %7122 = vst.sshfl [vmem:[%s9494_s15 + $0x14] sm:$0x33 pattern:$0x76325410] %v6266_v43 }
 0x538   : > { %v6265_v55 = vcombine.low %v6257_v37, %v6264_v53 }
 0x53a   : > { %6276 = vst [vmem:[%s9494_s15 + $0xc] sm:$0xff] %v6265_v55 }
 0x53b PF: > { %s15_s18 = sadd.s32 1, %s8384_s18  }
 0x53c   : > { %p12_p5 = scmp.ge.s32.totalorder %s15_s18, 4  }
 0x53e   :  { %14 = sbr.rel (!%p12_p5) target bundleno = 1 (0x1), region = 73 }

</bundles_post_ra>
